<compile_context>
chip_gen: v7x
topology: tpu7x:2x2x1
jax: 0.10.0
libtpu: 0.0.40
codegen_flags: <defaults>
</compile_context>

<pallas_src>
import functools

import jax
import jax.numpy as jnp
from jax import lax
from jax.experimental import pallas as pl
from jax.experimental.pallas import tpu as pltpu


# ----------------------------- VMEM / tiling helpers --------------------------


@functools.lru_cache(maxsize=1)
def _vmem_capacity():
    try:
        return int(pltpu.get_tpu_info().vmem_capacity_bytes)
    except Exception:                      # conservative fallback (v7x-sized)
        return 64 << 20


def _tile_budget():
    """Per-block VMEM budget: generous on 128 MiB parts (v5e/v6e), tight on v7x."""
    return (28 << 20) if _vmem_capacity() >= (96 << 20) else (12 << 20)


def _vmem_limit(block_bytes):
    cap = (_vmem_capacity() * 3) // 4
    return int(min(max(2 * block_bytes + (4 << 20), 16 << 20), cap))


def _choose_tile(S, bytes_per_col, batch=1, min_steps=8):
    """Largest lane tile (multiple of 128, divisor of S) within the VMEM budget
    while keeping >= min_steps grid steps so the DMA pipeline has work to hide."""
    assert S % 128 == 0
    cap = _tile_budget() // max(bytes_per_col, 1)
    cap = min(cap, max((S * batch) // min_steps, 128))
    cap = max((cap // 128) * 128, 128)
    if cap >= S:
        return S
    t = cap
    while t > 128:
        if S % t == 0:
            return t
        t -= 128
    return 128


def _choose_spec_fblk(Fp, Cin, Cout, batch=1, min_steps=4):
    """Frequency block: weight blocks fit VMEM (double-buffered real+imag),
    accumulators stay <= ~32 vregs, and the grid keeps a few pipeline steps."""
    assert Fp % 128 == 0
    cap = _tile_budget() // max(16 * Cin * Cout, 1)
    cap = min(cap, (16 << 10) // max(Cout, 1))
    cap = min(cap, max((Fp * batch) // min_steps, 128))
    cap = max((cap // 128) * 128, 128)
    if cap >= Fp:
        return Fp
    t = cap
    while t > 128:
        if Fp % t == 0:
            return t
        t -= 128
    return 128


def _pad_lanes(x, S):
    """Pad the trailing (lane) axis up to a multiple of 128 (no ragged fallback)."""
    pad = (-S) % 128
    if pad:
        x = jnp.pad(x, [(0, 0)] * (x.ndim - 1) + [(0, pad)])
    return x


# ----------------------------- Pallas kernels --------------------------------


def _pw_kernel(x_ref, w_ref, b_ref, o_ref):
    """Plain 1x1x1 conv: (Cout,Cin) @ (Cin,tile) + bias."""
    o_ref[0] = jnp.dot(w_ref[...], x_ref[0],
                       preferred_element_type=jnp.float32) + b_ref[...]


def _pe_stats_kernel(v_ref, pe_ref, o_ref):
    """Pass 1 of GroupNorm: per-batch sum / sum-of-squares of (v + pe), tiled
    over S ('arbitrary' reduction axis), accumulated in the resident out block."""
    j = pl.program_id(1)

    @pl.when(j == 0)
    def _():
        o_ref[...] = jnp.zeros_like(o_ref)

    x = v_ref[0] + pe_ref[...]                       # (1,tile) + (C,tile) -> (C,tile)
    o_ref[0, 0:1, :] += jnp.sum(x, keepdims=True)
    o_ref[0, 1:2, :] += jnp.sum(x * x, keepdims=True)


def _pe_norm_proj_kernel(v_ref, pe_ref, scale_ref, shift_ref, w_ref, wb_ref, o_ref):
    """Pass 2: re-add PE, apply folded per-(batch,channel) affine, proj conv."""
    x = v_ref[0] + pe_ref[...]                       # (C, tile)
    xn = x * scale_ref[0] + shift_ref[0]             # (C,1) broadcasts along lanes
    o_ref[0] = jnp.dot(w_ref[...], xn,
                       preferred_element_type=jnp.float32) + wb_ref[...]


def _fused_layer_kernel(x_ref, x1_ref, ww_ref, wb_ref, m1w_ref, m1b_ref,
                        m2w_ref, m2b_ref, o_ref, h_ref):
    """out = ReLU( mlp2(ReLU(mlp1(x1))) + (W @ x + b_w) ).

    The W-path is computed last so its (C, tile) result is not held live across
    the two MLP matmuls (shorter live range -> fewer spills at large tiles)."""
    h_ref[...] = jnp.maximum(
        jnp.dot(m1w_ref[...], x1_ref[0],
                preferred_element_type=jnp.float32) + m1b_ref[...], 0.0)
    y = jnp.dot(m2w_ref[...], h_ref[...],
                preferred_element_type=jnp.float32) + m2b_ref[...]
    y = y + jnp.dot(ww_ref[...], x_ref[0],
                    preferred_element_type=jnp.float32) + wb_ref[...]
    o_ref[0] = jnp.maximum(y, 0.0)


def _fused_mlp_res_kernel(x1_ref, r_ref, m1w_ref, m1b_ref, m2w_ref, m2b_ref,
                          o_ref, h_ref):
    """out = ReLU( mlp2(ReLU(mlp1(x1))) + residual )."""
    h_ref[...] = jnp.maximum(
        jnp.dot(m1w_ref[...], x1_ref[0],
                preferred_element_type=jnp.float32) + m1b_ref[...], 0.0)
    y = jnp.dot(m2w_ref[...], h_ref[...],
                preferred_element_type=jnp.float32) + m2b_ref[...] + r_ref[0]
    o_ref[0] = jnp.maximum(y, 0.0)


def _spec_kernel(ar_ref, ai_ref, wr_ref, wi_ref, or_ref, oi_ref):
    """Complex 'bif,iof->bof' on the VPU, one frequency block at a time.

    fori_loop (bounded unroll) over Cin bounds code size / vreg pressure; the
    dynamic channel index stays on leading (untiled) ref axes."""
    Cin, Cout, Fblk = wr_ref.shape

    def body(i, carry):
        acc_r, acc_i = carry
        xr = ar_ref[0, i]                            # (1, Fblk)
        xi = ai_ref[0, i]
        yr = wr_ref[i]                               # (Cout, Fblk)
        yi = wi_ref[i]
        # TODO(synk): the (1,Fblk)->(Cout,Fblk) broadcast could be a stride-0
        #             sublane-broadcast load; kept as a VPU broadcast here.
        acc_r = acc_r + xr * yr - xi * yi
        acc_i = acc_i + xr * yi + xi * yr
        return acc_r, acc_i

    init = (jnp.zeros((Cout, Fblk), jnp.float32),
            jnp.zeros((Cout, Fblk), jnp.float32))
    acc_r, acc_i = lax.fori_loop(0, Cin, body, init, unroll=min(Cin, 8))
    or_ref[0] = acc_r
    oi_ref[0] = acc_i


# ----------------------------- kernel wrappers --------------------------------


def pointwise_conv3d(x, w, b):
    """1x1x1 Conv3d as channel matmul. x: (B,Cin,S), w: (Cout,Cin), b: (Cout,)."""
    B, Cin, S = x.shape
    Cout = w.shape[0]
    Sp = S + ((-S) % 128)
    xp = _pad_lanes(x, S)
    tile = _choose_tile(Sp, 8 * (Cin + Cout), batch=B)
    grid = (B, Sp // tile)
    out = pl.pallas_call(
        _pw_kernel,
        out_shape=jax.ShapeDtypeStruct((B, Cout, Sp), jnp.float32),
        grid=grid,
        in_specs=[pl.BlockSpec((1, Cin, tile), lambda i, j: (i, 0, j)),
                  pl.BlockSpec((Cout, Cin), lambda i, j: (0, 0)),
                  pl.BlockSpec((Cout, 1), lambda i, j: (0, 0))],
        out_specs=pl.BlockSpec((1, Cout, tile), lambda i, j: (i, 0, j)),
        compiler_params=pltpu.CompilerParams(
            dimension_semantics=("parallel", "parallel"),
            vmem_limit_bytes=_vmem_limit(4 * tile * (Cin + Cout))),
    )(xp, w, b.reshape(Cout, 1))
    return out if Sp == S else out[..., :S]


def lifting_head(v, pe, gamma, beta, proj_w, proj_b, eps=1e-7):
    """Fused PE-add + GroupNorm(1 group) + proj conv, tiled over S (two passes)."""
    B, _, S = v.shape
    C = pe.shape[0]
    Cout = proj_w.shape[0]
    Sp = S + ((-S) % 128)
    vp = _pad_lanes(v, S)            # zero padding contributes 0 to the stats
    pep = _pad_lanes(pe, S)

    # ---- pass 1: per-batch sum / sum-of-squares ------------------------------
    tile = _choose_tile(Sp, 8 * (1 + C), batch=B)
    stats = pl.pallas_call(
        _pe_stats_kernel,
        out_shape=jax.ShapeDtypeStruct((B, 2, 128), jnp.float32),
        grid=(B, Sp // tile),
        in_specs=[pl.BlockSpec((1, 1, tile), lambda b, j: (b, 0, j)),
                  pl.BlockSpec((C, tile), lambda b, j: (0, j))],
        out_specs=pl.BlockSpec((1, 2, 128), lambda b, j: (b, 0, 0)),
        compiler_params=pltpu.CompilerParams(
            dimension_semantics=("parallel", "arbitrary"),
            vmem_limit_bytes=_vmem_limit(4 * tile * (1 + C))),
    )(vp, pep)

    n = float(C * S)
    mean = stats[:, 0, 0] / n
    # TODO(synk): single-pass variance (E[x^2]-E[x]^2); switch to a centered
    #             second pass if |mean| ever dominates the std.
    var = stats[:, 1, 0] / n - mean * mean
    inv = lax.rsqrt(var + eps)
    scale = inv[:, None] * gamma[None, :]             # (B, C)
    shift = beta[None, :] - mean[:, None] * scale     # (B, C)

    # ---- pass 2: normalize + proj conv, tiled over S --------------------------
    tile2 = _choose_tile(Sp, 8 * (1 + C + Cout), batch=B)
    out = pl.pallas_call(
        _pe_norm_proj_kernel,
        out_shape=jax.ShapeDtypeStruct((B, Cout, Sp), jnp.float32),
        grid=(B, Sp // tile2),
        in_specs=[pl.BlockSpec((1, 1, tile2), lambda b, j: (b, 0, j)),
                  pl.BlockSpec((C, tile2), lambda b, j: (0, j)),
                  pl.BlockSpec((1, C, 1), lambda b, j: (b, 0, 0)),
                  pl.BlockSpec((1, C, 1), lambda b, j: (b, 0, 0)),
                  pl.BlockSpec((Cout, C), lambda b, j: (0, 0)),
                  pl.BlockSpec((Cout, 1), lambda b, j: (0, 0))],
        out_specs=pl.BlockSpec((1, Cout, tile2), lambda b, j: (b, 0, j)),
        compiler_params=pltpu.CompilerParams(
            dimension_semantics=("parallel", "parallel"),
            vmem_limit_bytes=_vmem_limit(4 * tile2 * (1 + C + Cout))),
    )(vp, pep, scale.reshape(B, C, 1), shift.reshape(B, C, 1),
      proj_w, proj_b.reshape(Cout, 1))
    return out if Sp == S else out[..., :S]


def lifting_mlp_residual(x1, res, m1w, m1b, m2w, m2b):
    """v = ReLU(res + mlp2(ReLU(mlp1(x1)))) fused into one kernel."""
    B, C, S = x1.shape
    ce = m1w.shape[0]
    Sp = S + ((-S) % 128)
    x1p = _pad_lanes(x1, S)
    resp = _pad_lanes(res, S)
    tile = _choose_tile(Sp, 8 * 3 * C + 4 * ce, batch=B)
    xs = pl.BlockSpec((1, C, tile), lambda i, j: (i, 0, j))
    out = pl.pallas_call(
        _fused_mlp_res_kernel,
        out_shape=jax.ShapeDtypeStruct((B, C, Sp), jnp.float32),
        grid=(B, Sp // tile),
        in_specs=[xs, xs,
                  pl.BlockSpec((ce, C), lambda i, j: (0, 0)),
                  pl.BlockSpec((ce, 1), lambda i, j: (0, 0)),
                  pl.BlockSpec((C, ce), lambda i, j: (0, 0)),
                  pl.BlockSpec((C, 1), lambda i, j: (0, 0))],
        out_specs=xs,
        scratch_shapes=[pltpu.VMEM((ce, tile), jnp.float32)],
        compiler_params=pltpu.CompilerParams(
            dimension_semantics=("parallel", "parallel"),
            vmem_limit_bytes=_vmem_limit(4 * tile * (3 * C + ce))),
    )(x1p, resp, m1w, m1b.reshape(ce, 1), m2w, m2b.reshape(C, 1))
    return out if Sp == S else out[..., :S]


def fourier_layer_epilogue(x, x1, ww, wb, m1w, m1b, m2w, m2b):
    """v' = ReLU(mlp2(ReLU(mlp1(x1))) + W(x)) fused into one kernel."""
    B, C, S = x.shape
    ce = m1w.shape[0]
    Sp = S + ((-S) % 128)
    xp = _pad_lanes(x, S)
    x1p = _pad_lanes(x1, S)
    tile = _choose_tile(Sp, 8 * 3 * C + 4 * ce, batch=B)
    xs = pl.BlockSpec((1, C, tile), lambda i, j: (i, 0, j))
    out = pl.pallas_call(
        _fused_layer_kernel,
        out_shape=jax.ShapeDtypeStruct((B, C, Sp), jnp.float32),
        grid=(B, Sp // tile),
        in_specs=[xs, xs,
                  pl.BlockSpec((C, C), lambda i, j: (0, 0)),
                  pl.BlockSpec((C, 1), lambda i, j: (0, 0)),
                  pl.BlockSpec((ce, C), lambda i, j: (0, 0)),
                  pl.BlockSpec((ce, 1), lambda i, j: (0, 0)),
                  pl.BlockSpec((C, ce), lambda i, j: (0, 0)),
                  pl.BlockSpec((C, 1), lambda i, j: (0, 0))],
        out_specs=xs,
        scratch_shapes=[pltpu.VMEM((ce, tile), jnp.float32)],
        compiler_params=pltpu.CompilerParams(
            dimension_semantics=("parallel", "parallel"),
            vmem_limit_bytes=_vmem_limit(4 * tile * (3 * C + ce))),
    )(xp, x1p, ww, wb.reshape(C, 1), m1w, m1b.reshape(ce, 1), m2w, m2b.reshape(C, 1))
    return out if Sp == S else out[..., :S]


def _spectral_matmul(a_r, a_i, w_r, w_i):
    """Complex mix 'bif,iof->bof' with the truncated corners lane-dense on f.

    a_*: (B,Cin,1,Fp); w_*: (Cin,Cout,Fp); Fp a multiple of 128. Grid is
    (freq-blocks, batch) with batch innermost so each weight block is DMA'd once
    and reused across the batch (weights dominate the traffic here)."""
    B, Cin, _, Fp = a_r.shape
    Cout = w_r.shape[1]
    fblk = _choose_spec_fblk(Fp, Cin, Cout, batch=B)
    a_spec = pl.BlockSpec((1, Cin, 1, fblk), lambda f, b: (b, 0, 0, f))
    w_spec = pl.BlockSpec((Cin, Cout, fblk), lambda f, b: (0, 0, f))
    o_spec = pl.BlockSpec((1, Cout, fblk), lambda f, b: (b, 0, f))
    blk_bytes = 4 * fblk * (2 * Cin + 2 * Cin * Cout + 2 * Cout)
    return pl.pallas_call(
        _spec_kernel,
        out_shape=(jax.ShapeDtypeStruct((B, Cout, Fp), jnp.float32),
                   jax.ShapeDtypeStruct((B, Cout, Fp), jnp.float32)),
        grid=(Fp // fblk, B),
        in_specs=[a_spec, a_spec, w_spec, w_spec],
        out_specs=(o_spec, o_spec),
        compiler_params=pltpu.CompilerParams(
            dimension_semantics=("parallel", "parallel"),
            vmem_limit_bytes=_vmem_limit(blk_bytes)),
    )(a_r, a_i, w_r, w_i)


# --------------------------- spectral conv (JAX glue + Pallas core) -----------


def prepare_spectral_weight(w4, mx, my, mt):
    """Hoisted re-layout (done once at init): (4,Cin,Cout,mx,my,mt,2) ->
    lane-dense real/imag (Cin,Cout,Fp) with Fp padded to a multiple of 128."""
    w = w4.astype(jnp.float32)
    w_y0 = jnp.concatenate([w[0], w[1]], axis=2)      # iy = 0: x-low | x-high
    w_y1 = jnp.concatenate([w[2], w[3]], axis=2)      # iy = 1: x-low | x-high
    wf = jnp.concatenate([w_y0, w_y1], axis=3)        # (Cin,Cout,2mx,2my,mt,2)
    Cin, Cout = wf.shape[0], wf.shape[1]
    F = 4 * mx * my * mt
    wr = wf[..., 0].reshape(Cin, Cout, F)
    wi = wf[..., 1].reshape(Cin, Cout, F)
    pad = ((F + 127) // 128) * 128 - F
    if pad:
        wr = jnp.pad(wr, ((0, 0), (0, 0), (0, pad)))
        wi = jnp.pad(wi, ((0, 0), (0, 0), (0, pad)))
    return wr, wi


def spectral_conv_apply(vhat, wr, wi, mx, my, mt):
    """vhat: (B,Cin,NX,NY,NTF) complex64; wr/wi: precomputed (Cin,Cout,Fp)."""
    B, Cin, NX, NY, NTF = vhat.shape
    Cout = wr.shape[1]
    assert 2 * mx <= NX and 2 * my <= NY and mt <= NTF
    F = 4 * mx * my * mt
    Fp = wr.shape[2]
    assert Fp == ((F + 127) // 128) * 128

    # Gather all 4 retained corners into one contiguous (2mx,2my,mt) block.
    vx = jnp.concatenate([vhat[:, :, :mx], vhat[:, :, NX - mx:]], axis=2)
    vc = jnp.concatenate([vx[:, :, :, :my], vx[:, :, :, NY - my:]], axis=3)[..., :mt]
    a_r = jnp.real(vc).reshape(B, Cin, 1, F).astype(jnp.float32)
    a_i = jnp.imag(vc).reshape(B, Cin, 1, F).astype(jnp.float32)
    pad = Fp - F
    if pad:
        a_r = jnp.pad(a_r, ((0, 0), (0, 0), (0, 0), (0, pad)))
        a_i = jnp.pad(a_i, ((0, 0), (0, 0), (0, 0), (0, pad)))

    o_r, o_i = _spectral_matmul(a_r, a_i, wr, wi)
    o = lax.complex(o_r[..., :F], o_i[..., :F]).astype(vhat.dtype)
    o = o.reshape(B, Cout, 2 * mx, 2 * my, mt)

    # Scatter back: one pre-zeroed full-spectrum buffer + 4 in-place corner
    # updates (avoids re-materializing the full spectrum via concat/pad chains).
    out = jnp.zeros((B, Cout, NX, NY, NTF), vhat.dtype)
    xlo, xhi = o[:, :, :mx], o[:, :, mx:]
    out = lax.dynamic_update_slice(out, xlo[:, :, :, :my], (0, 0, 0, 0, 0))
    out = lax.dynamic_update_slice(out, xhi[:, :, :, :my], (0, 0, NX - mx, 0, 0))
    out = lax.dynamic_update_slice(out, xlo[:, :, :, my:], (0, 0, 0, NY - my, 0))
    out = lax.dynamic_update_slice(out, xhi[:, :, :, my:], (0, 0, NX - mx, NY - my, 0))
    return out


def spectral_convS(v, wr, wi, mx, my, mt):
    """SpectralConvS: same temporal size in/out."""
    B, C, NX, NY, NT = v.shape
    vhat = jnp.fft.rfftn(v, axes=(-3, -2, -1))
    vhat = spectral_conv_apply(vhat, wr, wi, mx, my, mt)
    return jnp.fft.irfftn(vhat, s=(NX, NY, NT), axes=(-3, -2, -1))


def spectral_convT(v, wr, wi, mx, my, mt, out_steps, temporal_padding=False):
    """SpectralConvT: arbitrary output temporal steps via FFT super-resolution."""
    B, C, NX, NY, NT = v.shape
    if temporal_padding:
        t_pad = NT
        v = jnp.pad(v, ((0, 0), (0, 0), (0, 0), (0, 0), (t_pad, 0)))
    else:
        t_pad = 0
    vhat = jnp.fft.rfftn(v, axes=(-3, -2, -1))
    vhat = spectral_conv_apply(vhat, wr, wi, mx, my, mt)
    # TODO(synk): SpectralConvT spectral bias terms are initialized to exactly
    # zero in the reference (gain * torch.zeros), so they are skipped here.
    out = jnp.fft.irfftn(vhat, s=(NX, NY, out_steps + t_pad), axes=(-3, -2, -1))
    if temporal_padding:
        out = out[..., -out_steps:]
    return out


# ----------------------------- positional encoding ----------------------------


def make_pe(nx, ny, nt, num_channels, beta, max_time_steps=100):
    gridx = jnp.linspace(0.0, 1.0, nx)
    gridy = jnp.linspace(0.0, 1.0, ny)
    gridt = jnp.linspace(0.0, 1.0, max_time_steps + 1)[1:nt + 1]
    gx, gy, gt = jnp.meshgrid(gridx, gridy, gridt, indexing="ij")
    chans = [gx, gy, gt]
    for k in range(num_channels - 3):
        basis = jnp.sin if k % 2 == 0 else jnp.cos
        b1d = jnp.exp(beta * gridt) * basis(jnp.pi * (k + 1) * gridt)      # (nt,)
        chans.append(jnp.broadcast_to(b1d.reshape(1, 1, nt), (nx, ny, nt)))
    return jnp.stack(chans)[None].astype(jnp.float32)                      # (1,C,nx,ny,nt)


# ----------------------------- parameters --------------------------------------


def init_params(key, width, mx, my, mt, ce, num_layers, dim_reduction=1):
    keys = iter(jax.random.split(key, 16 + 8 * num_layers))

    def conv(cout, cin):
        return (0.2 * jax.random.normal(next(keys), (cout, cin), jnp.float32),
                0.1 * jax.random.normal(next(keys), (cout,), jnp.float32))

    def spec(cin, cout):
        gain = 0.5 / (cin * cout)
        w4 = gain * jax.random.uniform(next(keys), (4, cin, cout, mx, my, mt, 2),
                                       jnp.float32)
        # Re-layout hoisted out of the forward pass (done once, eagerly).
        return prepare_spectral_weight(w4, mx, my, mt)

    p = {}
    p["norm_g"] = 1.0 + 0.1 * jax.random.normal(next(keys), (width,), jnp.float32)
    p["norm_b"] = 0.1 * jax.random.normal(next(keys), (width,), jnp.float32)
    p["proj_w"], p["proj_b"] = conv(width, width)
    p["lift_sc_wr"], p["lift_sc_wi"] = spec(width, width)
    p["lift_mlp1_w"], p["lift_mlp1_b"] = conv(ce, width)
    p["lift_mlp2_w"], p["lift_mlp2_b"] = conv(width, ce)
    layers = []
    for _ in range(num_layers):
        l = {}
        l["sc_wr"], l["sc_wi"] = spec(width, width)
        l["mlp1_w"], l["mlp1_b"] = conv(ce, width)
        l["mlp2_w"], l["mlp2_b"] = conv(width, ce)
        l["w_w"], l["w_b"] = conv(width, width)
        layers.append(l)
    p["layers"] = layers
    p["r_w"], p["r_b"] = conv(dim_reduction, width)
    p["q_wr"], p["q_wi"] = spec(dim_reduction, dim_reduction)
    return p


# ----------------------------- full forward pass --------------------------------


def sfno_forward(params, v, *, width, modes, latent_steps):
    mx, my, mt = modes
    B, NX, NY, NT = v.shape
    out_steps = NT                                   # out_steps defaults to input steps
    assert NT == latent_steps, "lifting residual add requires NT == latent_steps"
    v_res = v

    # ---- LiftingOperator: fused PE add + LayerNorm3d + proj conv ---------------
    S = NX * NY * NT
    pe = params["pe"].reshape(width, S)              # precomputed PE (hoisted)
    x = lifting_head(v.reshape(B, 1, S), pe, params["norm_g"], params["norm_b"],
                     params["proj_w"], params["proj_b"])                   # (B,width,S)

    x5 = x.reshape(B, width, NX, NY, NT)
    y = spectral_convT(x5, params["lift_sc_wr"], params["lift_sc_wi"], mx, my, mt,
                       out_steps=latent_steps, temporal_padding=False)
    Sl = NX * NY * latent_steps
    # v = ReLU(v + mlp2(ReLU(mlp1(sconv(v)))))  -- fully fused
    x = lifting_mlp_residual(y.reshape(B, width, Sl), x,
                             params["lift_mlp1_w"], params["lift_mlp1_b"],
                             params["lift_mlp2_w"], params["lift_mlp2_b"])

    # ---- Fourier layers: v' = ReLU(MLP(K(v)) + W(v)), epilogue fused -----------
    for layer in params["layers"]:
        x5 = x.reshape(B, width, NX, NY, latent_steps)
        x1 = spectral_convS(x5, layer["sc_wr"], layer["sc_wi"],
                            mx, my, mt).reshape(B, width, Sl)
        x = fourier_layer_epilogue(x, x1, layer["w_w"], layer["w_b"],
                                   layer["mlp1_w"], layer["mlp1_b"],
                                   layer["mlp2_w"], layer["mlp2_b"])

    # ---- channel reduction + OutConv --------------------------------------------
    x = pointwise_conv3d(x, params["r_w"], params["r_b"])                  # (B,1,Sl)
    x = x.reshape(B, 1, NX, NY, latent_steps)

    v_res5 = v_res[:, None, :, :, :]                                        # (B,1,X,Y,T)
    vv = jnp.concatenate([v_res5[..., -2:], x], axis=-1)                    # (B,1,X,Y,2+latent)
    vv_out = spectral_convT(vv, params["q_wr"], params["q_wi"], mx, my, mt,
                            out_steps=out_steps + 2, temporal_padding=True)
    out = v_res5[..., -1:] + vv_out[..., -out_steps:]
    return out[:, 0]                                                        # (B,X,Y,out_steps)


# ----------------------------------- main ---------------------------------------


if __name__ == "__main__":
    B, NX, NY, NT = 2, 16, 16, 8
    width = 8                       # must be even and > 3 (PE constraint)
    mx, my, mt = 4, 4, 3            # modes_t odd, <= NT//2 + 1
    channel_expansion = 16
    num_spectral_layers = 3         # -> 2 hidden Fourier layers
    latent_steps = NT               # equals input steps so the lifting residual add is valid
    beta = -0.01

    key = jax.random.PRNGKey(0)
    k_in, k_par = jax.random.split(key)
    v = jax.random.normal(k_in, (B, NX, NY, NT), jnp.float32)
    params = init_params(k_par, width, mx, my, mt, channel_expansion,
                         num_spectral_layers - 1, dim_reduction=1)
    params["pe"] = make_pe(NX, NY, NT, width, beta)     # hoisted out of the forward

    fwd = jax.jit(functools.partial(sfno_forward, width=width, modes=(mx, my, mt),
                                    latent_steps=latent_steps))
    out = jax.block_until_ready(fwd(params, v))
    assert out.shape == (B, NX, NY, NT), out.shape
    assert bool(jnp.all(jnp.isfinite(out)))
    print("KERNEL_OK")
</pallas_src>

<mosaic_0001>
module attributes {stable_mosaic.version = 11 : i64} {
  func.func @_pe_stats_kernel(%arg0: i32, %arg1: i32, %arg2: memref<1x1x512xf32, #tpu.memory_space<vmem>>, %arg3: memref<8x512xf32, #tpu.memory_space<vmem>>, %arg4: memref<1x2x128xf32, #tpu.memory_space<vmem>>) attributes {dimension_semantics = [#tpu.dimension_semantics<parallel>, #tpu.dimension_semantics<arbitrary>], iteration_bounds = array<i64: 2, 4>, scalar_prefetch = 0 : i64, scratch_operands = 0 : i64, tpu.core_type = #tpu.core_type<tc>, window_params = [{transform_indices = @transform_0, window_bounds = array<i64: 1, 1, 512>}, {transform_indices = @transform_1, window_bounds = array<i64: 8, 512>}, {transform_indices = @transform_2, window_bounds = array<i64: 1, 2, 128>}]} {
    %c0_i32 = arith.constant 0 : i32
    %0 = arith.cmpi eq, %arg1, %c0_i32 : i32
    %1 = arith.extui %0 : i1 to i32
    %c0_i32_0 = arith.constant 0 : i32
    %2 = arith.cmpi ne, %1, %c0_i32_0 : i32
    scf.if %2 {
      %cst_17 = arith.constant 0.000000e+00 : f32
      %33 = vector.broadcast %cst_17 : f32 to vector<1x2x128xf32>
      %c0_18 = arith.constant 0 : index
      %c0_19 = arith.constant 0 : index
      %c0_20 = arith.constant 0 : index
      %34 = vector.load %arg4[%c0_18, %c0_19, %c0_20] : memref<1x2x128xf32, #tpu.memory_space<vmem>>, vector<1x2x128xf32>
      tpu.vector_store %arg4[%c0_18, %c0_19, %c0_20], %33 {strides = array<i32>} : memref<1x2x128xf32, #tpu.memory_space<vmem>>, vector<1x2x128xf32>,
    } else {
    }
    %c0 = arith.constant 0 : index
    %c0_1 = arith.constant 0 : index
    %c0_2 = arith.constant 0 : index
    %3 = vector.load %arg2[%c0, %c0_1, %c0_2] : memref<1x1x512xf32, #tpu.memory_space<vmem>>, vector<1x1x512xf32>
    %4 = vector.shape_cast %3 : vector<1x1x512xf32> to vector<1x512xf32>
    %c0_3 = arith.constant 0 : index
    %c0_4 = arith.constant 0 : index
    %5 = vector.load %arg3[%c0_3, %c0_4] : memref<8x512xf32, #tpu.memory_space<vmem>>, vector<8x512xf32>
    %6 = vector.broadcast %4 : vector<1x512xf32> to vector<8x512xf32>
    %7 = arith.addf %6, %5 : vector<8x512xf32>
    %c0_5 = arith.constant 0 : index
    %c0_6 = arith.constant 0 : index
    %c0_7 = arith.constant 0 : index
    %8 = vector.load %arg4[%c0_5, %c0_6, %c0_7] : memref<1x2x128xf32, #tpu.memory_space<vmem>>, vector<1x1x128xf32>
    %9 = vector.shape_cast %8 : vector<1x1x128xf32> to vector<1x128xf32>
    %10 = vector.shape_cast %7 : vector<8x512xf32> to vector<1x8x512xf32>
    %cst = arith.constant dense<0.000000e+00> : vector<1xf32>
    %11 = vector.multi_reduction <add>, %10, %cst [1, 2] : vector<1x8x512xf32> to vector<1xf32>
    %12 = vector.shape_cast %11 : vector<1xf32> to vector<1x1x1xf32>
    %13 = vector.extract %12[0, 0, 0] : f32 from vector<1x1x1xf32>
    %14 = vector.broadcast %13 : f32 to vector<1x1xf32>
    %15 = vector.broadcast %14 : vector<1x1xf32> to vector<1x128xf32>
    %16 = arith.addf %9, %15 : vector<1x128xf32>
    %c0_8 = arith.constant 0 : index
    %c0_9 = arith.constant 0 : index
    %c0_10 = arith.constant 0 : index
    %17 = vector.load %arg4[%c0_8, %c0_9, %c0_10] : memref<1x2x128xf32, #tpu.memory_space<vmem>>, vector<1x1x128xf32>
    %18 = vector.shape_cast %17 : vector<1x1x128xf32> to vector<1x128xf32>
    %19 = vector.shape_cast %16 : vector<1x128xf32> to vector<1x1x128xf32>
    tpu.vector_store %arg4[%c0_8, %c0_9, %c0_10], %19 {strides = array<i32>} : memref<1x2x128xf32, #tpu.memory_space<vmem>>, vector<1x1x128xf32>,
    %c0_11 = arith.constant 0 : index
    %c1 = arith.constant 1 : index
    %c0_12 = arith.constant 0 : index
    %20 = vector.load %arg4[%c0_11, %c1, %c0_12] : memref<1x2x128xf32, #tpu.memory_space<vmem>>, vector<1x1x128xf32>
    %21 = vector.shape_cast %20 : vector<1x1x128xf32> to vector<1x128xf32>
    %22 = arith.mulf %7, %7 : vector<8x512xf32>
    %23 = vector.shape_cast %22 : vector<8x512xf32> to vector<1x8x512xf32>
    %cst_13 = arith.constant dense<0.000000e+00> : vector<1xf32>
    %24 = vector.multi_reduction <add>, %23, %cst_13 [1, 2] : vector<1x8x512xf32> to vector<1xf32>
    %25 = vector.shape_cast %24 : vector<1xf32> to vector<1x1x1xf32>
    %26 = vector.extract %25[0, 0, 0] : f32 from vector<1x1x1xf32>
    %27 = vector.broadcast %26 : f32 to vector<1x1xf32>
    %28 = vector.broadcast %27 : vector<1x1xf32> to vector<1x128xf32>
    %29 = arith.addf %21, %28 : vector<1x128xf32>
    %c0_14 = arith.constant 0 : index
    %c1_15 = arith.constant 1 : index
    %c0_16 = arith.constant 0 : index
    %30 = vector.load %arg4[%c0_14, %c1_15, %c0_16] : memref<1x2x128xf32, #tpu.memory_space<vmem>>, vector<1x1x128xf32>
    %31 = vector.shape_cast %30 : vector<1x1x128xf32> to vector<1x128xf32>
    %32 = vector.shape_cast %29 : vector<1x128xf32> to vector<1x1x128xf32>
    tpu.vector_store %arg4[%c0_14, %c1_15, %c0_16], %32 {strides = array<i32>} : memref<1x2x128xf32, #tpu.memory_space<vmem>>, vector<1x1x128xf32>,
    return
  }
  func.func @transform_0(%arg0: i32, %arg1: i32) -> (i32, i32, i32) {
    %c0_i32 = arith.constant 0 : i32
    %c0_i32_0 = arith.constant 0 : i32
    return %arg0, %c0_i32, %arg1 : i32, i32, i32
  }
  func.func @transform_1(%arg0: i32, %arg1: i32) -> (i32, i32) {
    %c0_i32 = arith.constant 0 : i32
    %c0_i32_0 = arith.constant 0 : i32
    return %c0_i32, %arg1 : i32, i32
  }
  func.func @transform_2(%arg0: i32, %arg1: i32) -> (i32, i32, i32) {
    %c0_i32 = arith.constant 0 : i32
    %c0_i32_0 = arith.constant 0 : i32
    %c0_i32_1 = arith.constant 0 : i32
    return %arg0, %c0_i32, %c0_i32_0 : i32, i32, i32
  }
}

module attributes {stable_mosaic.version = 11 : i64} {
  func.func @_pe_norm_proj_kernel(%arg0: i32, %arg1: i32, %arg2: memref<1x1x512xf32, #tpu.memory_space<vmem>>, %arg3: memref<8x512xf32, #tpu.memory_space<vmem>>, %arg4: memref<1x8x1xf32, #tpu.memory_space<vmem>>, %arg5: memref<1x8x1xf32, #tpu.memory_space<vmem>>, %arg6: memref<8x8xf32, #tpu.memory_space<vmem>>, %arg7: memref<8x1xf32, #tpu.memory_space<vmem>>, %arg8: memref<1x8x512xf32, #tpu.memory_space<vmem>>) attributes {dimension_semantics = [#tpu.dimension_semantics<parallel>, #tpu.dimension_semantics<parallel>], iteration_bounds = array<i64: 2, 4>, scalar_prefetch = 0 : i64, scratch_operands = 0 : i64, tpu.core_type = #tpu.core_type<tc>, window_params = [{transform_indices = @transform_0, window_bounds = array<i64: 1, 1, 512>}, {transform_indices = @transform_1, window_bounds = array<i64: 8, 512>}, {transform_indices = @transform_2, window_bounds = array<i64: 1, 8, 1>}, {transform_indices = @transform_3, window_bounds = array<i64: 1, 8, 1>}, {pipeline_mode = #tpu.pipeline_mode<synchronous>, transform_indices = @transform_4, window_bounds = array<i64: 8, 8>}, {pipeline_mode = #tpu.pipeline_mode<synchronous>, transform_indices = @transform_5, window_bounds = array<i64: 8, 1>}, {transform_indices = @transform_6, window_bounds = array<i64: 1, 8, 512>}]} {
    %c0 = arith.constant 0 : index
    %c0_0 = arith.constant 0 : index
    %c0_1 = arith.constant 0 : index
    %0 = vector.load %arg2[%c0, %c0_0, %c0_1] : memref<1x1x512xf32, #tpu.memory_space<vmem>>, vector<1x1x512xf32>
    %1 = vector.shape_cast %0 : vector<1x1x512xf32> to vector<1x512xf32>
    %c0_2 = arith.constant 0 : index
    %c0_3 = arith.constant 0 : index
    %2 = vector.load %arg3[%c0_2, %c0_3] : memref<8x512xf32, #tpu.memory_space<vmem>>, vector<8x512xf32>
    %3 = vector.broadcast %1 : vector<1x512xf32> to vector<8x512xf32>
    %4 = arith.addf %3, %2 : vector<8x512xf32>
    %c0_4 = arith.constant 0 : index
    %c0_5 = arith.constant 0 : index
    %c0_6 = arith.constant 0 : index
    %5 = vector.load %arg4[%c0_4, %c0_5, %c0_6] : memref<1x8x1xf32, #tpu.memory_space<vmem>>, vector<1x8x1xf32>
    %6 = vector.shape_cast %5 : vector<1x8x1xf32> to vector<8x1xf32>
    %7 = vector.broadcast %6 : vector<8x1xf32> to vector<8x512xf32>
    %8 = arith.mulf %4, %7 : vector<8x512xf32>
    %c0_7 = arith.constant 0 : index
    %c0_8 = arith.constant 0 : index
    %c0_9 = arith.constant 0 : index
    %9 = vector.load %arg5[%c0_7, %c0_8, %c0_9] : memref<1x8x1xf32, #tpu.memory_space<vmem>>, vector<1x8x1xf32>
    %10 = vector.shape_cast %9 : vector<1x8x1xf32> to vector<8x1xf32>
    %11 = vector.broadcast %10 : vector<8x1xf32> to vector<8x512xf32>
    %12 = arith.addf %8, %11 : vector<8x512xf32>
    %c0_10 = arith.constant 0 : index
    %c0_11 = arith.constant 0 : index
    %13 = vector.load %arg6[%c0_10, %c0_11] : memref<8x8xf32, #tpu.memory_space<vmem>>, vector<8x8xf32>
    %cst = arith.constant dense<0.000000e+00> : vector<8x512xf32>
    %14 = tpu.matmul %13, %12, %cst {dimension_numbers = #tpu.dot_dimension_numbers<[1], [0], [0], [1], [0, 0, 1, 1], [], []>} : vector<8x8xf32>, vector<8x512xf32>, vector<8x512xf32> -> vector<8x512xf32>
    %c0_12 = arith.constant 0 : index
    %c0_13 = arith.constant 0 : index
    %15 = vector.load %arg7[%c0_12, %c0_13] : memref<8x1xf32, #tpu.memory_space<vmem>>, vector<8x1xf32>
    %16 = vector.broadcast %15 : vector<8x1xf32> to vector<8x512xf32>
    %17 = arith.addf %14, %16 : vector<8x512xf32>
    %c0_14 = arith.constant 0 : index
    %c0_15 = arith.constant 0 : index
    %c0_16 = arith.constant 0 : index
    %18 = vector.load %arg8[%c0_14, %c0_15, %c0_16] : memref<1x8x512xf32, #tpu.memory_space<vmem>>, vector<1x8x512xf32>
    %19 = vector.shape_cast %18 : vector<1x8x512xf32> to vector<8x512xf32>
    %20 = vector.shape_cast %17 : vector<8x512xf32> to vector<1x8x512xf32>
    tpu.vector_store %arg8[%c0_14, %c0_15, %c0_16], %20 {strides = array<i32>} : memref<1x8x512xf32, #tpu.memory_space<vmem>>, vector<1x8x512xf32>,
    return
  }
  func.func @transform_0(%arg0: i32, %arg1: i32) -> (i32, i32, i32) {
    %c0_i32 = arith.constant 0 : i32
    %c0_i32_0 = arith.constant 0 : i32
    return %arg0, %c0_i32, %arg1 : i32, i32, i32
  }
  func.func @transform_1(%arg0: i32, %arg1: i32) -> (i32, i32) {
    %c0_i32 = arith.constant 0 : i32
    %c0_i32_0 = arith.constant 0 : i32
    return %c0_i32, %arg1 : i32, i32
  }
  func.func @transform_2(%arg0: i32, %arg1: i32) -> (i32, i32, i32) {
    %c0_i32 = arith.constant 0 : i32
    %c0_i32_0 = arith.constant 0 : i32
    %c0_i32_1 = arith.constant 0 : i32
    return %arg0, %c0_i32, %c0_i32_0 : i32, i32, i32
  }
  func.func @transform_3(%arg0: i32, %arg1: i32) -> (i32, i32, i32) {
    %c0_i32 = arith.constant 0 : i32
    %c0_i32_0 = arith.constant 0 : i32
    %c0_i32_1 = arith.constant 0 : i32
    return %arg0, %c0_i32, %c0_i32_0 : i32, i32, i32
  }
  func.func @transform_4(%arg0: i32, %arg1: i32) -> (i32, i32) {
    %c0_i32 = arith.constant 0 : i32
    %c0_i32_0 = arith.constant 0 : i32
    %c0_i32_1 = arith.constant 0 : i32
    return %c0_i32, %c0_i32_0 : i32, i32
  }
  func.func @transform_5(%arg0: i32, %arg1: i32) -> (i32, i32) {
    %c0_i32 = arith.constant 0 : i32
    %c0_i32_0 = arith.constant 0 : i32
    %c0_i32_1 = arith.constant 0 : i32
    return %c0_i32, %c0_i32_0 : i32, i32
  }
  func.func @transform_6(%arg0: i32, %arg1: i32) -> (i32, i32, i32) {
    %c0_i32 = arith.constant 0 : i32
    %c0_i32_0 = arith.constant 0 : i32
    return %arg0, %c0_i32, %arg1 : i32, i32, i32
  }
}

module attributes {stable_mosaic.version = 11 : i64} {
  func.func @_spec_kernel(%arg0: i32, %arg1: i32, %arg2: memref<1x8x1x128xf32, #tpu.memory_space<vmem>>, %arg3: memref<1x8x1x128xf32, #tpu.memory_space<vmem>>, %arg4: memref<8x8x128xf32, #tpu.memory_space<vmem>>, %arg5: memref<8x8x128xf32, #tpu.memory_space<vmem>>, %arg6: memref<1x8x128xf32, #tpu.memory_space<vmem>>, %arg7: memref<1x8x128xf32, #tpu.memory_space<vmem>>) attributes {dimension_semantics = [#tpu.dimension_semantics<parallel>, #tpu.dimension_semantics<parallel>], iteration_bounds = array<i64: 2, 2>, scalar_prefetch = 0 : i64, scratch_operands = 0 : i64, tpu.core_type = #tpu.core_type<tc>, window_params = [{transform_indices = @transform_0, window_bounds = array<i64: 1, 8, 1, 128>}, {transform_indices = @transform_1, window_bounds = array<i64: 1, 8, 1, 128>}, {transform_indices = @transform_2, window_bounds = array<i64: 8, 8, 128>}, {transform_indices = @transform_3, window_bounds = array<i64: 8, 8, 128>}, {transform_indices = @transform_4, window_bounds = array<i64: 1, 8, 128>}, {transform_indices = @transform_5, window_bounds = array<i64: 1, 8, 128>}]} {
    %cst = arith.constant 0.000000e+00 : f32
    %0 = vector.broadcast %cst : f32 to vector<8x128xf32>
    %cst_0 = arith.constant 0.000000e+00 : f32
    %1 = vector.broadcast %cst_0 : f32 to vector<8x128xf32>
    %c0_i32 = arith.constant 0 : i32
    %c0 = arith.constant 0 : index
    %2 = arith.index_cast %c0_i32 : i32 to index
    %c0_1 = arith.constant 0 : index
    %c0_2 = arith.constant 0 : index
    %3 = vector.load %arg2[%c0, %2, %c0_1, %c0_2] : memref<1x8x1x128xf32, #tpu.memory_space<vmem>>, vector<1x1x1x128xf32>
    %4 = vector.shape_cast %3 : vector<1x1x1x128xf32> to vector<1x128xf32>
    %c0_3 = arith.constant 0 : index
    %5 = arith.index_cast %c0_i32 : i32 to index
    %c0_4 = arith.constant 0 : index
    %c0_5 = arith.constant 0 : index
    %6 = vector.load %arg3[%c0_3, %5, %c0_4, %c0_5] : memref<1x8x1x128xf32, #tpu.memory_space<vmem>>, vector<1x1x1x128xf32>
    %7 = vector.shape_cast %6 : vector<1x1x1x128xf32> to vector<1x128xf32>
    %8 = arith.index_cast %c0_i32 : i32 to index
    %c0_6 = arith.constant 0 : index
    %c0_7 = arith.constant 0 : index
    %9 = vector.load %arg4[%8, %c0_6, %c0_7] : memref<8x8x128xf32, #tpu.memory_space<vmem>>, vector<1x8x128xf32>
    %10 = vector.shape_cast %9 : vector<1x8x128xf32> to vector<8x128xf32>
    %11 = arith.index_cast %c0_i32 : i32 to index
    %c0_8 = arith.constant 0 : index
    %c0_9 = arith.constant 0 : index
    %12 = vector.load %arg5[%11, %c0_8, %c0_9] : memref<8x8x128xf32, #tpu.memory_space<vmem>>, vector<1x8x128xf32>
    %13 = vector.shape_cast %12 : vector<1x8x128xf32> to vector<8x128xf32>
    %14 = vector.broadcast %4 : vector<1x128xf32> to vector<8x128xf32>
    %15 = arith.mulf %14, %10 : vector<8x128xf32>
    %16 = arith.addf %0, %15 : vector<8x128xf32>
    %17 = vector.broadcast %7 : vector<1x128xf32> to vector<8x128xf32>
    %18 = arith.mulf %17, %13 : vector<8x128xf32>
    %19 = arith.subf %16, %18 : vector<8x128xf32>
    %20 = vector.broadcast %4 : vector<1x128xf32> to vector<8x128xf32>
    %21 = arith.mulf %20, %13 : vector<8x128xf32>
    %22 = arith.addf %1, %21 : vector<8x128xf32>
    %23 = vector.broadcast %7 : vector<1x128xf32> to vector<8x128xf32>
    %24 = arith.mulf %23, %10 : vector<8x128xf32>
    %25 = arith.addf %22, %24 : vector<8x128xf32>
    %c1_i32 = arith.constant 1 : i32
    %c0_10 = arith.constant 0 : index
    %26 = arith.index_cast %c1_i32 : i32 to index
    %c0_11 = arith.constant 0 : index
    %c0_12 = arith.constant 0 : index
    %27 = vector.load %arg2[%c0_10, %26, %c0_11, %c0_12] : memref<1x8x1x128xf32, #tpu.memory_space<vmem>>, vector<1x1x1x128xf32>
    %28 = vector.shape_cast %27 : vector<1x1x1x128xf32> to vector<1x128xf32>
    %c0_13 = arith.constant 0 : index
    %29 = arith.index_cast %c1_i32 : i32 to index
    %c0_14 = arith.constant 0 : index
    %c0_15 = arith.constant 0 : index
    %30 = vector.load %arg3[%c0_13, %29, %c0_14, %c0_15] : memref<1x8x1x128xf32, #tpu.memory_space<vmem>>, vector<1x1x1x128xf32>
    %31 = vector.shape_cast %30 : vector<1x1x1x128xf32> to vector<1x128xf32>
    %32 = arith.index_cast %c1_i32 : i32 to index
    %c0_16 = arith.constant 0 : index
    %c0_17 = arith.constant 0 : index
    %33 = vector.load %arg4[%32, %c0_16, %c0_17] : memref<8x8x128xf32, #tpu.memory_space<vmem>>, vector<1x8x128xf32>
    %34 = vector.shape_cast %33 : vector<1x8x128xf32> to vector<8x128xf32>
    %35 = arith.index_cast %c1_i32 : i32 to index
    %c0_18 = arith.constant 0 : index
    %c0_19 = arith.constant 0 : index
    %36 = vector.load %arg5[%35, %c0_18, %c0_19] : memref<8x8x128xf32, #tpu.memory_space<vmem>>, vector<1x8x128xf32>
    %37 = vector.shape_cast %36 : vector<1x8x128xf32> to vector<8x128xf32>
    %38 = vector.broadcast %28 : vector<1x128xf32> to vector<8x128xf32>
    %39 = arith.mulf %38, %34 : vector<8x128xf32>
    %40 = arith.addf %19, %39 : vector<8x128xf32>
    %41 = vector.broadcast %31 : vector<1x128xf32> to vector<8x128xf32>
    %42 = arith.mulf %41, %37 : vector<8x128xf32>
    %43 = arith.subf %40, %42 : vector<8x128xf32>
    %44 = vector.broadcast %28 : vector<1x128xf32> to vector<8x128xf32>
    %45 = arith.mulf %44, %37 : vector<8x128xf32>
    %46 = arith.addf %25, %45 : vector<8x128xf32>
    %47 = vector.broadcast %31 : vector<1x128xf32> to vector<8x128xf32>
    %48 = arith.mulf %47, %34 : vector<8x128xf32>
    %49 = arith.addf %46, %48 : vector<8x128xf32>
    %c2_i32 = arith.constant 2 : i32
    %c0_20 = arith.constant 0 : index
    %50 = arith.index_cast %c2_i32 : i32 to index
    %c0_21 = arith.constant 0 : index
    %c0_22 = arith.constant 0 : index
    %51 = vector.load %arg2[%c0_20, %50, %c0_21, %c0_22] : memref<1x8x1x128xf32, #tpu.memory_space<vmem>>, vector<1x1x1x128xf32>
    %52 = vector.shape_cast %51 : vector<1x1x1x128xf32> to vector<1x128xf32>
    %c0_23 = arith.constant 0 : index
    %53 = arith.index_cast %c2_i32 : i32 to index
    %c0_24 = arith.constant 0 : index
    %c0_25 = arith.constant 0 : index
    %54 = vector.load %arg3[%c0_23, %53, %c0_24, %c0_25] : memref<1x8x1x128xf32, #tpu.memory_space<vmem>>, vector<1x1x1x128xf32>
    %55 = vector.shape_cast %54 : vector<1x1x1x128xf32> to vector<1x128xf32>
    %56 = arith.index_cast %c2_i32 : i32 to index
    %c0_26 = arith.constant 0 : index
    %c0_27 = arith.constant 0 : index
    %57 = vector.load %arg4[%56, %c0_26, %c0_27] : memref<8x8x128xf32, #tpu.memory_space<vmem>>, vector<1x8x128xf32>
    %58 = vector.shape_cast %57 : vector<1x8x128xf32> to vector<8x128xf32>
    %59 = arith.index_cast %c2_i32 : i32 to index
    %c0_28 = arith.constant 0 : index
    %c0_29 = arith.constant 0 : index
    %60 = vector.load %arg5[%59, %c0_28, %c0_29] : memref<8x8x128xf32, #tpu.memory_space<vmem>>, vector<1x8x128xf32>
    %61 = vector.shape_cast %60 : vector<1x8x128xf32> to vector<8x128xf32>
    %62 = vector.broadcast %52 : vector<1x128xf32> to vector<8x128xf32>
    %63 = arith.mulf %62, %58 : vector<8x128xf32>
    %64 = arith.addf %43, %63 : vector<8x128xf32>
    %65 = vector.broadcast %55 : vector<1x128xf32> to vector<8x128xf32>
    %66 = arith.mulf %65, %61 : vector<8x128xf32>
    %67 = arith.subf %64, %66 : vector<8x128xf32>
    %68 = vector.broadcast %52 : vector<1x128xf32> to vector<8x128xf32>
    %69 = arith.mulf %68, %61 : vector<8x128xf32>
    %70 = arith.addf %49, %69 : vector<8x128xf32>
    %71 = vector.broadcast %55 : vector<1x128xf32> to vector<8x128xf32>
    %72 = arith.mulf %71, %58 : vector<8x128xf32>
    %73 = arith.addf %70, %72 : vector<8x128xf32>
    %c3_i32 = arith.constant 3 : i32
    %c0_30 = arith.constant 0 : index
    %74 = arith.index_cast %c3_i32 : i32 to index
    %c0_31 = arith.constant 0 : index
    %c0_32 = arith.constant 0 : index
    %75 = vector.load %arg2[%c0_30, %74, %c0_31, %c0_32] : memref<1x8x1x128xf32, #tpu.memory_space<vmem>>, vector<1x1x1x128xf32>
    %76 = vector.shape_cast %75 : vector<1x1x1x128xf32> to vector<1x128xf32>
    %c0_33 = arith.constant 0 : index
    %77 = arith.index_cast %c3_i32 : i32 to index
    %c0_34 = arith.constant 0 : index
    %c0_35 = arith.constant 0 : index
    %78 = vector.load %arg3[%c0_33, %77, %c0_34, %c0_35] : memref<1x8x1x128xf32, #tpu.memory_space<vmem>>, vector<1x1x1x128xf32>
    %79 = vector.shape_cast %78 : vector<1x1x1x128xf32> to vector<1x128xf32>
    %80 = arith.index_cast %c3_i32 : i32 to index
    %c0_36 = arith.constant 0 : index
    %c0_37 = arith.constant 0 : index
    %81 = vector.load %arg4[%80, %c0_36, %c0_37] : memref<8x8x128xf32, #tpu.memory_space<vmem>>, vector<1x8x128xf32>
    %82 = vector.shape_cast %81 : vector<1x8x128xf32> to vector<8x128xf32>
    %83 = arith.index_cast %c3_i32 : i32 to index
    %c0_38 = arith.constant 0 : index
    %c0_39 = arith.constant 0 : index
    %84 = vector.load %arg5[%83, %c0_38, %c0_39] : memref<8x8x128xf32, #tpu.memory_space<vmem>>, vector<1x8x128xf32>
    %85 = vector.shape_cast %84 : vector<1x8x128xf32> to vector<8x128xf32>
    %86 = vector.broadcast %76 : vector<1x128xf32> to vector<8x128xf32>
    %87 = arith.mulf %86, %82 : vector<8x128xf32>
    %88 = arith.addf %67, %87 : vector<8x128xf32>
    %89 = vector.broadcast %79 : vector<1x128xf32> to vector<8x128xf32>
    %90 = arith.mulf %89, %85 : vector<8x128xf32>
    %91 = arith.subf %88, %90 : vector<8x128xf32>
    %92 = vector.broadcast %76 : vector<1x128xf32> to vector<8x128xf32>
    %93 = arith.mulf %92, %85 : vector<8x128xf32>
    %94 = arith.addf %73, %93 : vector<8x128xf32>
    %95 = vector.broadcast %79 : vector<1x128xf32> to vector<8x128xf32>
    %96 = arith.mulf %95, %82 : vector<8x128xf32>
    %97 = arith.addf %94, %96 : vector<8x128xf32>
    %c4_i32 = arith.constant 4 : i32
    %c0_40 = arith.constant 0 : index
    %98 = arith.index_cast %c4_i32 : i32 to index
    %c0_41 = arith.constant 0 : index
    %c0_42 = arith.constant 0 : index
    %99 = vector.load %arg2[%c0_40, %98, %c0_41, %c0_42] : memref<1x8x1x128xf32, #tpu.memory_space<vmem>>, vector<1x1x1x128xf32>
    %100 = vector.shape_cast %99 : vector<1x1x1x128xf32> to vector<1x128xf32>
    %c0_43 = arith.constant 0 : index
    %101 = arith.index_cast %c4_i32 : i32 to index
    %c0_44 = arith.constant 0 : index
    %c0_45 = arith.constant 0 : index
    %102 = vector.load %arg3[%c0_43, %101, %c0_44, %c0_45] : memref<1x8x1x128xf32, #tpu.memory_space<vmem>>, vector<1x1x1x128xf32>
    %103 = vector.shape_cast %102 : vector<1x1x1x128xf32> to vector<1x128xf32>
    %104 = arith.index_cast %c4_i32 : i32 to index
    %c0_46 = arith.constant 0 : index
    %c0_47 = arith.constant 0 : index
    %105 = vector.load %arg4[%104, %c0_46, %c0_47] : memref<8x8x128xf32, #tpu.memory_space<vmem>>, vector<1x8x128xf32>
    %106 = vector.shape_cast %105 : vector<1x8x128xf32> to vector<8x128xf32>
    %107 = arith.index_cast %c4_i32 : i32 to index
    %c0_48 = arith.constant 0 : index
    %c0_49 = arith.constant 0 : index
    %108 = vector.load %arg5[%107, %c0_48, %c0_49] : memref<8x8x128xf32, #tpu.memory_space<vmem>>, vector<1x8x128xf32>
    %109 = vector.shape_cast %108 : vector<1x8x128xf32> to vector<8x128xf32>
    %110 = vector.broadcast %100 : vector<1x128xf32> to vector<8x128xf32>
    %111 = arith.mulf %110, %106 : vector<8x128xf32>
    %112 = arith.addf %91, %111 : vector<8x128xf32>
    %113 = vector.broadcast %103 : vector<1x128xf32> to vector<8x128xf32>
    %114 = arith.mulf %113, %109 : vector<8x128xf32>
    %115 = arith.subf %112, %114 : vector<8x128xf32>
    %116 = vector.broadcast %100 : vector<1x128xf32> to vector<8x128xf32>
    %117 = arith.mulf %116, %109 : vector<8x128xf32>
    %118 = arith.addf %97, %117 : vector<8x128xf32>
    %119 = vector.broadcast %103 : vector<1x128xf32> to vector<8x128xf32>
    %120 = arith.mulf %119, %106 : vector<8x128xf32>
    %121 = arith.addf %118, %120 : vector<8x128xf32>
    %c5_i32 = arith.constant 5 : i32
    %c0_50 = arith.constant 0 : index
    %122 = arith.index_cast %c5_i32 : i32 to index
    %c0_51 = arith.constant 0 : index
    %c0_52 = arith.constant 0 : index
    %123 = vector.load %arg2[%c0_50, %122, %c0_51, %c0_52] : memref<1x8x1x128xf32, #tpu.memory_space<vmem>>, vector<1x1x1x128xf32>
    %124 = vector.shape_cast %123 : vector<1x1x1x128xf32> to vector<1x128xf32>
    %c0_53 = arith.constant 0 : index
    %125 = arith.index_cast %c5_i32 : i32 to index
    %c0_54 = arith.constant 0 : index
    %c0_55 = arith.constant 0 : index
    %126 = vector.load %arg3[%c0_53, %125, %c0_54, %c0_55] : memref<1x8x1x128xf32, #tpu.memory_space<vmem>>, vector<1x1x1x128xf32>
    %127 = vector.shape_cast %126 : vector<1x1x1x128xf32> to vector<1x128xf32>
    %128 = arith.index_cast %c5_i32 : i32 to index
    %c0_56 = arith.constant 0 : index
    %c0_57 = arith.constant 0 : index
    %129 = vector.load %arg4[%128, %c0_56, %c0_57] : memref<8x8x128xf32, #tpu.memory_space<vmem>>, vector<1x8x128xf32>
    %130 = vector.shape_cast %129 : vector<1x8x128xf32> to vector<8x128xf32>
    %131 = arith.index_cast %c5_i32 : i32 to index
    %c0_58 = arith.constant 0 : index
    %c0_59 = arith.constant 0 : index
    %132 = vector.load %arg5[%131, %c0_58, %c0_59] : memref<8x8x128xf32, #tpu.memory_space<vmem>>, vector<1x8x128xf32>
    %133 = vector.shape_cast %132 : vector<1x8x128xf32> to vector<8x128xf32>
    %134 = vector.broadcast %124 : vector<1x128xf32> to vector<8x128xf32>
    %135 = arith.mulf %134, %130 : vector<8x128xf32>
    %136 = arith.addf %115, %135 : vector<8x128xf32>
    %137 = vector.broadcast %127 : vector<1x128xf32> to vector<8x128xf32>
    %138 = arith.mulf %137, %133 : vector<8x128xf32>
    %139 = arith.subf %136, %138 : vector<8x128xf32>
    %140 = vector.broadcast %124 : vector<1x128xf32> to vector<8x128xf32>
    %141 = arith.mulf %140, %133 : vector<8x128xf32>
    %142 = arith.addf %121, %141 : vector<8x128xf32>
    %143 = vector.broadcast %127 : vector<1x128xf32> to vector<8x128xf32>
    %144 = arith.mulf %143, %130 : vector<8x128xf32>
    %145 = arith.addf %142, %144 : vector<8x128xf32>
    %c6_i32 = arith.constant 6 : i32
    %c0_60 = arith.constant 0 : index
    %146 = arith.index_cast %c6_i32 : i32 to index
    %c0_61 = arith.constant 0 : index
    %c0_62 = arith.constant 0 : index
    %147 = vector.load %arg2[%c0_60, %146, %c0_61, %c0_62] : memref<1x8x1x128xf32, #tpu.memory_space<vmem>>, vector<1x1x1x128xf32>
    %148 = vector.shape_cast %147 : vector<1x1x1x128xf32> to vector<1x128xf32>
    %c0_63 = arith.constant 0 : index
    %149 = arith.index_cast %c6_i32 : i32 to index
    %c0_64 = arith.constant 0 : index
    %c0_65 = arith.constant 0 : index
    %150 = vector.load %arg3[%c0_63, %149, %c0_64, %c0_65] : memref<1x8x1x128xf32, #tpu.memory_space<vmem>>, vector<1x1x1x128xf32>
    %151 = vector.shape_cast %150 : vector<1x1x1x128xf32> to vector<1x128xf32>
    %152 = arith.index_cast %c6_i32 : i32 to index
    %c0_66 = arith.constant 0 : index
    %c0_67 = arith.constant 0 : index
    %153 = vector.load %arg4[%152, %c0_66, %c0_67] : memref<8x8x128xf32, #tpu.memory_space<vmem>>, vector<1x8x128xf32>
    %154 = vector.shape_cast %153 : vector<1x8x128xf32> to vector<8x128xf32>
    %155 = arith.index_cast %c6_i32 : i32 to index
    %c0_68 = arith.constant 0 : index
    %c0_69 = arith.constant 0 : index
    %156 = vector.load %arg5[%155, %c0_68, %c0_69] : memref<8x8x128xf32, #tpu.memory_space<vmem>>, vector<1x8x128xf32>
    %157 = vector.shape_cast %156 : vector<1x8x128xf32> to vector<8x128xf32>
    %158 = vector.broadcast %148 : vector<1x128xf32> to vector<8x128xf32>
    %159 = arith.mulf %158, %154 : vector<8x128xf32>
    %160 = arith.addf %139, %159 : vector<8x128xf32>
    %161 = vector.broadcast %151 : vector<1x128xf32> to vector<8x128xf32>
    %162 = arith.mulf %161, %157 : vector<8x128xf32>
    %163 = arith.subf %160, %162 : vector<8x128xf32>
    %164 = vector.broadcast %148 : vector<1x128xf32> to vector<8x128xf32>
    %165 = arith.mulf %164, %157 : vector<8x128xf32>
    %166 = arith.addf %145, %165 : vector<8x128xf32>
    %167 = vector.broadcast %151 : vector<1x128xf32> to vector<8x128xf32>
    %168 = arith.mulf %167, %154 : vector<8x128xf32>
    %169 = arith.addf %166, %168 : vector<8x128xf32>
    %c7_i32 = arith.constant 7 : i32
    %c0_70 = arith.constant 0 : index
    %170 = arith.index_cast %c7_i32 : i32 to index
    %c0_71 = arith.constant 0 : index
    %c0_72 = arith.constant 0 : index
    %171 = vector.load %arg2[%c0_70, %170, %c0_71, %c0_72] : memref<1x8x1x128xf32, #tpu.memory_space<vmem>>, vector<1x1x1x128xf32>
    %172 = vector.shape_cast %171 : vector<1x1x1x128xf32> to vector<1x128xf32>
    %c0_73 = arith.constant 0 : index
    %173 = arith.index_cast %c7_i32 : i32 to index
    %c0_74 = arith.constant 0 : index
    %c0_75 = arith.constant 0 : index
    %174 = vector.load %arg3[%c0_73, %173, %c0_74, %c0_75] : memref<1x8x1x128xf32, #tpu.memory_space<vmem>>, vector<1x1x1x128xf32>
    %175 = vector.shape_cast %174 : vector<1x1x1x128xf32> to vector<1x128xf32>
    %176 = arith.index_cast %c7_i32 : i32 to index
    %c0_76 = arith.constant 0 : index
    %c0_77 = arith.constant 0 : index
    %177 = vector.load %arg4[%176, %c0_76, %c0_77] : memref<8x8x128xf32, #tpu.memory_space<vmem>>, vector<1x8x128xf32>
    %178 = vector.shape_cast %177 : vector<1x8x128xf32> to vector<8x128xf32>
    %179 = arith.index_cast %c7_i32 : i32 to index
    %c0_78 = arith.constant 0 : index
    %c0_79 = arith.constant 0 : index
    %180 = vector.load %arg5[%179, %c0_78, %c0_79] : memref<8x8x128xf32, #tpu.memory_space<vmem>>, vector<1x8x128xf32>
    %181 = vector.shape_cast %180 : vector<1x8x128xf32> to vector<8x128xf32>
    %182 = vector.broadcast %172 : vector<1x128xf32> to vector<8x128xf32>
    %183 = arith.mulf %182, %178 : vector<8x128xf32>
    %184 = arith.addf %163, %183 : vector<8x128xf32>
    %185 = vector.broadcast %175 : vector<1x128xf32> to vector<8x128xf32>
    %186 = arith.mulf %185, %181 : vector<8x128xf32>
    %187 = arith.subf %184, %186 : vector<8x128xf32>
    %188 = vector.broadcast %172 : vector<1x128xf32> to vector<8x128xf32>
    %189 = arith.mulf %188, %181 : vector<8x128xf32>
    %190 = arith.addf %169, %189 : vector<8x128xf32>
    %191 = vector.broadcast %175 : vector<1x128xf32> to vector<8x128xf32>
    %192 = arith.mulf %191, %178 : vector<8x128xf32>
    %193 = arith.addf %190, %192 : vector<8x128xf32>
    %c8_i32 = arith.constant 8 : i32
    %c0_80 = arith.constant 0 : index
    %c0_81 = arith.constant 0 : index
    %c0_82 = arith.constant 0 : index
    %194 = vector.load %arg6[%c0_80, %c0_81, %c0_82] : memref<1x8x128xf32, #tpu.memory_space<vmem>>, vector<1x8x128xf32>
    %195 = vector.shape_cast %194 : vector<1x8x128xf32> to vector<8x128xf32>
    %196 = vector.shape_cast %187 : vector<8x128xf32> to vector<1x8x128xf32>
    tpu.vector_store %arg6[%c0_80, %c0_81, %c0_82], %196 {strides = array<i32>} : memref<1x8x128xf32, #tpu.memory_space<vmem>>, vector<1x8x128xf32>,
    %c0_83 = arith.constant 0 : index
    %c0_84 = arith.constant 0 : index
    %c0_85 = arith.constant 0 : index
    %197 = vector.load %arg7[%c0_83, %c0_84, %c0_85] : memref<1x8x128xf32, #tpu.memory_space<vmem>>, vector<1x8x128xf32>
    %198 = vector.shape_cast %197 : vector<1x8x128xf32> to vector<8x128xf32>
    %199 = vector.shape_cast %193 : vector<8x128xf32> to vector<1x8x128xf32>
    tpu.vector_store %arg7[%c0_83, %c0_84, %c0_85], %199 {strides = array<i32>} : memref<1x8x128xf32, #tpu.memory_space<vmem>>, vector<1x8x128xf32>,
    return
  }
  func.func @transform_0(%arg0: i32, %arg1: i32) -> (i32, i32, i32, i32) {
    %c0_i32 = arith.constant 0 : i32
    %c0_i32_0 = arith.constant 0 : i32
    %c0_i32_1 = arith.constant 0 : i32
    return %arg1, %c0_i32, %c0_i32_0, %arg0 : i32, i32, i32, i32
  }
  func.func @transform_1(%arg0: i32, %arg1: i32) -> (i32, i32, i32, i32) {
    %c0_i32 = arith.constant 0 : i32
    %c0_i32_0 = arith.constant 0 : i32
    %c0_i32_1 = arith.constant 0 : i32
    return %arg1, %c0_i32, %c0_i32_0, %arg0 : i32, i32, i32, i32
  }
  func.func @transform_2(%arg0: i32, %arg1: i32) -> (i32, i32, i32) {
    %c0_i32 = arith.constant 0 : i32
    %c0_i32_0 = arith.constant 0 : i32
    %c0_i32_1 = arith.constant 0 : i32
    return %c0_i32, %c0_i32_0, %arg0 : i32, i32, i32
  }
  func.func @transform_3(%arg0: i32, %arg1: i32) -> (i32, i32, i32) {
    %c0_i32 = arith.constant 0 : i32
    %c0_i32_0 = arith.constant 0 : i32
    %c0_i32_1 = arith.constant 0 : i32
    return %c0_i32, %c0_i32_0, %arg0 : i32, i32, i32
  }
  func.func @transform_4(%arg0: i32, %arg1: i32) -> (i32, i32, i32) {
    %c0_i32 = arith.constant 0 : i32
    %c0_i32_0 = arith.constant 0 : i32
    return %arg1, %c0_i32, %arg0 : i32, i32, i32
  }
  func.func @transform_5(%arg0: i32, %arg1: i32) -> (i32, i32, i32) {
    %c0_i32 = arith.constant 0 : i32
    %c0_i32_0 = arith.constant 0 : i32
    return %arg1, %c0_i32, %arg0 : i32, i32, i32
  }
}

module attributes {stable_mosaic.version = 11 : i64} {
  func.func @_fused_mlp_res_kernel(%arg0: i32, %arg1: i32, %arg2: memref<1x8x512xf32, #tpu.memory_space<vmem>>, %arg3: memref<1x8x512xf32, #tpu.memory_space<vmem>>, %arg4: memref<16x8xf32, #tpu.memory_space<vmem>>, %arg5: memref<16x1xf32, #tpu.memory_space<vmem>>, %arg6: memref<8x16xf32, #tpu.memory_space<vmem>>, %arg7: memref<8x1xf32, #tpu.memory_space<vmem>>, %arg8: memref<1x8x512xf32, #tpu.memory_space<vmem>>, %arg9: memref<16x512xf32, #tpu.memory_space<vmem>>) attributes {dimension_semantics = [#tpu.dimension_semantics<parallel>, #tpu.dimension_semantics<parallel>], iteration_bounds = array<i64: 2, 4>, scalar_prefetch = 0 : i64, scratch_operands = 1 : i64, tpu.core_type = #tpu.core_type<tc>, window_params = [{transform_indices = @transform_0, window_bounds = array<i64: 1, 8, 512>}, {transform_indices = @transform_1, window_bounds = array<i64: 1, 8, 512>}, {pipeline_mode = #tpu.pipeline_mode<synchronous>, transform_indices = @transform_2, window_bounds = array<i64: 16, 8>}, {pipeline_mode = #tpu.pipeline_mode<synchronous>, transform_indices = @transform_3, window_bounds = array<i64: 16, 1>}, {pipeline_mode = #tpu.pipeline_mode<synchronous>, transform_indices = @transform_4, window_bounds = array<i64: 8, 16>}, {pipeline_mode = #tpu.pipeline_mode<synchronous>, transform_indices = @transform_5, window_bounds = array<i64: 8, 1>}, {transform_indices = @transform_6, window_bounds = array<i64: 1, 8, 512>}]} {
    %c0 = arith.constant 0 : index
    %c0_0 = arith.constant 0 : index
    %0 = vector.load %arg4[%c0, %c0_0] : memref<16x8xf32, #tpu.memory_space<vmem>>, vector<16x8xf32>
    %c0_1 = arith.constant 0 : index
    %c0_2 = arith.constant 0 : index
    %c0_3 = arith.constant 0 : index
    %1 = vector.load %arg2[%c0_1, %c0_2, %c0_3] : memref<1x8x512xf32, #tpu.memory_space<vmem>>, vector<1x8x512xf32>
    %2 = vector.shape_cast %1 : vector<1x8x512xf32> to vector<8x512xf32>
    %cst = arith.constant dense<0.000000e+00> : vector<16x512xf32>
    %3 = tpu.matmul %0, %2, %cst {dimension_numbers = #tpu.dot_dimension_numbers<[1], [0], [0], [1], [0, 0, 1, 1], [], []>} : vector<16x8xf32>, vector<8x512xf32>, vector<16x512xf32> -> vector<16x512xf32>
    %c0_4 = arith.constant 0 : index
    %c0_5 = arith.constant 0 : index
    %4 = vector.load %arg5[%c0_4, %c0_5] : memref<16x1xf32, #tpu.memory_space<vmem>>, vector<16x1xf32>
    %5 = vector.broadcast %4 : vector<16x1xf32> to vector<16x512xf32>
    %6 = arith.addf %3, %5 : vector<16x512xf32>
    %cst_6 = arith.constant 0.000000e+00 : f32
    %7 = vector.broadcast %cst_6 : f32 to vector<16x512xf32>
    %8 = arith.maximumf %6, %7 : vector<16x512xf32>
    %c0_7 = arith.constant 0 : index
    %c0_8 = arith.constant 0 : index
    %9 = vector.load %arg9[%c0_7, %c0_8] : memref<16x512xf32, #tpu.memory_space<vmem>>, vector<16x512xf32>
    tpu.vector_store %arg9[%c0_7, %c0_8], %8 {strides = array<i32>} : memref<16x512xf32, #tpu.memory_space<vmem>>, vector<16x512xf32>,
    %c0_9 = arith.constant 0 : index
    %c0_10 = arith.constant 0 : index
    %10 = vector.load %arg6[%c0_9, %c0_10] : memref<8x16xf32, #tpu.memory_space<vmem>>, vector<8x16xf32>
    %c0_11 = arith.constant 0 : index
    %c0_12 = arith.constant 0 : index
    %11 = vector.load %arg9[%c0_11, %c0_12] : memref<16x512xf32, #tpu.memory_space<vmem>>, vector<16x512xf32>
    %cst_13 = arith.constant dense<0.000000e+00> : vector<8x512xf32>
    %12 = tpu.matmul %10, %11, %cst_13 {dimension_numbers = #tpu.dot_dimension_numbers<[1], [0], [0], [1], [0, 0, 1, 1], [], []>} : vector<8x16xf32>, vector<16x512xf32>, vector<8x512xf32> -> vector<8x512xf32>
    %c0_14 = arith.constant 0 : index
    %c0_15 = arith.constant 0 : index
    %13 = vector.load %arg7[%c0_14, %c0_15] : memref<8x1xf32, #tpu.memory_space<vmem>>, vector<8x1xf32>
    %14 = vector.broadcast %13 : vector<8x1xf32> to vector<8x512xf32>
    %15 = arith.addf %12, %14 : vector<8x512xf32>
    %c0_16 = arith.constant 0 : index
    %c0_17 = arith.constant 0 : index
    %c0_18 = arith.constant 0 : index
    %16 = vector.load %arg3[%c0_16, %c0_17, %c0_18] : memref<1x8x512xf32, #tpu.memory_space<vmem>>, vector<1x8x512xf32>
    %17 = vector.shape_cast %16 : vector<1x8x512xf32> to vector<8x512xf32>
    %18 = arith.addf %15, %17 : vector<8x512xf32>
    %cst_19 = arith.constant 0.000000e+00 : f32
    %19 = vector.broadcast %cst_19 : f32 to vector<8x512xf32>
    %20 = arith.maximumf %18, %19 : vector<8x512xf32>
    %c0_20 = arith.constant 0 : index
    %c0_21 = arith.constant 0 : index
    %c0_22 = arith.constant 0 : index
    %21 = vector.load %arg8[%c0_20, %c0_21, %c0_22] : memref<1x8x512xf32, #tpu.memory_space<vmem>>, vector<1x8x512xf32>
    %22 = vector.shape_cast %21 : vector<1x8x512xf32> to vector<8x512xf32>
    %23 = vector.shape_cast %20 : vector<8x512xf32> to vector<1x8x512xf32>
    tpu.vector_store %arg8[%c0_20, %c0_21, %c0_22], %23 {strides = array<i32>} : memref<1x8x512xf32, #tpu.memory_space<vmem>>, vector<1x8x512xf32>,
    return
  }
  func.func @transform_0(%arg0: i32, %arg1: i32) -> (i32, i32, i32) {
    %c0_i32 = arith.constant 0 : i32
    %c0_i32_0 = arith.constant 0 : i32
    return %arg0, %c0_i32, %arg1 : i32, i32, i32
  }
  func.func @transform_1(%arg0: i32, %arg1: i32) -> (i32, i32, i32) {
    %c0_i32 = arith.constant 0 : i32
    %c0_i32_0 = arith.constant 0 : i32
    return %arg0, %c0_i32, %arg1 : i32, i32, i32
  }
  func.func @transform_2(%arg0: i32, %arg1: i32) -> (i32, i32) {
    %c0_i32 = arith.constant 0 : i32
    %c0_i32_0 = arith.constant 0 : i32
    %c0_i32_1 = arith.constant 0 : i32
    return %c0_i32, %c0_i32_0 : i32, i32
  }
  func.func @transform_3(%arg0: i32, %arg1: i32) -> (i32, i32) {
    %c0_i32 = arith.constant 0 : i32
    %c0_i32_0 = arith.constant 0 : i32
    %c0_i32_1 = arith.constant 0 : i32
    return %c0_i32, %c0_i32_0 : i32, i32
  }
  func.func @transform_4(%arg0: i32, %arg1: i32) -> (i32, i32) {
    %c0_i32 = arith.constant 0 : i32
    %c0_i32_0 = arith.constant 0 : i32
    %c0_i32_1 = arith.constant 0 : i32
    return %c0_i32, %c0_i32_0 : i32, i32
  }
  func.func @transform_5(%arg0: i32, %arg1: i32) -> (i32, i32) {
    %c0_i32 = arith.constant 0 : i32
    %c0_i32_0 = arith.constant 0 : i32
    %c0_i32_1 = arith.constant 0 : i32
    return %c0_i32, %c0_i32_0 : i32, i32
  }
  func.func @transform_6(%arg0: i32, %arg1: i32) -> (i32, i32, i32) {
    %c0_i32 = arith.constant 0 : i32
    %c0_i32_0 = arith.constant 0 : i32
    return %arg0, %c0_i32, %arg1 : i32, i32, i32
  }
}

module attributes {stable_mosaic.version = 11 : i64} {
  func.func @_fused_layer_kernel(%arg0: i32, %arg1: i32, %arg2: memref<1x8x512xf32, #tpu.memory_space<vmem>>, %arg3: memref<1x8x512xf32, #tpu.memory_space<vmem>>, %arg4: memref<8x8xf32, #tpu.memory_space<vmem>>, %arg5: memref<8x1xf32, #tpu.memory_space<vmem>>, %arg6: memref<16x8xf32, #tpu.memory_space<vmem>>, %arg7: memref<16x1xf32, #tpu.memory_space<vmem>>, %arg8: memref<8x16xf32, #tpu.memory_space<vmem>>, %arg9: memref<8x1xf32, #tpu.memory_space<vmem>>, %arg10: memref<1x8x512xf32, #tpu.memory_space<vmem>>, %arg11: memref<16x512xf32, #tpu.memory_space<vmem>>) attributes {dimension_semantics = [#tpu.dimension_semantics<parallel>, #tpu.dimension_semantics<parallel>], iteration_bounds = array<i64: 2, 4>, scalar_prefetch = 0 : i64, scratch_operands = 1 : i64, tpu.core_type = #tpu.core_type<tc>, window_params = [{transform_indices = @transform_0, window_bounds = array<i64: 1, 8, 512>}, {transform_indices = @transform_1, window_bounds = array<i64: 1, 8, 512>}, {pipeline_mode = #tpu.pipeline_mode<synchronous>, transform_indices = @transform_2, window_bounds = array<i64: 8, 8>}, {pipeline_mode = #tpu.pipeline_mode<synchronous>, transform_indices = @transform_3, window_bounds = array<i64: 8, 1>}, {pipeline_mode = #tpu.pipeline_mode<synchronous>, transform_indices = @transform_4, window_bounds = array<i64: 16, 8>}, {pipeline_mode = #tpu.pipeline_mode<synchronous>, transform_indices = @transform_5, window_bounds = array<i64: 16, 1>}, {pipeline_mode = #tpu.pipeline_mode<synchronous>, transform_indices = @transform_6, window_bounds = array<i64: 8, 16>}, {pipeline_mode = #tpu.pipeline_mode<synchronous>, transform_indices = @transform_7, window_bounds = array<i64: 8, 1>}, {transform_indices = @transform_8, window_bounds = array<i64: 1, 8, 512>}]} {
    %c0 = arith.constant 0 : index
    %c0_0 = arith.constant 0 : index
    %0 = vector.load %arg6[%c0, %c0_0] : memref<16x8xf32, #tpu.memory_space<vmem>>, vector<16x8xf32>
    %c0_1 = arith.constant 0 : index
    %c0_2 = arith.constant 0 : index
    %c0_3 = arith.constant 0 : index
    %1 = vector.load %arg3[%c0_1, %c0_2, %c0_3] : memref<1x8x512xf32, #tpu.memory_space<vmem>>, vector<1x8x512xf32>
    %2 = vector.shape_cast %1 : vector<1x8x512xf32> to vector<8x512xf32>
    %cst = arith.constant dense<0.000000e+00> : vector<16x512xf32>
    %3 = tpu.matmul %0, %2, %cst {dimension_numbers = #tpu.dot_dimension_numbers<[1], [0], [0], [1], [0, 0, 1, 1], [], []>} : vector<16x8xf32>, vector<8x512xf32>, vector<16x512xf32> -> vector<16x512xf32>
    %c0_4 = arith.constant 0 : index
    %c0_5 = arith.constant 0 : index
    %4 = vector.load %arg7[%c0_4, %c0_5] : memref<16x1xf32, #tpu.memory_space<vmem>>, vector<16x1xf32>
    %5 = vector.broadcast %4 : vector<16x1xf32> to vector<16x512xf32>
    %6 = arith.addf %3, %5 : vector<16x512xf32>
    %cst_6 = arith.constant 0.000000e+00 : f32
    %7 = vector.broadcast %cst_6 : f32 to vector<16x512xf32>
    %8 = arith.maximumf %6, %7 : vector<16x512xf32>
    %c0_7 = arith.constant 0 : index
    %c0_8 = arith.constant 0 : index
    %9 = vector.load %arg11[%c0_7, %c0_8] : memref<16x512xf32, #tpu.memory_space<vmem>>, vector<16x512xf32>
    tpu.vector_store %arg11[%c0_7, %c0_8], %8 {strides = array<i32>} : memref<16x512xf32, #tpu.memory_space<vmem>>, vector<16x512xf32>,
    %c0_9 = arith.constant 0 : index
    %c0_10 = arith.constant 0 : index
    %10 = vector.load %arg8[%c0_9, %c0_10] : memref<8x16xf32, #tpu.memory_space<vmem>>, vector<8x16xf32>
    %c0_11 = arith.constant 0 : index
    %c0_12 = arith.constant 0 : index
    %11 = vector.load %arg11[%c0_11, %c0_12] : memref<16x512xf32, #tpu.memory_space<vmem>>, vector<16x512xf32>
    %cst_13 = arith.constant dense<0.000000e+00> : vector<8x512xf32>
    %12 = tpu.matmul %10, %11, %cst_13 {dimension_numbers = #tpu.dot_dimension_numbers<[1], [0], [0], [1], [0, 0, 1, 1], [], []>} : vector<8x16xf32>, vector<16x512xf32>, vector<8x512xf32> -> vector<8x512xf32>
    %c0_14 = arith.constant 0 : index
    %c0_15 = arith.constant 0 : index
    %13 = vector.load %arg9[%c0_14, %c0_15] : memref<8x1xf32, #tpu.memory_space<vmem>>, vector<8x1xf32>
    %14 = vector.broadcast %13 : vector<8x1xf32> to vector<8x512xf32>
    %15 = arith.addf %12, %14 : vector<8x512xf32>
    %c0_16 = arith.constant 0 : index
    %c0_17 = arith.constant 0 : index
    %16 = vector.load %arg4[%c0_16, %c0_17] : memref<8x8xf32, #tpu.memory_space<vmem>>, vector<8x8xf32>
    %c0_18 = arith.constant 0 : index
    %c0_19 = arith.constant 0 : index
    %c0_20 = arith.constant 0 : index
    %17 = vector.load %arg2[%c0_18, %c0_19, %c0_20] : memref<1x8x512xf32, #tpu.memory_space<vmem>>, vector<1x8x512xf32>
    %18 = vector.shape_cast %17 : vector<1x8x512xf32> to vector<8x512xf32>
    %cst_21 = arith.constant dense<0.000000e+00> : vector<8x512xf32>
    %19 = tpu.matmul %16, %18, %cst_21 {dimension_numbers = #tpu.dot_dimension_numbers<[1], [0], [0], [1], [0, 0, 1, 1], [], []>} : vector<8x8xf32>, vector<8x512xf32>, vector<8x512xf32> -> vector<8x512xf32>
    %20 = arith.addf %15, %19 : vector<8x512xf32>
    %c0_22 = arith.constant 0 : index
    %c0_23 = arith.constant 0 : index
    %21 = vector.load %arg5[%c0_22, %c0_23] : memref<8x1xf32, #tpu.memory_space<vmem>>, vector<8x1xf32>
    %22 = vector.broadcast %21 : vector<8x1xf32> to vector<8x512xf32>
    %23 = arith.addf %20, %22 : vector<8x512xf32>
    %cst_24 = arith.constant 0.000000e+00 : f32
    %24 = vector.broadcast %cst_24 : f32 to vector<8x512xf32>
    %25 = arith.maximumf %23, %24 : vector<8x512xf32>
    %c0_25 = arith.constant 0 : index
    %c0_26 = arith.constant 0 : index
    %c0_27 = arith.constant 0 : index
    %26 = vector.load %arg10[%c0_25, %c0_26, %c0_27] : memref<1x8x512xf32, #tpu.memory_space<vmem>>, vector<1x8x512xf32>
    %27 = vector.shape_cast %26 : vector<1x8x512xf32> to vector<8x512xf32>
    %28 = vector.shape_cast %25 : vector<8x512xf32> to vector<1x8x512xf32>
    tpu.vector_store %arg10[%c0_25, %c0_26, %c0_27], %28 {strides = array<i32>} : memref<1x8x512xf32, #tpu.memory_space<vmem>>, vector<1x8x512xf32>,
    return
  }
  func.func @transform_0(%arg0: i32, %arg1: i32) -> (i32, i32, i32) {
    %c0_i32 = arith.constant 0 : i32
    %c0_i32_0 = arith.constant 0 : i32
    return %arg0, %c0_i32, %arg1 : i32, i32, i32
  }
  func.func @transform_1(%arg0: i32, %arg1: i32) -> (i32, i32, i32) {
    %c0_i32 = arith.constant 0 : i32
    %c0_i32_0 = arith.constant 0 : i32
    return %arg0, %c0_i32, %arg1 : i32, i32, i32
  }
  func.func @transform_2(%arg0: i32, %arg1: i32) -> (i32, i32) {
    %c0_i32 = arith.constant 0 : i32
    %c0_i32_0 = arith.constant 0 : i32
    %c0_i32_1 = arith.constant 0 : i32
    return %c0_i32, %c0_i32_0 : i32, i32
  }
  func.func @transform_3(%arg0: i32, %arg1: i32) -> (i32, i32) {
    %c0_i32 = arith.constant 0 : i32
    %c0_i32_0 = arith.constant 0 : i32
    %c0_i32_1 = arith.constant 0 : i32
    return %c0_i32, %c0_i32_0 : i32, i32
  }
  func.func @transform_4(%arg0: i32, %arg1: i32) -> (i32, i32) {
    %c0_i32 = arith.constant 0 : i32
    %c0_i32_0 = arith.constant 0 : i32
    %c0_i32_1 = arith.constant 0 : i32
    return %c0_i32, %c0_i32_0 : i32, i32
  }
  func.func @transform_5(%arg0: i32, %arg1: i32) -> (i32, i32) {
    %c0_i32 = arith.constant 0 : i32
    %c0_i32_0 = arith.constant 0 : i32
    %c0_i32_1 = arith.constant 0 : i32
    return %c0_i32, %c0_i32_0 : i32, i32
  }
  func.func @transform_6(%arg0: i32, %arg1: i32) -> (i32, i32) {
    %c0_i32 = arith.constant 0 : i32
    %c0_i32_0 = arith.constant 0 : i32
    %c0_i32_1 = arith.constant 0 : i32
    return %c0_i32, %c0_i32_0 : i32, i32
  }
  func.func @transform_7(%arg0: i32, %arg1: i32) -> (i32, i32) {
    %c0_i32 = arith.constant 0 : i32
    %c0_i32_0 = arith.constant 0 : i32
    %c0_i32_1 = arith.constant 0 : i32
    return %c0_i32, %c0_i32_0 : i32, i32
  }
  func.func @transform_8(%arg0: i32, %arg1: i32) -> (i32, i32, i32) {
    %c0_i32 = arith.constant 0 : i32
    %c0_i32_0 = arith.constant 0 : i32
    return %arg0, %c0_i32, %arg1 : i32, i32, i32
  }
}

module attributes {stable_mosaic.version = 11 : i64} {
  func.func @_pw_kernel(%arg0: i32, %arg1: i32, %arg2: memref<1x8x512xf32, #tpu.memory_space<vmem>>, %arg3: memref<1x8xf32, #tpu.memory_space<vmem>>, %arg4: memref<1x1xf32, #tpu.memory_space<vmem>>, %arg5: memref<1x1x512xf32, #tpu.memory_space<vmem>>) attributes {dimension_semantics = [#tpu.dimension_semantics<parallel>, #tpu.dimension_semantics<parallel>], iteration_bounds = array<i64: 2, 4>, scalar_prefetch = 0 : i64, scratch_operands = 0 : i64, tpu.core_type = #tpu.core_type<tc>, window_params = [{transform_indices = @transform_0, window_bounds = array<i64: 1, 8, 512>}, {pipeline_mode = #tpu.pipeline_mode<synchronous>, transform_indices = @transform_1, window_bounds = array<i64: 1, 8>}, {pipeline_mode = #tpu.pipeline_mode<synchronous>, transform_indices = @transform_2, window_bounds = array<i64: 1, 1>}, {transform_indices = @transform_3, window_bounds = array<i64: 1, 1, 512>}]} {
    %c0 = arith.constant 0 : index
    %c0_0 = arith.constant 0 : index
    %0 = vector.load %arg3[%c0, %c0_0] : memref<1x8xf32, #tpu.memory_space<vmem>>, vector<1x8xf32>
    %c0_1 = arith.constant 0 : index
    %c0_2 = arith.constant 0 : index
    %c0_3 = arith.constant 0 : index
    %1 = vector.load %arg2[%c0_1, %c0_2, %c0_3] : memref<1x8x512xf32, #tpu.memory_space<vmem>>, vector<1x8x512xf32>
    %2 = vector.shape_cast %1 : vector<1x8x512xf32> to vector<8x512xf32>
    %cst = arith.constant dense<0.000000e+00> : vector<1x512xf32>
    %3 = tpu.matmul %0, %2, %cst {dimension_numbers = #tpu.dot_dimension_numbers<[1], [0], [0], [1], [0, 0, 1, 1], [], []>} : vector<1x8xf32>, vector<8x512xf32>, vector<1x512xf32> -> vector<1x512xf32>
    %c0_4 = arith.constant 0 : index
    %c0_5 = arith.constant 0 : index
    %4 = vector.load %arg4[%c0_4, %c0_5] : memref<1x1xf32, #tpu.memory_space<vmem>>, vector<1x1xf32>
    %5 = vector.broadcast %4 : vector<1x1xf32> to vector<1x512xf32>
    %6 = arith.addf %3, %5 : vector<1x512xf32>
    %c0_6 = arith.constant 0 : index
    %c0_7 = arith.constant 0 : index
    %c0_8 = arith.constant 0 : index
    %7 = vector.load %arg5[%c0_6, %c0_7, %c0_8] : memref<1x1x512xf32, #tpu.memory_space<vmem>>, vector<1x1x512xf32>
    %8 = vector.shape_cast %7 : vector<1x1x512xf32> to vector<1x512xf32>
    %9 = vector.shape_cast %6 : vector<1x512xf32> to vector<1x1x512xf32>
    tpu.vector_store %arg5[%c0_6, %c0_7, %c0_8], %9 {strides = array<i32>} : memref<1x1x512xf32, #tpu.memory_space<vmem>>, vector<1x1x512xf32>,
    return
  }
  func.func @transform_0(%arg0: i32, %arg1: i32) -> (i32, i32, i32) {
    %c0_i32 = arith.constant 0 : i32
    %c0_i32_0 = arith.constant 0 : i32
    return %arg0, %c0_i32, %arg1 : i32, i32, i32
  }
  func.func @transform_1(%arg0: i32, %arg1: i32) -> (i32, i32) {
    %c0_i32 = arith.constant 0 : i32
    %c0_i32_0 = arith.constant 0 : i32
    %c0_i32_1 = arith.constant 0 : i32
    return %c0_i32, %c0_i32_0 : i32, i32
  }
  func.func @transform_2(%arg0: i32, %arg1: i32) -> (i32, i32) {
    %c0_i32 = arith.constant 0 : i32
    %c0_i32_0 = arith.constant 0 : i32
    %c0_i32_1 = arith.constant 0 : i32
    return %c0_i32, %c0_i32_0 : i32, i32
  }
  func.func @transform_3(%arg0: i32, %arg1: i32) -> (i32, i32, i32) {
    %c0_i32 = arith.constant 0 : i32
    %c0_i32_0 = arith.constant 0 : i32
    return %arg0, %c0_i32, %arg1 : i32, i32, i32
  }
}

module attributes {stable_mosaic.version = 11 : i64} {
  func.func @_spec_kernel(%arg0: i32, %arg1: i32, %arg2: memref<1x1x1x128xf32, #tpu.memory_space<vmem>>, %arg3: memref<1x1x1x128xf32, #tpu.memory_space<vmem>>, %arg4: memref<1x1x128xf32, #tpu.memory_space<vmem>>, %arg5: memref<1x1x128xf32, #tpu.memory_space<vmem>>, %arg6: memref<1x1x128xf32, #tpu.memory_space<vmem>>, %arg7: memref<1x1x128xf32, #tpu.memory_space<vmem>>) attributes {dimension_semantics = [#tpu.dimension_semantics<parallel>, #tpu.dimension_semantics<parallel>], iteration_bounds = array<i64: 2, 2>, scalar_prefetch = 0 : i64, scratch_operands = 0 : i64, tpu.core_type = #tpu.core_type<tc>, window_params = [{transform_indices = @transform_0, window_bounds = array<i64: 1, 1, 1, 128>}, {transform_indices = @transform_1, window_bounds = array<i64: 1, 1, 1, 128>}, {transform_indices = @transform_2, window_bounds = array<i64: 1, 1, 128>}, {transform_indices = @transform_3, window_bounds = array<i64: 1, 1, 128>}, {transform_indices = @transform_4, window_bounds = array<i64: 1, 1, 128>}, {transform_indices = @transform_5, window_bounds = array<i64: 1, 1, 128>}]} {
    %cst = arith.constant 0.000000e+00 : f32
    %0 = vector.broadcast %cst : f32 to vector<1x128xf32>
    %cst_0 = arith.constant 0.000000e+00 : f32
    %1 = vector.broadcast %cst_0 : f32 to vector<1x128xf32>
    %c0_i32 = arith.constant 0 : i32
    %c0 = arith.constant 0 : index
    %2 = arith.index_cast %c0_i32 : i32 to index
    %c0_1 = arith.constant 0 : index
    %c0_2 = arith.constant 0 : index
    %3 = vector.load %arg2[%c0, %2, %c0_1, %c0_2] : memref<1x1x1x128xf32, #tpu.memory_space<vmem>>, vector<1x1x1x128xf32>
    %4 = vector.shape_cast %3 : vector<1x1x1x128xf32> to vector<1x128xf32>
    %c0_3 = arith.constant 0 : index
    %5 = arith.index_cast %c0_i32 : i32 to index
    %c0_4 = arith.constant 0 : index
    %c0_5 = arith.constant 0 : index
    %6 = vector.load %arg3[%c0_3, %5, %c0_4, %c0_5] : memref<1x1x1x128xf32, #tpu.memory_space<vmem>>, vector<1x1x1x128xf32>
    %7 = vector.shape_cast %6 : vector<1x1x1x128xf32> to vector<1x128xf32>
    %8 = arith.index_cast %c0_i32 : i32 to index
    %c0_6 = arith.constant 0 : index
    %c0_7 = arith.constant 0 : index
    %9 = vector.load %arg4[%8, %c0_6, %c0_7] : memref<1x1x128xf32, #tpu.memory_space<vmem>>, vector<1x1x128xf32>
    %10 = vector.shape_cast %9 : vector<1x1x128xf32> to vector<1x128xf32>
    %11 = arith.index_cast %c0_i32 : i32 to index
    %c0_8 = arith.constant 0 : index
    %c0_9 = arith.constant 0 : index
    %12 = vector.load %arg5[%11, %c0_8, %c0_9] : memref<1x1x128xf32, #tpu.memory_space<vmem>>, vector<1x1x128xf32>
    %13 = vector.shape_cast %12 : vector<1x1x128xf32> to vector<1x128xf32>
    %14 = arith.mulf %4, %10 : vector<1x128xf32>
    %15 = arith.addf %0, %14 : vector<1x128xf32>
    %16 = arith.mulf %7, %13 : vector<1x128xf32>
    %17 = arith.subf %15, %16 : vector<1x128xf32>
    %18 = arith.mulf %4, %13 : vector<1x128xf32>
    %19 = arith.addf %1, %18 : vector<1x128xf32>
    %20 = arith.mulf %7, %10 : vector<1x128xf32>
    %21 = arith.addf %19, %20 : vector<1x128xf32>
    %c1_i32 = arith.constant 1 : i32
    %c0_10 = arith.constant 0 : index
    %c0_11 = arith.constant 0 : index
    %c0_12 = arith.constant 0 : index
    %22 = vector.load %arg6[%c0_10, %c0_11, %c0_12] : memref<1x1x128xf32, #tpu.memory_space<vmem>>, vector<1x1x128xf32>
    %23 = vector.shape_cast %22 : vector<1x1x128xf32> to vector<1x128xf32>
    %24 = vector.shape_cast %17 : vector<1x128xf32> to vector<1x1x128xf32>
    tpu.vector_store %arg6[%c0_10, %c0_11, %c0_12], %24 {strides = array<i32>} : memref<1x1x128xf32, #tpu.memory_space<vmem>>, vector<1x1x128xf32>,
    %c0_13 = arith.constant 0 : index
    %c0_14 = arith.constant 0 : index
    %c0_15 = arith.constant 0 : index
    %25 = vector.load %arg7[%c0_13, %c0_14, %c0_15] : memref<1x1x128xf32, #tpu.memory_space<vmem>>, vector<1x1x128xf32>
    %26 = vector.shape_cast %25 : vector<1x1x128xf32> to vector<1x128xf32>
    %27 = vector.shape_cast %21 : vector<1x128xf32> to vector<1x1x128xf32>
    tpu.vector_store %arg7[%c0_13, %c0_14, %c0_15], %27 {strides = array<i32>} : memref<1x1x128xf32, #tpu.memory_space<vmem>>, vector<1x1x128xf32>,
    return
  }
  func.func @transform_0(%arg0: i32, %arg1: i32) -> (i32, i32, i32, i32) {
    %c0_i32 = arith.constant 0 : i32
    %c0_i32_0 = arith.constant 0 : i32
    %c0_i32_1 = arith.constant 0 : i32
    return %arg1, %c0_i32, %c0_i32_0, %arg0 : i32, i32, i32, i32
  }
  func.func @transform_1(%arg0: i32, %arg1: i32) -> (i32, i32, i32, i32) {
    %c0_i32 = arith.constant 0 : i32
    %c0_i32_0 = arith.constant 0 : i32
    %c0_i32_1 = arith.constant 0 : i32
    return %arg1, %c0_i32, %c0_i32_0, %arg0 : i32, i32, i32, i32
  }
  func.func @transform_2(%arg0: i32, %arg1: i32) -> (i32, i32, i32) {
    %c0_i32 = arith.constant 0 : i32
    %c0_i32_0 = arith.constant 0 : i32
    %c0_i32_1 = arith.constant 0 : i32
    return %c0_i32, %c0_i32_0, %arg0 : i32, i32, i32
  }
  func.func @transform_3(%arg0: i32, %arg1: i32) -> (i32, i32, i32) {
    %c0_i32 = arith.constant 0 : i32
    %c0_i32_0 = arith.constant 0 : i32
    %c0_i32_1 = arith.constant 0 : i32
    return %c0_i32, %c0_i32_0, %arg0 : i32, i32, i32
  }
  func.func @transform_4(%arg0: i32, %arg1: i32) -> (i32, i32, i32) {
    %c0_i32 = arith.constant 0 : i32
    %c0_i32_0 = arith.constant 0 : i32
    return %arg1, %c0_i32, %arg0 : i32, i32, i32
  }
  func.func @transform_5(%arg0: i32, %arg1: i32) -> (i32, i32, i32) {
    %c0_i32 = arith.constant 0 : i32
    %c0_i32_0 = arith.constant 0 : i32
    return %arg1, %c0_i32, %arg0 : i32, i32, i32
  }
}

</mosaic_0001>

<bundles_post_ra>
// kernel: sfno_forward.10
= control target key start
LH: loop header
LB: loop body
LE: loop exit
PB: predicated region body
PF: predicated region fallthrough
CT: control target
= control target key end

     0   :  { %s453_s9 = smov 0   ;;  %s455_s10 = smov 0   ;;  %s514_s0 = inlined_call_operand.vmem [shape: f32[2,1,2048], index: 0, kind: input, shape index: {}]   ;;  %s515_s1 = inlined_call_operand.vmem [shape: f32[8,2048], index: 1, kind: input, shape index: {}]   ;;  %s516_s2 = inlined_call_operand.vmem [shape: f32[2,2,128], index: 2, kind: output, shape index: {}]  }
   0x1   :  { %s457_s11 = smov 0   ;;  %s459_s12 = smov 0  }
   0x2   :  { %s461_s13 = smov 0  }
   0x3 LB: > { %s21_s14 = sadd.s32 1, %s427_s11  ;;  %s24_s15 = sadd.s32 1, %s431_s12  ;;  %s435_s13 = sphi %s461_s13, %s12_s13   ;;  %s431_s12 = sphi %s459_s12, %s520_s12   ;;  %s427_s11 = sphi %s457_s11, %s519_s11   ;;  %s423_s10 = sphi %s455_s10, %s518_s10   ;;  %s419_s9 = sphi %s453_s9, %s517_s9  }
   0x4   : > { %p22_p0 = scmp.ge.s32.totalorder %s21_s14, 4  ;;  %p343_p1 = scmp.ge.s32.totalorder %s435_s13, 1 }
   0x5   : > { %p141_p2 = scmp.lt.s32.totalorder %s435_s13, 9 }
   0x6   : > { %s522_s14 = smov (%p22_p0, %s21_s14), 0  ;;  %s524_s15 = smov (!%p22_p0, %s24_s15), %s431_s12 }
   0x7   : > { %p142_p3 = pnand %p343_p1, %p141_p2  ;;  %p26_p4 = scmp.ge.s32.totalorder %s524_s15, 2 }
   0x8   : > { %s344_s16 = sshll.u32 (!%p142_p3), %s419_s9, 2  ;;  %p171_p5 = scmp.lt.s32.totalorder (!%p142_p3), %s423_s10, 1 }
   0x9   : > { %s526_s15 = smov (%p26_p4, %s524_s15), 0  ;;  %145 = sbr.rel (%p142_p3) target bundleno = 255 (0xff), region = 28 }
   0xa   : > { %p173_p6 = scmp.lt.s32.totalorder (!%p142_p3), %s344_s16, 15  ;;  %p349_p7 = scmp.ne.s32.totalorder (!%p142_p3), %s419_s9, 0 }
  0x10   : > { %s528_s10 = smov (!%p171_p5, %s423_s10), 1  ;;  %s530_s16 = smov (!%p173_p6, %s344_s16), 15 }
  0x11   : > { %s345_s17 = sshll.u32 %s528_s10, 4  ;;  %s348_s18 = sshll.u32 %s528_s10, 1  ;;  %v437_v0 = vmov (!%p349_p7), 0.0  }
  0x12   : > { %s176_s19 = sadd.s32 %s345_s17, %s530_s16  ;;  %s347_s20 = sshll.u32 %s530_s16, 3 }
  0x13   : > { %s177_s23 = scalar_lea.vmem %s514_s0, %s176_s19  ;;  %s183_s26 = scalar_lea.vmem %s515_s1, %s347_s20 }
  0x14   : > { %s492_s29 = scalar_lea.vmem %s516_s2, %s348_s18  ;;  %192 = sbr.rel (%p349_p7) target bundleno = 27 (0x1b), region = 32 }
  0x15   : > { %193 = vst [vmem:[%s492_s29] sm:$0x3] (!%p349_p7), %v437_v0 }
  0x1b PF: > { %v200_v1 = vlaneseq  ;;  %v194_v3 = vld [vmem:[%s177_s23] sm:$0xf]  ;;  %v196_v9 = vld [vmem:[%s183_s26 + $0x8] sm:$0xff]  ;;  %v197_v10 = vld [vmem:[%s183_s26 + $0x10] sm:$0xff] }
  0x1c   : > { %v195_v8 = vld [vmem:[%s183_s26] sm:$0xff]  ;;  %v198_v11 = vld [vmem:[%s183_s26 + $0x18] sm:$0xff] }
  0x1d   : > { %v201_v2 = vshrl.u32 %v200_v1, 7  ;;  %v224_v44 = vld [vmem:[%s492_s29] sm:$0x1]  ;;  %v240_v47 = vld [vmem:[%s492_s29 + $0x1] sm:$0x1] }
  0x1f   : > { %v202_v4 = vsub.s32 0, %v201_v2  ;;  %v206_v5 = vsub.s32 1, %v201_v2  ;;  %v210_v6 = vsub.s32 2, %v201_v2  ;;  %v214_v7 = vsub.s32 3, %v201_v2 }
  0x21   : > { %v203_v12 = vrot.slane %v194_v3, %v202_v4  ;;  %v207_v13 = vrot.slane %v194_v3, %v206_v5  ;;  %v211_v14 = vrot.slane %v194_v3, %v210_v6  ;;  %v215_v15 = vrot.slane %v194_v3, %v214_v7 }
  0x23   : > { %v220_v16 = vadd.f32 %v203_v12, %v195_v8  ;;  %v221_v17 = vadd.f32 %v207_v13, %v196_v9  ;;  %v222_v18 = vadd.f32 %v211_v14, %v197_v10  ;;  %v223_v19 = vadd.f32 %v215_v15, %v198_v11 }
  0x25   : > { %v225_v20 = vadd.f32 %v221_v17, %v220_v16  ;;  %v241_v21 = vmul.f32 %v220_v16, %v220_v16  ;;  %v242_v22 = vmul.f32 %v221_v17, %v221_v17  ;;  %v243_v23 = vmul.f32 %v222_v18, %v222_v18 }
  0x26   : > { %v244_v25 = vmul.f32 %v223_v19, %v223_v19 }
  0x27   : > { %v226_v24 = vadd.f32 %v225_v20, %v222_v18  ;;  %v245_v26 = vadd.f32 %v242_v22, %v241_v21 }
  0x29   : > { %v227_v27 = vadd.f32 %v226_v24, %v223_v19  ;;  %v246_v28 = vadd.f32 %v245_v26, %v243_v23 }
  0x2b   : > { %228 = vadd.xlane.f32.xlu0 %v227_v27  ;;  %v247_v29 = vadd.f32 %v246_v28, %v244_v25 }
  0x2f   : > { %248 = vadd.xlane.f32.xlu0 %v247_v29 }
  0xb8   : > { %v229_v30 = vpop.xlane.xlu0 %228 }
  0xb9   : > { %v230_v31 = vrot.slane %v229_v30, 4 }
  0xbb   : > { %v231_v32 = vadd.f32 %v230_v31, %v229_v30 }
  0xbc   : > { %v249_v33 = vpop.xlane.xlu0 %248 }
  0xbd   : > { %v232_v34 = vrot.slane %v231_v32, 2  ;;  %v250_v35 = vrot.slane %v249_v33, 4 }
  0xbf   : > { %v251_v36 = vadd.f32 %v250_v35, %v249_v33  ;;  %v233_v37 = vadd.f32 %v232_v34, %v231_v32 }
  0xc1   : > { %v252_v38 = vrot.slane %v251_v36, 2  ;;  %v234_v39 = vrot.slane %v233_v37, 1 }
  0xc3   : > { %v253_v40 = vadd.f32 %v252_v38, %v251_v36  ;;  %v235_v41 = vadd.f32 %v234_v39, %v233_v37 }
  0xc5   : > { %352 = vpush %v235_v41  ;;  %v254_v42 = vrot.slane %v253_v40, 1 }
  0xc7   : > { %v255_v43 = vadd.f32 %v254_v42, %v253_v40 }
  0xc9   : > { %354 = vpush %v255_v43 }
  0xf6   : > { %s353_s30 = spop %352 }
  0xf7   : > { %v237_v45 = vstv %s353_s30 }
  0xf8   : > { %v238_v46 = vadd.f32 %v237_v45, %v224_v44 }
  0xfa   : > { %239 = vst [vmem:[%s492_s29] sm:$0x1] %v238_v46  ;;  %s355_s3 = spop %354 }
  0xfb   : > { %v257_v48 = vstv %s355_s3 }
  0xfc   : > { %v258_v49 = vadd.f32 %v257_v48, %v240_v47 }
  0xfe   : > { %259 = vst [vmem:[%s492_s29 + $0x1] sm:$0x1] %v258_v49 }
  0xff PF: > { %s12_s13 = sadd.s32 1, %s435_s13   ;;  %s517_s9 = smov %s427_s11 }
 0x100   : > { %p9_p8 = scmp.ge.s32.totalorder %s12_s13, 10   ;;  %s518_s10 = smov %s431_s12 }
 0x101   : > { %s519_s11 = smov %s522_s14  ;;  %s520_s12 = smov %s526_s15 }
 0x102   :  { %11 = sbr.rel (!%p9_p8) target bundleno = 3 (0x3), region = 65 }

// kernel: sfno_forward.11
= control target key start
LH: loop header
LB: loop body
LE: loop exit
PB: predicated region body
PF: predicated region fallthrough
CT: control target
= control target key end

     0   :  { %s813_s21 = smov 0   ;;  %s815_s22 = smov 0   ;;  %s886_s0 = inlined_call_operand.vmem [shape: f32[2,1,2048], index: 0, kind: input, shape index: {}]   ;;  %s887_s1 = inlined_call_operand.vmem [shape: f32[8,2048], index: 1, kind: input, shape index: {}]   ;;  %s888_s2 = inlined_call_operand.vmem [shape: f32[2,8,1], index: 2, kind: input, shape index: {}]   ;;  %s889_s3 = inlined_call_operand.vmem [shape: f32[2,8,1], index: 3, kind: input, shape index: {}]   ;;  %s890_s4 = inlined_call_operand.vmem [shape: f32[8,8], index: 4, kind: input, shape index: {}]   ;;  %s891_s5 = inlined_call_operand.vmem [shape: f32[8,1], index: 5, kind: input, shape index: {}]   ;;  %s892_s6 = inlined_call_operand.vmem [shape: f32[2,8,2048], index: 6, kind: output, shape index: {}]  }
   0x1   :  { %s817_s23 = smov 0   ;;  %s819_s24 = smov 0  }
   0x2   :  { %s821_s25 = smov 0  }
   0x3 LB: > { %s25_s26 = sadd.s32 1, %s766_s23  ;;  %s28_s27 = sadd.s32 1, %s770_s24  ;;  %s774_s25 = sphi %s821_s25, %s16_s25   ;;  %s770_s24 = sphi %s819_s24, %s896_s24   ;;  %s766_s23 = sphi %s817_s23, %s895_s23   ;;  %s762_s22 = sphi %s815_s22, %s894_s22   ;;  %s758_s21 = sphi %s813_s21, %s893_s21  }
   0x4   : > { %p26_p0 = scmp.ge.s32.totalorder %s25_s26, 4  ;;  %p678_p1 = scmp.ge.s32.totalorder %s774_s25, 1 }
   0x5   : > { %p261_p2 = scmp.lt.s32.totalorder %s774_s25, 9 }
   0x6   : > { %s898_s26 = smov (%p26_p0, %s25_s26), 0  ;;  %s900_s27 = smov (!%p26_p0, %s28_s27), %s770_s24 }
   0x7   : > { %p262_p3 = pnand %p678_p1, %p261_p2  ;;  %p30_p4 = scmp.ge.s32.totalorder %s900_s27, 2 }
   0x8   : > { %p312_p5 = scmp.lt.s32.totalorder (!%p262_p3), %s762_s22, 1  ;;  %v776_v0 = vmov (!%p262_p3), 0   ;;  %v777_v3 = vmov (!%p262_p3), 0.0   ;;  %v395_v4 = vld [vmem:[%s891_s5] sm:$0xff] (!%p262_p3)  ;;  %s679_s13 = sshll.u32 (!%p262_p3), %s758_s21, 2  ;;  %v350_v5 = vlaneseq (!%p262_p3)  ;;  %vm401_vm0 = vcmask (!%p262_p3), 64512  }
   0x9   : > { %s902_s27 = smov (%p30_p4, %s900_s27), 0  ;;  %265 = sbr.rel (%p262_p3) target bundleno = 372 (0x174), region = 44 }
   0xa   : > { %734 = vset.pattern.permute.xlu0 (!%p262_p3), %v776_v0  ;;  %735 = vset.pattern.permute.xlu1 (!%p262_p3), %v776_v0  ;;  %p314_p6 = scmp.lt.s32.totalorder (!%p262_p3), %s679_s13, 15  ;;  %v351_v6 = vshrl.u32 (!%p262_p3), %v350_v5, 7  ;;  %v394_v34 = vld [vmem:[%s890_s4] sm:$0xff] (!%p262_p3) }
   0xb   : > { %469 = vmatprep.mubr.f32.mxu0 (!%p262_p3), %v777_v3  ;;  %540 = vmatprep.mubr.f32.mxu1 (!%p262_p3), %v777_v3 }
   0xc   : > { %398 = vperm.xlu1 (!%p262_p3), %735, %v395_v4   ;;  %v356_v7 = vsub.s32 (!%p262_p3), 1, %v351_v6  ;;  %v364_v8 = vsub.s32 (!%p262_p3), 3, %v351_v6  ;;  %v352_v9 = vsub.s32 (!%p262_p3), 0, %v351_v6  ;;  %v360_v10 = vsub.s32 (!%p262_p3), 2, %v351_v6 }
  0x10   : > { %s904_s22 = smov (!%p312_p5, %s762_s22), 1  ;;  %s906_s13 = smov (!%p314_p6, %s679_s13), 15 }
  0x11   : > { %s683_s28 = sshll.u32 %s904_s22, 3  ;;  %s680_s14 = sshll.u32 %s904_s22, 4 }
  0x12   : > { %s329_s7 = scalar_lea.vmem %s888_s2, %s683_s28  ;;  %s333_s10 = scalar_lea.vmem %s889_s3, %s683_s28 }
  0x13   : > { %v374_v1 = vld [vmem:[%s329_s7] sm:$0xff]  ;;  %s855_s15 = sadd.s32 %s680_s14, %s906_s13  ;;  %s682_s19 = sshll.u32 %s906_s13, 3 }
  0x14   : > { %377 = vperm.xlu0 %734, %v374_v1   ;;  %v384_v2 = vld [vmem:[%s333_s10] sm:$0xff]  ;;  %s318_s18 = scalar_lea.vmem %s886_s0, %s855_s15  ;;  %s324_s28 = scalar_lea.vmem %s887_s1, %s682_s19 }
  0x15   : > { %v344_v11 = vld [vmem:[%s318_s18] sm:$0xf]  ;;  %v346_v12 = vld [vmem:[%s324_s28 + $0x8] sm:$0xff]  ;;  %v348_v17 = vld [vmem:[%s324_s28 + $0x18] sm:$0xff]  ;;  %s687_s30 = sshll.u32 %s855_s15, 3 }
  0x16   : > { %v357_v13 = vrot.slane %v344_v11, %v356_v7  ;;  %v365_v14 = vrot.slane %v344_v11, %v364_v8  ;;  %v353_v15 = vrot.slane %v344_v11, %v352_v9  ;;  %v361_v16 = vrot.slane %v344_v11, %v360_v10  ;;  %v345_v18 = vld [vmem:[%s324_s28] sm:$0xff]  ;;  %v347_v19 = vld [vmem:[%s324_s28 + $0x10] sm:$0xff]  ;;  %s342_s9 = scalar_lea.vmem %s892_s6, %s687_s30 }
  0x18   : > { %387 = vperm.xlu0 %734, %v384_v2   ;;  %v371_v20 = vadd.f32 %v357_v13, %v346_v12  ;;  %v373_v21 = vadd.f32 %v365_v14, %v348_v17  ;;  %v370_v22 = vadd.f32 %v353_v15, %v345_v18  ;;  %v372_v23 = vadd.f32 %v361_v16, %v347_v19 }
  0x8b   : > { %v399_v35 = vpop.permute.xlu1 %398 }
  0x93   : > { %v378_v24 = vpop.permute.xlu0 %377 }
  0x94   : > { %v381_v25 = vmul.f32 %v378_v24, %v371_v20  ;;  %v383_v26 = vmul.f32 %v378_v24, %v373_v21  ;;  %v380_v27 = vmul.f32 %v378_v24, %v370_v22  ;;  %v382_v28 = vmul.f32 %v378_v24, %v372_v23 }
  0x97   : > { %v388_v29 = vpop.permute.xlu0 %387 }
  0x98   : > { %v391_v30 = vadd.f32 %v388_v29, %v381_v25  ;;  %v393_v31 = vadd.f32 %v388_v29, %v383_v26  ;;  %v390_v32 = vadd.f32 %v388_v29, %v380_v27  ;;  %v392_v33 = vadd.f32 %v388_v29, %v382_v28 }
  0x9a   : > { %405 = vmatprep.subr.mxu0 %v391_v30  ;;  %476 = vmatprep.subr.mxu1 %v393_v31 }
  0x9b   : > { %406 = vmatpush1.msra.mxu0 %v390_v32  ;;  %477 = vmatpush1.msra.mxu1 %v392_v33 }
  0x9c   : > { %688 = vmatmul.mubr.msk.f32.vlgmr.msra.gmra.mrb[0].mxu0 %vm401_vm0, %v394_v34  ;;  %689 = vmatmul.mubr.msk.f32.vlgmr.msra.gmra.mrb[0].mxu1 %vm401_vm0, %v394_v34 }
 0x16f   : > { %v471_v36 = vpop.f32.mrb[0].mxu0  ;;  %v542_v37 = vpop.f32.mrb[0].mxu1 }
 0x170   : > { %v472_v38 = vadd.f32 %v471_v36, %v399_v35  ;;  %v543_v39 = vadd.f32 %v542_v37, %v399_v35  ;;  %v473_v40 = vpop.f32.mrb[1].mxu0  ;;  %v544_v41 = vpop.f32.mrb[1].mxu1 }
 0x171   : > { %v474_v42 = vadd.f32 %v473_v40, %v399_v35  ;;  %v545_v43 = vadd.f32 %v544_v41, %v399_v35 }
 0x172   : > { %547 = vst [vmem:[%s342_s9] sm:$0xff] %v472_v38  ;;  %549 = vst [vmem:[%s342_s9 + $0x10] sm:$0xff] %v543_v39 }
 0x173   : > { %548 = vst [vmem:[%s342_s9 + $0x8] sm:$0xff] %v474_v42  ;;  %550 = vst [vmem:[%s342_s9 + $0x18] sm:$0xff] %v545_v43 }
 0x174 PF: > { %s16_s25 = sadd.s32 1, %s774_s25   ;;  %s893_s21 = smov %s766_s23 }
 0x175   : > { %p13_p7 = scmp.ge.s32.totalorder %s16_s25, 10   ;;  %s894_s22 = smov %s770_s24 }
 0x176   : > { %s895_s23 = smov %s898_s26  ;;  %s896_s24 = smov %s902_s27 }
 0x177   :  { %15 = sbr.rel (!%p13_p7) target bundleno = 3 (0x3), region = 83 }

// kernel: sfno_forward.12
= control target key start
LH: loop header
LB: loop body
LE: loop exit
PB: predicated region body
PF: predicated region fallthrough
CT: control target
= control target key end

     0   :  { %s1246_s18 = smov 0   ;;  %s1248_s19 = smov 0   ;;  %s1439_s0 = inlined_call_operand.vmem [shape: f32[2,8,1,256], index: 0, kind: input, shape index: {}]   ;;  %s1440_s1 = inlined_call_operand.vmem [shape: f32[2,8,1,256], index: 1, kind: input, shape index: {}]   ;;  %s1441_s2 = inlined_call_operand.vmem [shape: f32[8,8,256], index: 2, kind: input, shape index: {}]   ;;  %s1442_s3 = inlined_call_operand.vmem [shape: f32[8,8,256], index: 3, kind: input, shape index: {}]   ;;  %s1443_s4 = inlined_call_operand.vmem [shape: f32[2,8,256], index: 4, kind: output, shape index: {0}]   ;;  %s1444_s5 = inlined_call_operand.vmem [shape: f32[2,8,256], index: 5, kind: output, shape index: {1}]  }
   0x1   :  { %s1250_s20 = smov 0   ;;  %s1252_s21 = smov 0  }
   0x2   :  { %s1254_s22 = smov 0   ;;  %s1256_s23 = smov 0  }
   0x3   :  { %s1258_s24 = smov 0   ;;  %s1260_s25 = smov 0  }
   0x4   :  { %s1262_s26 = smov 0  }
   0x5 LB: > { %s25_s27 = sadd.s32 1, %s1206_s24  ;;  %s28_s28 = sadd.s32 1, %s1210_s25  ;;  %s1214_s26 = sphi %s1262_s26, %s16_s26   ;;  %s1210_s25 = sphi %s1260_s25, %s1454_s25   ;;  %s1206_s24 = sphi %s1258_s24, %s1453_s24   ;;  %s1202_s23 = sphi %s1256_s23, %s1452_s23   ;;  %s1198_s22 = sphi %s1254_s22, %s1451_s22   ;;  %s1194_s21 = sphi %s1252_s21, %s1450_s21   ;;  %s1190_s20 = sphi %s1250_s20, %s1449_s20   ;;  %s1186_s19 = sphi %s1248_s19, %s1448_s19   ;;  %s1182_s18 = sphi %s1246_s18, %s1447_s18  }
   0x6   : > { %p26_p0 = scmp.ge.s32.totalorder %s25_s27, 2  ;;  %p44_p1 = scmp.ne.s32.totalorder %s1194_s21, %s1190_s20 }
   0x7   : > { %p45_p2 = scmp.eq.s32.totalorder %s1214_s26, 0  ;;  %p98_p5 = scmp.ne.s32.totalorder %s1186_s19, %s1182_s18 }
   0x8   : > { %s1456_s27 = smov (%p26_p0, %s25_s27), 0  ;;  %s1458_s28 = smov (!%p26_p0, %s28_s28), %s1210_s25 }
   0x9   : > { %p1299_p3 = por %p45_p2, %p44_p1  ;;  %p30_p4 = scmp.ge.s32.totalorder %s1458_s28, 2 }
   0xa   : > { %s32_s30 = ssub.s32 %s1206_s24, %s1456_s27  ;;  %s37_s6 = sadd.s32 1, %s1194_s21 }
   0xb   : > { %s1460_s28 = smov (%p30_p4, %s1458_s28), 0  ;;  %p1310_p6 = por %p98_p5, %p45_p2 }
   0xc   : > { %s33_s8 = ssub.s32 %s1210_s25, %s1460_s28  ;;  %s91_s9 = sadd.s32 1, %s1186_s19 }
   0xd   : > { %s34_s10 = sor.u32 %s33_s8, %s32_s30  ;;  %p89_p7 = scmp.eq.s32.totalorder %s33_s8, 0 }
   0xe   : > { %p35_p8 = scmp.eq.s32.totalorder %s34_s10, 0  ;;  %p1008_p9 = scmp.ge.s32.totalorder %s1214_s26, 4 }
   0xf   : > { %s1318_s11 = scalar_select %p89_p7, %s1186_s19, %s91_s9  }
  0x10   : > { %s1321_s12 = scalar_select %p35_p8, %s1194_s21, %s37_s6  }
  0x11   : > { %206 = sbr.rel (%p1008_p9) target bundleno = 60 (0x3c), region = 16 }
  0x18   : > { %209 = sbr.rel (!%p1299_p3) target bundleno = 34 (0x22), region = 20  ;;  %s211_s13 = sand.u32 (%p1299_p3), 1, %s1194_s21  }
  0x19   : > { %s1010_s14 = sshll.u32 (%p1299_p3), %s1206_s24, 4  ;;  %s1009_s15 = sshll.u32 (%p1299_p3), %s211_s13, 3 }
  0x1a   : > { %s215_s16 = sadd.s32 (%p1299_p3), %s1210_s25, %s1010_s14  ;;  %s213_s6 = scalar_lea.vmem (%p1299_p3), [#allocation2], %s1009_s15 }
  0x1b   : > { %s216_s8 = scalar_lea.vmem (%p1299_p3), %s1439_s0, %s215_s16 }
  0x1c   : > { %v232_v0 = vld [vmem:[%s216_s8] sm:$0x1] (%p1299_p3)  ;;  %v234_v1 = vld [vmem:[%s216_s8 + $0x2] sm:$0x1] (%p1299_p3)  ;;  %v236_v2 = vld [vmem:[%s216_s8 + $0x4] sm:$0x1] (%p1299_p3) }
  0x1d   : > { %233 = vst [vmem:[%s213_s6] sm:$0x1] (%p1299_p3), %v232_v0  ;;  %235 = vst [vmem:[%s213_s6 + $0x1] sm:$0x1] (%p1299_p3), %v234_v1  ;;  %v238_v3 = vld [vmem:[%s216_s8 + $0x6] sm:$0x1] (%p1299_p3) }
  0x1e   : > { %237 = vst [vmem:[%s213_s6 + $0x2] sm:$0x1] (%p1299_p3), %v236_v2  ;;  %v240_v4 = vld [vmem:[%s216_s8 + $0x8] sm:$0x1] (%p1299_p3)  ;;  %v242_v5 = vld [vmem:[%s216_s8 + $0xa] sm:$0x1] (%p1299_p3) }
  0x1f   : > { %239 = vst [vmem:[%s213_s6 + $0x3] sm:$0x1] %v238_v3  ;;  %241 = vst [vmem:[%s213_s6 + $0x4] sm:$0x1] %v240_v4  ;;  %v244_v6 = vld [vmem:[%s216_s8 + $0xc] sm:$0x1] }
  0x20   : > { %243 = vst [vmem:[%s213_s6 + $0x5] sm:$0x1] %v242_v5  ;;  %v246_v7 = vld [vmem:[%s216_s8 + $0xe] sm:$0x1]  ;;  %245 = vst [vmem:[%s213_s6 + $0x6] sm:$0x1] %v244_v6 }
  0x21   : > { %247 = vst [vmem:[%s213_s6 + $0x7] sm:$0x1] %v246_v7 }
  0x22 PF: > { %286 = sbr.rel (!%p1299_p3) target bundleno = 44 (0x2c), region = 61  ;;  %s288_s9 = sand.u32 (%p1299_p3), 1, %s1194_s21  }
  0x23   : > { %s1012_s10 = sshll.u32 (%p1299_p3), %s1206_s24, 4  ;;  %s1011_s13 = sshll.u32 (%p1299_p3), %s288_s9, 3 }
  0x24   : > { %s292_s14 = sadd.s32 (%p1299_p3), %s1210_s25, %s1012_s10  ;;  %s290_s30 = scalar_lea.vmem (%p1299_p3), [#allocation3], %s1011_s13 }
  0x25   : > { %s293_s17 = scalar_lea.vmem (%p1299_p3), %s1440_s1, %s292_s14 }
  0x26   : > { %v309_v8 = vld [vmem:[%s293_s17] sm:$0x1] (%p1299_p3)  ;;  %v311_v9 = vld [vmem:[%s293_s17 + $0x2] sm:$0x1] (%p1299_p3)  ;;  %v313_v10 = vld [vmem:[%s293_s17 + $0x4] sm:$0x1] (%p1299_p3) }
  0x27   : > { %310 = vst [vmem:[%s290_s30] sm:$0x1] (%p1299_p3), %v309_v8  ;;  %312 = vst [vmem:[%s290_s30 + $0x1] sm:$0x1] (%p1299_p3), %v311_v9  ;;  %v315_v11 = vld [vmem:[%s293_s17 + $0x6] sm:$0x1] (%p1299_p3) }
  0x28   : > { %314 = vst [vmem:[%s290_s30 + $0x2] sm:$0x1] (%p1299_p3), %v313_v10  ;;  %v317_v12 = vld [vmem:[%s293_s17 + $0x8] sm:$0x1] (%p1299_p3)  ;;  %v319_v13 = vld [vmem:[%s293_s17 + $0xa] sm:$0x1] (%p1299_p3) }
  0x29   : > { %316 = vst [vmem:[%s290_s30 + $0x3] sm:$0x1] %v315_v11  ;;  %318 = vst [vmem:[%s290_s30 + $0x4] sm:$0x1] %v317_v12  ;;  %v321_v14 = vld [vmem:[%s293_s17 + $0xc] sm:$0x1] }
  0x2a   : > { %320 = vst [vmem:[%s290_s30 + $0x5] sm:$0x1] %v319_v13  ;;  %v323_v15 = vld [vmem:[%s293_s17 + $0xe] sm:$0x1]  ;;  %322 = vst [vmem:[%s290_s30 + $0x6] sm:$0x1] %v321_v14 }
  0x2b   : > { %324 = vst [vmem:[%s290_s30 + $0x7] sm:$0x1] %v323_v15 }
  0x2c PF: > { %363 = sbr.rel (!%p1310_p6) target bundleno = 52 (0x34), region = 102  ;;  %s365_s29 = sand.u32 (%p1310_p6), 1, %s1186_s19  }
  0x2d   : > { %s1014_s8 = sshll.u32 (%p1310_p6), %s1210_s25, 3  ;;  %s1013_s6 = sshll.u32 (%p1310_p6), %s365_s29, 6 }
  0x2e   : > { %s369_s13 = scalar_lea.vmem (%p1310_p6), %s1441_s2, %s1014_s8  ;;  %s367_s14 = scalar_lea.vmem (%p1310_p6), [#allocation4], %s1013_s6 }
  0x2f   : > { %v411_v16 = vld [vmem:[%s369_s13] sm:$0xff] (%p1310_p6)  ;;  %v413_v17 = vld [vmem:[%s369_s13 + $0x10] sm:$0xff] (%p1310_p6) }
  0x30   : > { %v415_v18 = vld [vmem:[%s369_s13 + $0x20] sm:$0xff] (%p1310_p6)  ;;  %412 = vst [vmem:[%s367_s14] sm:$0xff] (%p1310_p6), %v411_v16  ;;  %414 = vst [vmem:[%s367_s14 + $0x8] sm:$0xff] (%p1310_p6), %v413_v17  ;;  %v417_v19 = vld [vmem:[%s369_s13 + $0x30] sm:$0xff] (%p1310_p6) }
  0x31   : > { %416 = vst [vmem:[%s367_s14 + $0x10] sm:$0xff] (%p1310_p6), %v415_v18  ;;  %v419_v20 = vld [vmem:[%s369_s13 + $0x40] sm:$0xff] (%p1310_p6)  ;;  %v421_v21 = vld [vmem:[%s369_s13 + $0x50] sm:$0xff] (%p1310_p6)  ;;  %418 = vst [vmem:[%s367_s14 + $0x18] sm:$0xff] (%p1310_p6), %v417_v19 }
  0x32   : > { %420 = vst [vmem:[%s367_s14 + $0x20] sm:$0xff] (%p1310_p6), %v419_v20  ;;  %422 = vst [vmem:[%s367_s14 + $0x28] sm:$0xff] (%p1310_p6), %v421_v21  ;;  %v423_v22 = vld [vmem:[%s369_s13 + $0x60] sm:$0xff] (%p1310_p6)  ;;  %v425_v23 = vld [vmem:[%s369_s13 + $0x70] sm:$0xff] (%p1310_p6) }
  0x33   : > { %424 = vst [vmem:[%s367_s14 + $0x30] sm:$0xff] %v423_v22  ;;  %426 = vst [vmem:[%s367_s14 + $0x38] sm:$0xff] %v425_v23 }
  0x34 PF: > { %432 = sbr.rel (!%p1310_p6) target bundleno = 60 (0x3c), region = 140  ;;  %s434_s15 = sand.u32 (%p1310_p6), 1, %s1186_s19  }
  0x35   : > { %s1016_s16 = sshll.u32 (%p1310_p6), %s1210_s25, 3  ;;  %s1015_s17 = sshll.u32 (%p1310_p6), %s434_s15, 6 }
  0x36   : > { %s438_s8 = scalar_lea.vmem (%p1310_p6), %s1442_s3, %s1016_s16  ;;  %s436_s6 = scalar_lea.vmem (%p1310_p6), [#allocation5], %s1015_s17 }
  0x37   : > { %v480_v24 = vld [vmem:[%s438_s8] sm:$0xff] (%p1310_p6)  ;;  %v482_v25 = vld [vmem:[%s438_s8 + $0x10] sm:$0xff] (%p1310_p6) }
  0x38   : > { %v484_v26 = vld [vmem:[%s438_s8 + $0x20] sm:$0xff] (%p1310_p6)  ;;  %481 = vst [vmem:[%s436_s6] sm:$0xff] (%p1310_p6), %v480_v24  ;;  %483 = vst [vmem:[%s436_s6 + $0x8] sm:$0xff] (%p1310_p6), %v482_v25  ;;  %v486_v27 = vld [vmem:[%s438_s8 + $0x30] sm:$0xff] (%p1310_p6) }
  0x39   : > { %485 = vst [vmem:[%s436_s6 + $0x10] sm:$0xff] (%p1310_p6), %v484_v26  ;;  %v488_v28 = vld [vmem:[%s438_s8 + $0x40] sm:$0xff] (%p1310_p6)  ;;  %v490_v29 = vld [vmem:[%s438_s8 + $0x50] sm:$0xff] (%p1310_p6)  ;;  %487 = vst [vmem:[%s436_s6 + $0x18] sm:$0xff] (%p1310_p6), %v486_v27 }
  0x3a   : > { %489 = vst [vmem:[%s436_s6 + $0x20] sm:$0xff] (%p1310_p6), %v488_v28  ;;  %491 = vst [vmem:[%s436_s6 + $0x28] sm:$0xff] (%p1310_p6), %v490_v29  ;;  %v492_v30 = vld [vmem:[%s438_s8 + $0x60] sm:$0xff] (%p1310_p6)  ;;  %v494_v31 = vld [vmem:[%s438_s8 + $0x70] sm:$0xff] (%p1310_p6) }
  0x3b   : > { %493 = vst [vmem:[%s436_s6 + $0x30] sm:$0xff] %v492_v30  ;;  %495 = vst [vmem:[%s436_s6 + $0x38] sm:$0xff] %v494_v31 }
  0x3c PF: > { %p1017_p10 = scmp.ge.s32.totalorder %s1214_s26, 1  ;;  %p500_p11 = scmp.lt.s32.totalorder %s1214_s26, 5 }
  0x3e   : > { %p501_p12 = pnand %p1017_p10, %p500_p11 }
  0x3f   : > { %s507_s7 = sand.u32 (!%p501_p12), 1, %s1190_s20   ;;  %s521_s9 = sand.u32 (!%p501_p12), 1, %s1182_s18  }
  0x40   : > { %504 = sbr.rel (%p501_p12) target bundleno = 102 (0x66), region = 178  ;;  %s1018_s10 = sshll.u32 (!%p501_p12), %s507_s7, 3 }
  0x41   : > { %s1020_s13 = sshll.u32 (!%p501_p12), %s521_s9, 6  ;;  %s1358_s14 = scalar_lea.vmem (!%p501_p12), [#allocation2], %s1018_s10 }
  0x42   : > { %v1026_v32 = vld [vmem:[%s1358_s14] ss:$0 sm:$0xff] (!%p501_p12)  ;;  %s1361_s15 = scalar_lea.vmem (!%p501_p12), [#allocation3], %s1018_s10  ;;  %s1364_s16 = scalar_lea.vmem (!%p501_p12), [#allocation4], %s1020_s13  ;;  %v1032_v36 = vld [vmem:[%s1358_s14 + $0x1] ss:$0 sm:$0xff] (!%p501_p12) }
  0x43   : > { %v1027_v33 = vld [vmem:[%s1361_s15] ss:$0 sm:$0xff] (!%p501_p12)  ;;  %v596_v34 = vld [vmem:[%s1364_s16] sm:$0xff] (!%p501_p12)  ;;  %s1367_s18 = scalar_lea.vmem (!%p501_p12), [#allocation5], %s1020_s13  ;;  %v1033_v39 = vld [vmem:[%s1361_s15 + $0x1] ss:$0 sm:$0xff] (!%p501_p12) }
  0x44   : > { %v597_v35 = vld [vmem:[%s1367_s18] sm:$0xff] (!%p501_p12)  ;;  %v604_v37 = vmul.f32 (!%p501_p12), %v1026_v32, %v596_v34  ;;  %v1030_v40 = vld [vmem:[%s1364_s16 + $0x8] sm:$0xff] (!%p501_p12)  ;;  %v616_v43 = vmul.f32 (!%p501_p12), %v1027_v33, %v596_v34  ;;  %v1036_v46 = vld [vmem:[%s1364_s16 + $0x10] sm:$0xff] (!%p501_p12)  ;;  %p578_p13 = scmp.lt.s32.totalorder (!%p501_p12), %s1198_s22, 1  ;;  %p580_p0 = scmp.lt.s32.totalorder (!%p501_p12), %s1202_s23, 1 }
  0x45   : > { %v612_v38 = vmul.f32 (!%p501_p12), %v1027_v33, %v597_v35  ;;  %v1031_v41 = vld [vmem:[%s1367_s18 + $0x8] sm:$0xff] (!%p501_p12)  ;;  %v614_v42 = vmul.f32 (!%p501_p12), %v1026_v32, %v597_v35  ;;  %v632_v44 = vmul.f32 (!%p501_p12), %v1032_v36, %v1030_v40  ;;  %v1037_v50 = vld [vmem:[%s1367_s18 + $0x10] sm:$0xff] (!%p501_p12)  ;;  %v644_v52 = vmul.f32 (!%p501_p12), %v1033_v39, %v1030_v40  ;;  %v1042_v59 = vld [vmem:[%s1364_s16 + $0x18] sm:$0xff] (!%p501_p12) }
  0x46   : > { %v1038_v45 = vld [vmem:[%s1358_s14 + $0x2] ss:$0 sm:$0xff] (!%p501_p12)  ;;  %v642_v47 = vmul.f32 (!%p501_p12), %v1032_v36, %v1031_v41  ;;  %v640_v49 = vmul.f32 (!%p501_p12), %v1033_v39, %v1031_v41  ;;  %v1039_v53 = vld [vmem:[%s1361_s15 + $0x2] ss:$0 sm:$0xff] (!%p501_p12)  ;;  %v1044_v58 = vld [vmem:[%s1358_s14 + $0x3] ss:$0 sm:$0xff] (!%p501_p12) }
  0x47   : > { %v613_v48 = vsub.f32 %v604_v37, %v612_v38  ;;  %v617_v51 = vadd.f32 %v616_v43, %v614_v42  ;;  %v660_v55 = vmul.f32 %v1038_v45, %v1036_v46  ;;  %v670_v57 = vmul.f32 %v1038_v45, %v1037_v50  ;;  %v1043_v60 = vld [vmem:[%s1367_s18 + $0x18] sm:$0xff]  ;;  %v1050_v6 = vld [vmem:[%s1358_s14 + $0x4] ss:$0 sm:$0xff]  ;;  %v1056_v18 = vld [vmem:[%s1358_s14 + $0x5] ss:$0 sm:$0xff]  ;;  %s1462_s22 = smov (!%p578_p13, %s1198_s22), 1 }
  0x48   : > { %v668_v62 = vmul.f32 %v1039_v53, %v1037_v50  ;;  %v672_v0 = vmul.f32 %v1039_v53, %v1036_v46  ;;  %v1045_v1 = vld [vmem:[%s1361_s15 + $0x3] ss:$0 sm:$0xff]  ;;  %v688_v3 = vmul.f32 %v1044_v58, %v1042_v59  ;;  %v698_v5 = vmul.f32 %v1044_v58, %v1043_v60  ;;  %v1048_v7 = vld [vmem:[%s1364_s16 + $0x20] sm:$0xff]  ;;  %v1051_v13 = vld [vmem:[%s1361_s15 + $0x4] ss:$0 sm:$0xff]  ;;  %s1464_s23 = smov (!%p580_p0, %s1202_s23), 1 }
  0x49   : > { %v633_v54 = vadd.f32 %v632_v44, %v613_v48  ;;  %v643_v56 = vadd.f32 %v642_v47, %v617_v51  ;;  %v1049_v8 = vld [vmem:[%s1367_s18 + $0x20] sm:$0xff]  ;;  %v696_v10 = vmul.f32 %v1045_v1, %v1043_v60  ;;  %v700_v12 = vmul.f32 %v1045_v1, %v1042_v59  ;;  %v1054_v19 = vld [vmem:[%s1364_s16 + $0x28] sm:$0xff]  ;;  %v1057_v25 = vld [vmem:[%s1361_s15 + $0x5] ss:$0 sm:$0xff]  ;;  %s1022_s20 = sshll.u32 %s1462_s22, 1 }
  0x4a   : > { %v716_v15 = vmul.f32 %v1050_v6, %v1048_v7  ;;  %v726_v17 = vmul.f32 %v1050_v6, %v1049_v8  ;;  %v1055_v20 = vld [vmem:[%s1367_s18 + $0x28] sm:$0xff]  ;;  %v724_v22 = vmul.f32 %v1051_v13, %v1049_v8  ;;  %v728_v24 = vmul.f32 %v1051_v13, %v1048_v7  ;;  %v1060_v31 = vld [vmem:[%s1364_s16 + $0x30] sm:$0xff]  ;;  %v1066_v43 = vld [vmem:[%s1364_s16 + $0x38] sm:$0xff]  ;;  %s583_s17 = sadd.s32 %s1022_s20, %s1464_s23 }
  0x4b   : > { %v641_v61 = vsub.f32 %v633_v54, %v640_v49  ;;  %v645_v63 = vadd.f32 %v644_v52, %v643_v56  ;;  %v744_v27 = vmul.f32 %v1056_v18, %v1054_v19  ;;  %v754_v29 = vmul.f32 %v1056_v18, %v1055_v20  ;;  %v1062_v30 = vld [vmem:[%s1358_s14 + $0x6] ss:$0 sm:$0xff]  ;;  %v1061_v32 = vld [vmem:[%s1367_s18 + $0x30] sm:$0xff]  ;;  %v1068_v42 = vld [vmem:[%s1358_s14 + $0x7] ss:$0 sm:$0xff]  ;;  %s1023_s30 = sshll.u32 %s583_s17, 3 }
  0x4c   : > { %v752_v34 = vmul.f32 %v1057_v25, %v1055_v20  ;;  %v756_v36 = vmul.f32 %v1057_v25, %v1054_v19  ;;  %v1063_v37 = vld [vmem:[%s1361_s15 + $0x6] ss:$0 sm:$0xff]  ;;  %v772_v39 = vmul.f32 %v1062_v30, %v1060_v31  ;;  %v782_v41 = vmul.f32 %v1062_v30, %v1061_v32  ;;  %v1069_v49 = vld [vmem:[%s1361_s15 + $0x7] ss:$0 sm:$0xff]  ;;  %s585_s8 = scalar_lea.vmem %s1443_s4, %s1023_s30  ;;  %s593_s23 = scalar_lea.vmem %s1444_s5, %s1023_s30 }
  0x4d   : > { %v661_v2 = vadd.f32 %v660_v55, %v641_v61  ;;  %v671_v4 = vadd.f32 %v670_v57, %v645_v63  ;;  %v1067_v44 = vld [vmem:[%s1367_s18 + $0x38] sm:$0xff]  ;;  %v780_v46 = vmul.f32 %v1063_v37, %v1061_v32  ;;  %v784_v48 = vmul.f32 %v1063_v37, %v1060_v31 }
  0x4e   : > { %v800_v51 = vmul.f32 %v1068_v42, %v1066_v43  ;;  %v810_v53 = vmul.f32 %v1068_v42, %v1067_v44  ;;  %v808_v55 = vmul.f32 %v1069_v49, %v1067_v44  ;;  %v812_v57 = vmul.f32 %v1069_v49, %v1066_v43 }
  0x4f   : > { %v669_v9 = vsub.f32 %v661_v2, %v668_v62  ;;  %v673_v11 = vadd.f32 %v672_v0, %v671_v4 }
  0x51   : > { %v689_v14 = vadd.f32 %v688_v3, %v669_v9  ;;  %v699_v16 = vadd.f32 %v698_v5, %v673_v11 }
  0x53   : > { %v697_v21 = vsub.f32 %v689_v14, %v696_v10  ;;  %v701_v23 = vadd.f32 %v700_v12, %v699_v16 }
  0x55   : > { %v717_v26 = vadd.f32 %v716_v15, %v697_v21  ;;  %v727_v28 = vadd.f32 %v726_v17, %v701_v23 }
  0x57   : > { %v725_v33 = vsub.f32 %v717_v26, %v724_v22  ;;  %v729_v35 = vadd.f32 %v728_v24, %v727_v28 }
  0x59   : > { %v745_v38 = vadd.f32 %v744_v27, %v725_v33  ;;  %v755_v40 = vadd.f32 %v754_v29, %v729_v35 }
  0x5b   : > { %v753_v45 = vsub.f32 %v745_v38, %v752_v34  ;;  %v757_v47 = vadd.f32 %v756_v36, %v755_v40 }
  0x5d   : > { %v773_v50 = vadd.f32 %v772_v39, %v753_v45  ;;  %v783_v52 = vadd.f32 %v782_v41, %v757_v47 }
  0x5f   : > { %v781_v54 = vsub.f32 %v773_v50, %v780_v46  ;;  %v785_v56 = vadd.f32 %v784_v48, %v783_v52 }
  0x61   : > { %v801_v58 = vadd.f32 %v800_v51, %v781_v54  ;;  %v811_v59 = vadd.f32 %v810_v53, %v785_v56 }
  0x63   : > { %v809_v60 = vsub.f32 %v801_v58, %v808_v55  ;;  %v813_v61 = vadd.f32 %v812_v57, %v811_v59 }
  0x65   : > { %814 = vst [vmem:[%s585_s8] sm:$0xff] %v809_v60  ;;  %815 = vst [vmem:[%s593_s23] sm:$0xff] %v813_v61 }
  0x66 PF: > { %s16_s26 = sadd.s32 1, %s1214_s26   ;;  %s1447_s18 = smov %s1186_s19 }
  0x67   : > { %p13_p1 = scmp.ge.s32.totalorder %s16_s26, 6   ;;  %s1448_s19 = smov %s1318_s11 }
  0x68   : > { %s1449_s20 = smov %s1194_s21  ;;  %s1450_s21 = smov %s1321_s12 }
  0x69   : > { %s1451_s22 = smov %s1206_s24  ;;  %s1452_s23 = smov %s1210_s25 }
  0x6a   : > { %s1453_s24 = smov %s1456_s27  ;;  %s1454_s25 = smov %s1460_s28 }
  0x6b   :  { %15 = sbr.rel (!%p13_p1) target bundleno = 5 (0x5), region = 293 }

// kernel: reverse.8
= control target key start
LH: loop header
LB: loop body
LE: loop exit
PB: predicated region body
PF: predicated region fallthrough
CT: control target
= control target key end

     0   :  { %s1160_s0 = inlined_call_operand.vmem [shape: f32[2,8,16,16,3], index: 0, kind: input, shape index: {}]   ;;  %s1161_s1 = inlined_call_operand.vmem [shape: f32[2,8,16,16,3], index: 1, kind: output, shape index: {}]  }
   0x1   :  { %v384_v0 = vld [vmem:[%s1160_s0 + $0x20] sm:$0xff]  ;;  %v387_v2 = vld [vmem:[%s1160_s0 + $0x50] sm:$0xff]  ;;  %v478_v48 = vld [vmem:[%s1160_s0 + $0x28] sm:$0xff] }
   0x2   :  { %v385_v1 = vld [vmem:[%s1160_s0 + $0x1a0] sm:$0xff]  ;;  %4 = vst [vmem:[%s1161_s1] sm:$0xff] %v384_v0  ;;  %388 = vst [vmem:[%s1161_s1 + $0x30] sm:$0xff] %v387_v2  ;;  %v389_v3 = vld [vmem:[%s1160_s0 + $0x1d0] sm:$0xff] }
   0x3   :  { %386 = vst [vmem:[%s1161_s1 + $0x180] sm:$0xff] %v385_v1  ;;  %v391_v4 = vld [vmem:[%s1160_s0 + $0x80] sm:$0xff]  ;;  %390 = vst [vmem:[%s1161_s1 + $0x1b0] sm:$0xff] %v389_v3  ;;  %v395_v6 = vld [vmem:[%s1160_s0 + $0xb0] sm:$0xff] }
   0x4   :  { %v393_v5 = vld [vmem:[%s1160_s0 + $0x200] sm:$0xff]  ;;  %392 = vst [vmem:[%s1161_s1 + $0x60] sm:$0xff] %v391_v4  ;;  %v397_v7 = vld [vmem:[%s1160_s0 + $0x230] sm:$0xff]  ;;  %396 = vst [vmem:[%s1161_s1 + $0x90] sm:$0xff] %v395_v6 }
   0x5   :  { %394 = vst [vmem:[%s1161_s1 + $0x1e0] sm:$0xff] %v393_v5  ;;  %v399_v8 = vld [vmem:[%s1160_s0 + $0xe0] sm:$0xff]  ;;  %398 = vst [vmem:[%s1161_s1 + $0x210] sm:$0xff] %v397_v7  ;;  %v403_v10 = vld [vmem:[%s1160_s0 + $0x110] sm:$0xff] }
   0x6   :  { %400 = vst [vmem:[%s1161_s1 + $0xc0] sm:$0xff] %v399_v8  ;;  %v401_v9 = vld [vmem:[%s1160_s0 + $0x260] sm:$0xff]  ;;  %v405_v11 = vld [vmem:[%s1160_s0 + $0x290] sm:$0xff]  ;;  %404 = vst [vmem:[%s1161_s1 + $0xf0] sm:$0xff] %v403_v10 }
   0x7   :  { %402 = vst [vmem:[%s1161_s1 + $0x240] sm:$0xff] %v401_v9  ;;  %406 = vst [vmem:[%s1161_s1 + $0x270] sm:$0xff] %v405_v11  ;;  %v407_v12 = vld [vmem:[%s1160_s0 + $0x140] sm:$0xff]  ;;  %v411_v14 = vld [vmem:[%s1160_s0 + $0x170] sm:$0xff] }
   0x8   :  { %v409_v13 = vld [vmem:[%s1160_s0 + $0x2c0] sm:$0xff]  ;;  %408 = vst [vmem:[%s1161_s1 + $0x120] sm:$0xff] %v407_v12  ;;  %412 = vst [vmem:[%s1161_s1 + $0x150] sm:$0xff] %v411_v14  ;;  %v413_v15 = vld [vmem:[%s1160_s0 + $0x2f0] sm:$0xff] }
   0x9   :  { %410 = vst [vmem:[%s1161_s1 + $0x2a0] sm:$0xff] %v409_v13  ;;  %v415_v16 = vld [vmem:[%s1160_s0 + $0x10] sm:$0xff]  ;;  %414 = vst [vmem:[%s1161_s1 + $0x2d0] sm:$0xff] %v413_v15  ;;  %v419_v18 = vld [vmem:[%s1160_s0 + $0x40] sm:$0xff] }
   0xa   :  { %v417_v17 = vld [vmem:[%s1160_s0 + $0x190] sm:$0xff]  ;;  %416 = vst [vmem:[%s1161_s1 + $0x10] sm:$0xff] %v415_v16  ;;  %v421_v19 = vld [vmem:[%s1160_s0 + $0x1c0] sm:$0xff]  ;;  %420 = vst [vmem:[%s1161_s1 + $0x40] sm:$0xff] %v419_v18 }
   0xb   :  { %418 = vst [vmem:[%s1161_s1 + $0x190] sm:$0xff] %v417_v17  ;;  %v423_v20 = vld [vmem:[%s1160_s0 + $0x70] sm:$0xff]  ;;  %422 = vst [vmem:[%s1161_s1 + $0x1c0] sm:$0xff] %v421_v19  ;;  %v427_v22 = vld [vmem:[%s1160_s0 + $0xa0] sm:$0xff] }
   0xc   :  { %424 = vst [vmem:[%s1161_s1 + $0x70] sm:$0xff] %v423_v20  ;;  %v425_v21 = vld [vmem:[%s1160_s0 + $0x1f0] sm:$0xff]  ;;  %v429_v23 = vld [vmem:[%s1160_s0 + $0x220] sm:$0xff]  ;;  %428 = vst [vmem:[%s1161_s1 + $0xa0] sm:$0xff] %v427_v22 }
   0xd   :  { %426 = vst [vmem:[%s1161_s1 + $0x1f0] sm:$0xff] %v425_v21  ;;  %430 = vst [vmem:[%s1161_s1 + $0x220] sm:$0xff] %v429_v23  ;;  %v431_v24 = vld [vmem:[%s1160_s0 + $0xd0] sm:$0xff]  ;;  %v435_v26 = vld [vmem:[%s1160_s0 + $0x100] sm:$0xff] }
   0xe   :  { %v433_v25 = vld [vmem:[%s1160_s0 + $0x250] sm:$0xff]  ;;  %432 = vst [vmem:[%s1161_s1 + $0xd0] sm:$0xff] %v431_v24  ;;  %436 = vst [vmem:[%s1161_s1 + $0x100] sm:$0xff] %v435_v26  ;;  %v437_v27 = vld [vmem:[%s1160_s0 + $0x280] sm:$0xff] }
   0xf   :  { %434 = vst [vmem:[%s1161_s1 + $0x250] sm:$0xff] %v433_v25  ;;  %v439_v28 = vld [vmem:[%s1160_s0 + $0x130] sm:$0xff]  ;;  %438 = vst [vmem:[%s1161_s1 + $0x280] sm:$0xff] %v437_v27  ;;  %v443_v30 = vld [vmem:[%s1160_s0 + $0x160] sm:$0xff] }
  0x10   :  { %v441_v29 = vld [vmem:[%s1160_s0 + $0x2b0] sm:$0xff]  ;;  %440 = vst [vmem:[%s1161_s1 + $0x130] sm:$0xff] %v439_v28  ;;  %v445_v31 = vld [vmem:[%s1160_s0 + $0x2e0] sm:$0xff]  ;;  %444 = vst [vmem:[%s1161_s1 + $0x160] sm:$0xff] %v443_v30 }
  0x11   :  { %442 = vst [vmem:[%s1161_s1 + $0x2b0] sm:$0xff] %v441_v29  ;;  %v129_v32 = vld [vmem:[%s1160_s0] sm:$0xff]  ;;  %446 = vst [vmem:[%s1161_s1 + $0x2e0] sm:$0xff] %v445_v31  ;;  %v450_v34 = vld [vmem:[%s1160_s0 + $0x30] sm:$0xff] }
  0x12   :  { %447 = vst [vmem:[%s1161_s1 + $0x20] sm:$0xff] %v129_v32  ;;  %v448_v33 = vld [vmem:[%s1160_s0 + $0x180] sm:$0xff]  ;;  %v452_v35 = vld [vmem:[%s1160_s0 + $0x1b0] sm:$0xff]  ;;  %451 = vst [vmem:[%s1161_s1 + $0x50] sm:$0xff] %v450_v34 }
  0x13   :  { %449 = vst [vmem:[%s1161_s1 + $0x1a0] sm:$0xff] %v448_v33  ;;  %453 = vst [vmem:[%s1161_s1 + $0x1d0] sm:$0xff] %v452_v35  ;;  %v454_v36 = vld [vmem:[%s1160_s0 + $0x60] sm:$0xff]  ;;  %v458_v38 = vld [vmem:[%s1160_s0 + $0x90] sm:$0xff] }
  0x14   :  { %v456_v37 = vld [vmem:[%s1160_s0 + $0x1e0] sm:$0xff]  ;;  %455 = vst [vmem:[%s1161_s1 + $0x80] sm:$0xff] %v454_v36  ;;  %459 = vst [vmem:[%s1161_s1 + $0xb0] sm:$0xff] %v458_v38  ;;  %v460_v39 = vld [vmem:[%s1160_s0 + $0x210] sm:$0xff] }
  0x15   :  { %457 = vst [vmem:[%s1161_s1 + $0x200] sm:$0xff] %v456_v37  ;;  %v462_v40 = vld [vmem:[%s1160_s0 + $0xc0] sm:$0xff]  ;;  %461 = vst [vmem:[%s1161_s1 + $0x230] sm:$0xff] %v460_v39  ;;  %v466_v42 = vld [vmem:[%s1160_s0 + $0xf0] sm:$0xff] }
  0x16   :  { %v464_v41 = vld [vmem:[%s1160_s0 + $0x240] sm:$0xff]  ;;  %463 = vst [vmem:[%s1161_s1 + $0xe0] sm:$0xff] %v462_v40  ;;  %v468_v43 = vld [vmem:[%s1160_s0 + $0x270] sm:$0xff]  ;;  %467 = vst [vmem:[%s1161_s1 + $0x110] sm:$0xff] %v466_v42 }
  0x17   :  { %465 = vst [vmem:[%s1161_s1 + $0x260] sm:$0xff] %v464_v41  ;;  %v470_v44 = vld [vmem:[%s1160_s0 + $0x120] sm:$0xff]  ;;  %469 = vst [vmem:[%s1161_s1 + $0x290] sm:$0xff] %v468_v43  ;;  %v474_v46 = vld [vmem:[%s1160_s0 + $0x150] sm:$0xff] }
  0x18   :  { %471 = vst [vmem:[%s1161_s1 + $0x140] sm:$0xff] %v470_v44  ;;  %v472_v45 = vld [vmem:[%s1160_s0 + $0x2a0] sm:$0xff]  ;;  %v476_v47 = vld [vmem:[%s1160_s0 + $0x2d0] sm:$0xff]  ;;  %475 = vst [vmem:[%s1161_s1 + $0x170] sm:$0xff] %v474_v46 }
  0x19   :  { %473 = vst [vmem:[%s1161_s1 + $0x2c0] sm:$0xff] %v472_v45  ;;  %477 = vst [vmem:[%s1161_s1 + $0x2f0] sm:$0xff] %v476_v47  ;;  %v480_v49 = vld [vmem:[%s1160_s0 + $0x1a8] sm:$0xff]  ;;  %v482_v50 = vld [vmem:[%s1160_s0 + $0x58] sm:$0xff] }
  0x1a   :  { %479 = vst [vmem:[%s1161_s1 + $0x8] sm:$0xff] %v478_v48  ;;  %481 = vst [vmem:[%s1161_s1 + $0x188] sm:$0xff] %v480_v49  ;;  %v484_v51 = vld [vmem:[%s1160_s0 + $0x1d8] sm:$0xff]  ;;  %v486_v52 = vld [vmem:[%s1160_s0 + $0x88] sm:$0xff] }
  0x1b   :  { %483 = vst [vmem:[%s1161_s1 + $0x38] sm:$0xff] %v482_v50  ;;  %v488_v53 = vld [vmem:[%s1160_s0 + $0x208] sm:$0xff]  ;;  %485 = vst [vmem:[%s1161_s1 + $0x1b8] sm:$0xff] %v484_v51  ;;  %v490_v54 = vld [vmem:[%s1160_s0 + $0xb8] sm:$0xff] }
  0x1c   :  { %487 = vst [vmem:[%s1161_s1 + $0x68] sm:$0xff] %v486_v52  ;;  %489 = vst [vmem:[%s1161_s1 + $0x1e8] sm:$0xff] %v488_v53  ;;  %v492_v55 = vld [vmem:[%s1160_s0 + $0x238] sm:$0xff]  ;;  %v494_v56 = vld [vmem:[%s1160_s0 + $0xe8] sm:$0xff] }
  0x1d   :  { %491 = vst [vmem:[%s1161_s1 + $0x98] sm:$0xff] %v490_v54  ;;  %493 = vst [vmem:[%s1161_s1 + $0x218] sm:$0xff] %v492_v55  ;;  %v496_v57 = vld [vmem:[%s1160_s0 + $0x268] sm:$0xff]  ;;  %v498_v58 = vld [vmem:[%s1160_s0 + $0x118] sm:$0xff] }
  0x1e   :  { %495 = vst [vmem:[%s1161_s1 + $0xc8] sm:$0xff] %v494_v56  ;;  %v500_v59 = vld [vmem:[%s1160_s0 + $0x298] sm:$0xff]  ;;  %497 = vst [vmem:[%s1161_s1 + $0x248] sm:$0xff] %v496_v57  ;;  %v502_v60 = vld [vmem:[%s1160_s0 + $0x148] sm:$0xff] }
  0x1f   :  { %499 = vst [vmem:[%s1161_s1 + $0xf8] sm:$0xff] %v498_v58  ;;  %501 = vst [vmem:[%s1161_s1 + $0x278] sm:$0xff] %v500_v59  ;;  %v504_v61 = vld [vmem:[%s1160_s0 + $0x2c8] sm:$0xff]  ;;  %v506_v62 = vld [vmem:[%s1160_s0 + $0x178] sm:$0xff] }
  0x20   :  { %503 = vst [vmem:[%s1161_s1 + $0x128] sm:$0xff] %v502_v60  ;;  %505 = vst [vmem:[%s1161_s1 + $0x2a8] sm:$0xff] %v504_v61  ;;  %v508_v63 = vld [vmem:[%s1160_s0 + $0x2f8] sm:$0xff]  ;;  %v514_v2 = vld [vmem:[%s1160_s0 + $0x48] sm:$0xff] }
  0x21   :  { %507 = vst [vmem:[%s1161_s1 + $0x158] sm:$0xff] %v506_v62  ;;  %v510_v0 = vld [vmem:[%s1160_s0 + $0x18] sm:$0xff]  ;;  %509 = vst [vmem:[%s1161_s1 + $0x2d8] sm:$0xff] %v508_v63  ;;  %v516_v3 = vld [vmem:[%s1160_s0 + $0x1c8] sm:$0xff] }
  0x22   :  { %v512_v1 = vld [vmem:[%s1160_s0 + $0x198] sm:$0xff]  ;;  %511 = vst [vmem:[%s1161_s1 + $0x18] sm:$0xff] %v510_v0  ;;  %515 = vst [vmem:[%s1161_s1 + $0x48] sm:$0xff] %v514_v2  ;;  %v522_v6 = vld [vmem:[%s1160_s0 + $0xa8] sm:$0xff] }
  0x23   :  { %513 = vst [vmem:[%s1161_s1 + $0x198] sm:$0xff] %v512_v1  ;;  %v518_v4 = vld [vmem:[%s1160_s0 + $0x78] sm:$0xff]  ;;  %517 = vst [vmem:[%s1161_s1 + $0x1c8] sm:$0xff] %v516_v3  ;;  %v524_v7 = vld [vmem:[%s1160_s0 + $0x228] sm:$0xff] }
  0x24   :  { %519 = vst [vmem:[%s1161_s1 + $0x78] sm:$0xff] %v518_v4  ;;  %v520_v5 = vld [vmem:[%s1160_s0 + $0x1f8] sm:$0xff]  ;;  %523 = vst [vmem:[%s1161_s1 + $0xa8] sm:$0xff] %v522_v6  ;;  %v530_v10 = vld [vmem:[%s1160_s0 + $0x108] sm:$0xff] }
  0x25   :  { %521 = vst [vmem:[%s1161_s1 + $0x1f8] sm:$0xff] %v520_v5  ;;  %525 = vst [vmem:[%s1161_s1 + $0x228] sm:$0xff] %v524_v7  ;;  %v526_v8 = vld [vmem:[%s1160_s0 + $0xd8] sm:$0xff]  ;;  %v532_v11 = vld [vmem:[%s1160_s0 + $0x288] sm:$0xff] }
  0x26   :  { %v528_v9 = vld [vmem:[%s1160_s0 + $0x258] sm:$0xff]  ;;  %527 = vst [vmem:[%s1161_s1 + $0xd8] sm:$0xff] %v526_v8  ;;  %531 = vst [vmem:[%s1161_s1 + $0x108] sm:$0xff] %v530_v10  ;;  %v538_v14 = vld [vmem:[%s1160_s0 + $0x168] sm:$0xff] }
  0x27   :  { %529 = vst [vmem:[%s1161_s1 + $0x258] sm:$0xff] %v528_v9  ;;  %v534_v12 = vld [vmem:[%s1160_s0 + $0x138] sm:$0xff]  ;;  %533 = vst [vmem:[%s1161_s1 + $0x288] sm:$0xff] %v532_v11  ;;  %v540_v15 = vld [vmem:[%s1160_s0 + $0x2e8] sm:$0xff] }
  0x28   :  { %v536_v13 = vld [vmem:[%s1160_s0 + $0x2b8] sm:$0xff]  ;;  %535 = vst [vmem:[%s1161_s1 + $0x138] sm:$0xff] %v534_v12  ;;  %v542_v16 = vld [vmem:[%s1160_s0 + $0x8] sm:$0xff]  ;;  %539 = vst [vmem:[%s1161_s1 + $0x168] sm:$0xff] %v538_v14 }
  0x29   :  { %537 = vst [vmem:[%s1161_s1 + $0x2b8] sm:$0xff] %v536_v13  ;;  %541 = vst [vmem:[%s1161_s1 + $0x2e8] sm:$0xff] %v540_v15  ;;  %v544_v17 = vld [vmem:[%s1160_s0 + $0x188] sm:$0xff]  ;;  %v546_v18 = vld [vmem:[%s1160_s0 + $0x38] sm:$0xff] }
  0x2a   :  { %543 = vst [vmem:[%s1161_s1 + $0x28] sm:$0xff] %v542_v16  ;;  %v548_v19 = vld [vmem:[%s1160_s0 + $0x1b8] sm:$0xff]  ;;  %545 = vst [vmem:[%s1161_s1 + $0x1a8] sm:$0xff] %v544_v17  ;;  %v550_v20 = vld [vmem:[%s1160_s0 + $0x68] sm:$0xff] }
  0x2b   :  { %547 = vst [vmem:[%s1161_s1 + $0x58] sm:$0xff] %v546_v18  ;;  %549 = vst [vmem:[%s1161_s1 + $0x1d8] sm:$0xff] %v548_v19  ;;  %v552_v21 = vld [vmem:[%s1160_s0 + $0x1e8] sm:$0xff]  ;;  %v554_v22 = vld [vmem:[%s1160_s0 + $0x98] sm:$0xff] }
  0x2c   :  { %551 = vst [vmem:[%s1161_s1 + $0x88] sm:$0xff] %v550_v20  ;;  %553 = vst [vmem:[%s1161_s1 + $0x208] sm:$0xff] %v552_v21  ;;  %v556_v23 = vld [vmem:[%s1160_s0 + $0x218] sm:$0xff]  ;;  %v558_v24 = vld [vmem:[%s1160_s0 + $0xc8] sm:$0xff] }
  0x2d   :  { %555 = vst [vmem:[%s1161_s1 + $0xb8] sm:$0xff] %v554_v22  ;;  %v560_v25 = vld [vmem:[%s1160_s0 + $0x248] sm:$0xff]  ;;  %557 = vst [vmem:[%s1161_s1 + $0x238] sm:$0xff] %v556_v23  ;;  %v562_v26 = vld [vmem:[%s1160_s0 + $0xf8] sm:$0xff] }
  0x2e   :  { %559 = vst [vmem:[%s1161_s1 + $0xe8] sm:$0xff] %v558_v24  ;;  %561 = vst [vmem:[%s1161_s1 + $0x268] sm:$0xff] %v560_v25  ;;  %v564_v27 = vld [vmem:[%s1160_s0 + $0x278] sm:$0xff]  ;;  %v566_v28 = vld [vmem:[%s1160_s0 + $0x128] sm:$0xff] }
  0x2f   :  { %563 = vst [vmem:[%s1161_s1 + $0x118] sm:$0xff] %v562_v26  ;;  %565 = vst [vmem:[%s1161_s1 + $0x298] sm:$0xff] %v564_v27  ;;  %v568_v29 = vld [vmem:[%s1160_s0 + $0x2a8] sm:$0xff]  ;;  %v570_v30 = vld [vmem:[%s1160_s0 + $0x158] sm:$0xff] }
  0x30   :  { %567 = vst [vmem:[%s1161_s1 + $0x148] sm:$0xff] %v566_v28  ;;  %v572_v31 = vld [vmem:[%s1160_s0 + $0x2d8] sm:$0xff]  ;;  %569 = vst [vmem:[%s1161_s1 + $0x2c8] sm:$0xff] %v568_v29 }
  0x31   :  { %571 = vst [vmem:[%s1161_s1 + $0x178] sm:$0xff] %v570_v30  ;;  %573 = vst [vmem:[%s1161_s1 + $0x2f8] sm:$0xff] %v572_v31 }

// kernel: sfno_forward.13
= control target key start
LH: loop header
LB: loop body
LE: loop exit
PB: predicated region body
PF: predicated region fallthrough
CT: control target
= control target key end

     0   :  { %s958_s21 = smov 0   ;;  %s960_s22 = smov 0   ;;  %s1035_s0 = inlined_call_operand.vmem [shape: f32[2,8,2048], index: 0, kind: input, shape index: {}]   ;;  %s1036_s1 = inlined_call_operand.vmem [shape: f32[2,8,2048], index: 1, kind: input, shape index: {}]   ;;  %s1037_s2 = inlined_call_operand.vmem [shape: f32[16,8], index: 2, kind: input, shape index: {}]   ;;  %s1038_s3 = inlined_call_operand.vmem [shape: f32[16,1], index: 3, kind: input, shape index: {}]   ;;  %s1039_s4 = inlined_call_operand.vmem [shape: f32[8,16], index: 4, kind: input, shape index: {}]   ;;  %s1040_s5 = inlined_call_operand.vmem [shape: f32[8,1], index: 5, kind: input, shape index: {}]   ;;  %s1041_s6 = inlined_call_operand.vmem [shape: f32[2,8,2048], index: 6, kind: output, shape index: {}]  }
   0x1   :  { %s962_s23 = smov 0   ;;  %s964_s24 = smov 0  }
   0x2   :  { %s966_s25 = smov 0  }
   0x3 LB: > { %s25_s26 = sadd.s32 1, %s911_s23  ;;  %s28_s27 = sadd.s32 1, %s915_s24  ;;  %s919_s25 = sphi %s966_s25, %s16_s25   ;;  %s915_s24 = sphi %s964_s24, %s1045_s24   ;;  %s911_s23 = sphi %s962_s23, %s1044_s23   ;;  %s907_s22 = sphi %s960_s22, %s1043_s22   ;;  %s903_s21 = sphi %s958_s21, %s1042_s21  }
   0x4   : > { %p26_p0 = scmp.ge.s32.totalorder %s25_s26, 4  ;;  %p811_p1 = scmp.ge.s32.totalorder %s919_s25, 1 }
   0x5   : > { %p250_p2 = scmp.lt.s32.totalorder %s919_s25, 9 }
   0x6   : > { %s1047_s26 = smov (%p26_p0, %s25_s26), 0  ;;  %s1049_s27 = smov (!%p26_p0, %s28_s27), %s915_s24 }
   0x7   : > { %p251_p3 = pnand %p811_p1, %p250_p2  ;;  %p30_p4 = scmp.ge.s32.totalorder %s1049_s27, 2 }
   0x8   : > { %s812_s28 = sshll.u32 (!%p251_p3), %s903_s21, 2  ;;  %p298_p5 = scmp.lt.s32.totalorder (!%p251_p3), %s907_s22, 1  ;;  %v921_v0 = vmov (!%p251_p3), 0.0   ;;  %v333_v1 = vld [vmem:[%s1038_s3] sm:$0xff] (!%p251_p3)  ;;  %v922_v2 = vmov (!%p251_p3), 0   ;;  %v334_v3 = vld [vmem:[%s1038_s3 + $0x8] sm:$0xff] (!%p251_p3) }
   0x9   : > { %s1051_s27 = smov (%p30_p4, %s1049_s27), 0  ;;  %254 = sbr.rel (%p251_p3) target bundleno = 471 (0x1d7), region = 44 }
   0xa   : > { %p300_p6 = scmp.lt.s32.totalorder (!%p251_p3), %s812_s28, 15  ;;  %416 = vmatprep.mubr.f32.mxu0 (!%p251_p3), %v921_v0  ;;  %493 = vmatprep.mubr.f32.mxu1 (!%p251_p3), %v921_v0  ;;  %v327_v4 = vld [vmem:[%s1037_s2] sm:$0xff] (!%p251_p3)  ;;  %vm345_vm0 = vcmask (!%p251_p3), 64512   ;;  %v328_v9 = vld [vmem:[%s1037_s2 + $0x8] sm:$0xff] (!%p251_p3)  ;;  %vm537_vm1 = vcmask (!%p251_p3), 130048  }
   0xb   : > { %879 = vset.pattern.permute.xlu0 (!%p251_p3), %v922_v2  ;;  %880 = vset.pattern.permute.xlu1 (!%p251_p3), %v922_v2  ;;  %v531_v10 = vld [vmem:[%s1040_s5] sm:$0xff] (!%p251_p3) }
   0xc   : > { %337 = vperm.xlu0 (!%p251_p3), %879, %v333_v1   ;;  %534 = vperm.xlu1 (!%p251_p3), %880, %v531_v10   ;;  %v522_v41 = vld [vmem:[%s1039_s4] sm:$0xff] (!%p251_p3) }
  0x10   : > { %s1053_s22 = smov (!%p298_p5, %s907_s22), 1  ;;  %s1055_s28 = smov (!%p300_p6, %s812_s28), 15  ;;  %342 = vperm.xlu0 %879, %v334_v3  }
  0x11   : > { %s813_s7 = sshll.u32 %s1053_s22, 4 }
  0x12   : > { %s303_s10 = sadd.s32 %s813_s7, %s1055_s28 }
  0x13   : > { %s994_s11 = sshll.u32 %s303_s10, 3 }
  0x14   : > { %s305_s14 = scalar_lea.vmem %s1035_s0, %s994_s11  ;;  %s315_s30 = scalar_lea.vmem %s1036_s1, %s994_s11 }
  0x15   : > { %v330_v5 = vld [vmem:[%s305_s14 + $0x8] sm:$0xff]  ;;  %v332_v6 = vld [vmem:[%s305_s14 + $0x18] sm:$0xff]  ;;  %v329_v7 = vld [vmem:[%s305_s14] sm:$0xff]  ;;  %s325_s9 = scalar_lea.vmem %s1041_s6, %s994_s11 }
  0x16   : > { %352 = vmatprep.subr.mxu0 %v330_v5  ;;  %429 = vmatprep.subr.mxu1 %v332_v6  ;;  %v331_v8 = vld [vmem:[%s305_s14 + $0x10] sm:$0xff]  ;;  %v683_v45 = vld [vmem:[%s315_s30] sm:$0xff]  ;;  %v684_v50 = vld [vmem:[%s315_s30 + $0x8] sm:$0xff] }
  0x17   : > { %353 = vmatpush1.msra.mxu0 %v329_v7  ;;  %430 = vmatpush1.msra.mxu1 %v331_v8  ;;  %v685_v46 = vld [vmem:[%s315_s30 + $0x10] sm:$0xff]  ;;  %v686_v52 = vld [vmem:[%s315_s30 + $0x18] sm:$0xff] }
  0x18   : > { %821 = vmatmul.mubr.msk.f32.vlgmr.msra.gmra.mrb[0].mxu0 %vm345_vm0, %v327_v4  ;;  %823 = vmatmul.mubr.msk.f32.vlgmr.msra.gmra.mrb[0].mxu1 %vm345_vm0, %v327_v4 }
  0x19   : > { %422 = vmatprep.mubr.f32.mxu0 %v921_v0  ;;  %499 = vmatprep.mubr.f32.mxu1 %v921_v0 }
  0x1c   : > { %822 = vmatmul.mubr.msk.f32.gmra.mrb[2].mxu0 %vm345_vm0, %v328_v9  ;;  %824 = vmatmul.mubr.msk.f32.gmra.mrb[2].mxu1 %vm345_vm0, %v328_v9 }
  0x1d   : > { %605 = vmatprep.mubr.f32.mxu0 %v921_v0  ;;  %676 = vmatprep.mubr.f32.mxu1 %v921_v0 }
  0x8b   : > { %v338_v11 = vpop.permute.xlu0 %337  ;;  %v535_v42 = vpop.permute.xlu1 %534 }
  0x8f   : > { %v343_v18 = vpop.permute.xlu0 %342 }
  0xeb   : > { %v418_v12 = vpop.f32.mrb[0].mxu0  ;;  %v495_v13 = vpop.f32.mrb[0].mxu1 }
  0xec   : > { %v420_v14 = vpop.f32.mrb[1].mxu0  ;;  %v497_v15 = vpop.f32.mrb[1].mxu1  ;;  %v419_v16 = vadd.f32 %v418_v12, %v338_v11  ;;  %v496_v17 = vadd.f32 %v495_v13, %v338_v11 }
  0xed   : > { %v421_v19 = vadd.f32 %v420_v14, %v338_v11  ;;  %v498_v20 = vadd.f32 %v497_v15, %v338_v11 }
  0xee   : > { %v506_v29 = vmax.f32 %v419_v16, 0.0  ;;  %v508_v30 = vmax.f32 %v496_v17, 0.0 }
  0xef   : > { %v424_v21 = vpop.f32.mrb[2].mxu0  ;;  %v501_v22 = vpop.f32.mrb[2].mxu1  ;;  %v507_v33 = vmax.f32 %v421_v19, 0.0  ;;  %v509_v34 = vmax.f32 %v498_v20, 0.0 }
  0xf0   : > { %v425_v23 = vadd.f32 %v424_v21, %v343_v18  ;;  %v502_v24 = vadd.f32 %v501_v22, %v343_v18  ;;  %v426_v25 = vpop.f32.mrb[3].mxu0  ;;  %v503_v26 = vpop.f32.mrb[3].mxu1 }
  0xf1   : > { %v427_v27 = vadd.f32 %v426_v25, %v343_v18  ;;  %v504_v28 = vadd.f32 %v503_v26, %v343_v18 }
  0xf2   : > { %v510_v31 = vmax.f32 %v425_v23, 0.0  ;;  %v512_v32 = vmax.f32 %v502_v24, 0.0 }
  0xf3   : > { %v511_v35 = vmax.f32 %v427_v27, 0.0  ;;  %v513_v36 = vmax.f32 %v504_v28, 0.0 }
  0xf4   : > { %v831_v37 = vpack.c.bf16 %v510_v31, %v506_v29  ;;  %v835_v38 = vpack.c.bf16 %v512_v32, %v508_v30 }
  0xf5   : > { %v829_v39 = vpack.c.bf16 %v511_v35, %v507_v33  ;;  %v833_v40 = vpack.c.bf16 %v513_v36, %v509_v34 }
  0xf7   : > { %830 = vmatprep.subr.bf16.mxu0 %v829_v39  ;;  %834 = vmatprep.subr.bf16.mxu1 %v833_v40 }
  0xf8   : > { %832 = vmatpush1.bf16.msra.mxu0 %v831_v37  ;;  %836 = vmatpush1.bf16.msra.mxu1 %v835_v38 }
  0xfb   : > { %825 = vmatmul.mubr.msk.f32.vlgmr.msra.gmra.mrb[4].mxu0 %vm537_vm1, %v522_v41  ;;  %826 = vmatmul.mubr.msk.f32.vlgmr.msra.gmra.mrb[4].mxu1 %vm537_vm1, %v522_v41 }
 0x1ce   : > { %v607_v43 = vpop.f32.mrb[4].mxu0  ;;  %v678_v44 = vpop.f32.mrb[4].mxu1 }
 0x1cf   : > { %v608_v47 = vadd.f32 %v607_v43, %v535_v42  ;;  %v679_v48 = vadd.f32 %v678_v44, %v535_v42  ;;  %v609_v49 = vpop.f32.mrb[5].mxu0  ;;  %v680_v51 = vpop.f32.mrb[5].mxu1 }
 0x1d0   : > { %v610_v53 = vadd.f32 %v609_v49, %v535_v42  ;;  %v681_v54 = vadd.f32 %v680_v51, %v535_v42 }
 0x1d1   : > { %v687_v55 = vadd.f32 %v683_v45, %v608_v47  ;;  %v689_v56 = vadd.f32 %v685_v46, %v679_v48 }
 0x1d2   : > { %v688_v57 = vadd.f32 %v684_v50, %v610_v53  ;;  %v690_v58 = vadd.f32 %v686_v52, %v681_v54 }
 0x1d3   : > { %v691_v59 = vmax.f32 %v687_v55, 0.0  ;;  %v693_v60 = vmax.f32 %v689_v56, 0.0 }
 0x1d4   : > { %v692_v61 = vmax.f32 %v688_v57, 0.0  ;;  %v694_v62 = vmax.f32 %v690_v58, 0.0 }
 0x1d5   : > { %695 = vst [vmem:[%s325_s9] sm:$0xff] %v691_v59  ;;  %697 = vst [vmem:[%s325_s9 + $0x10] sm:$0xff] %v693_v60 }
 0x1d6   : > { %696 = vst [vmem:[%s325_s9 + $0x8] sm:$0xff] %v692_v61  ;;  %698 = vst [vmem:[%s325_s9 + $0x18] sm:$0xff] %v694_v62 }
 0x1d7 PF: > { %s16_s25 = sadd.s32 1, %s919_s25   ;;  %s1042_s21 = smov %s911_s23 }
 0x1d8   : > { %p13_p7 = scmp.ge.s32.totalorder %s16_s25, 10   ;;  %s1043_s22 = smov %s915_s24 }
 0x1d9   : > { %s1044_s23 = smov %s1047_s26  ;;  %s1045_s24 = smov %s1051_s27 }
 0x1da   :  { %15 = sbr.rel (!%p13_p7) target bundleno = 3 (0x3), region = 77 }

// kernel: sfno_forward.15
= control target key start
LH: loop header
LB: loop body
LE: loop exit
PB: predicated region body
PF: predicated region fallthrough
CT: control target
= control target key end

     0   :  { %s1188_s27 = smov 0   ;;  %s1190_s28 = smov 0   ;;  %s1285_s0 = inlined_call_operand.vmem [shape: f32[2,8,2048], index: 0, kind: input, shape index: {}]   ;;  %s1286_s1 = inlined_call_operand.vmem [shape: f32[2,8,2048], index: 1, kind: input, shape index: {}]   ;;  %s1287_s2 = inlined_call_operand.vmem [shape: f32[8,8], index: 2, kind: input, shape index: {}]   ;;  %s1288_s3 = inlined_call_operand.vmem [shape: f32[8,1], index: 3, kind: input, shape index: {}]   ;;  %s1289_s4 = inlined_call_operand.vmem [shape: f32[16,8], index: 4, kind: input, shape index: {}]   ;;  %s1290_s5 = inlined_call_operand.vmem [shape: f32[16,1], index: 5, kind: input, shape index: {}]   ;;  %s1291_s6 = inlined_call_operand.vmem [shape: f32[8,16], index: 6, kind: input, shape index: {}]   ;;  %s1292_s7 = inlined_call_operand.vmem [shape: f32[8,1], index: 7, kind: input, shape index: {}]   ;;  %s1293_s8 = inlined_call_operand.vmem [shape: f32[2,8,2048], index: 8, kind: output, shape index: {}]  }
   0x1   :  { %s1192_s29 = smov 0   ;;  %s1194_s30 = smov 0  }
   0x2   :  { %s1196_s9 = smov 0  }
   0x3 LB: > { %s27_s10 = sadd.s32 1, %s1131_s29  ;;  %s30_s11 = sadd.s32 1, %s1135_s30  ;;  %s1139_s9 = sphi %s1196_s9, %s18_s9   ;;  %s1135_s30 = sphi %s1194_s30, %s1297_s30   ;;  %s1131_s29 = sphi %s1192_s29, %s1296_s29   ;;  %s1127_s28 = sphi %s1190_s28, %s1295_s28   ;;  %s1123_s27 = sphi %s1188_s27, %s1294_s27  }
   0x4   : > { %p28_p0 = scmp.ge.s32.totalorder %s27_s10, 4  ;;  %p1021_p1 = scmp.ge.s32.totalorder %s1139_s9, 1 }
   0x5   : > { %p300_p2 = scmp.lt.s32.totalorder %s1139_s9, 9 }
   0x6   : > { %s1299_s10 = smov (%p28_p0, %s27_s10), 0  ;;  %s1301_s11 = smov (!%p28_p0, %s30_s11), %s1135_s30 }
   0x7   : > { %p301_p3 = pnand %p1021_p1, %p300_p2  ;;  %p32_p4 = scmp.ge.s32.totalorder %s1301_s11, 2 }
   0x8   : > { %s1022_s12 = sshll.u32 (!%p301_p3), %s1123_s27, 2  ;;  %p352_p5 = scmp.lt.s32.totalorder (!%p301_p3), %s1127_s28, 1  ;;  %v1141_v0 = vmov (!%p301_p3), 0.0   ;;  %v387_v1 = vld [vmem:[%s1290_s5] sm:$0xff] (!%p301_p3)  ;;  %v1142_v2 = vmov (!%p301_p3), 0   ;;  %v388_v3 = vld [vmem:[%s1290_s5 + $0x8] sm:$0xff] (!%p301_p3) }
   0x9   : > { %s1303_s11 = smov (%p32_p4, %s1301_s11), 0  ;;  %304 = sbr.rel (%p301_p3) target bundleno = 479 (0x1df), region = 52 }
   0xa   : > { %p354_p6 = scmp.lt.s32.totalorder (!%p301_p3), %s1022_s12, 15  ;;  %470 = vmatprep.mubr.f32.mxu0 (!%p301_p3), %v1141_v0  ;;  %547 = vmatprep.mubr.f32.mxu1 (!%p301_p3), %v1141_v0  ;;  %v381_v4 = vld [vmem:[%s1289_s4] sm:$0xff] (!%p301_p3)  ;;  %vm399_vm0 = vcmask (!%p301_p3), 64512   ;;  %v382_v9 = vld [vmem:[%s1289_s4 + $0x8] sm:$0xff] (!%p301_p3)  ;;  %vm591_vm1 = vcmask (!%p301_p3), 130048  }
   0xb   : > { %1099 = vset.pattern.permute.xlu0 (!%p301_p3), %v1142_v2  ;;  %1100 = vset.pattern.permute.xlu1 (!%p301_p3), %v1142_v2  ;;  %v585_v10 = vld [vmem:[%s1292_s7] sm:$0xff] (!%p301_p3) }
   0xc   : > { %391 = vperm.xlu0 (!%p301_p3), %1099, %v387_v1   ;;  %588 = vperm.xlu1 (!%p301_p3), %1100, %v585_v10   ;;  %v891_v11 = vld [vmem:[%s1288_s3] sm:$0xff] (!%p301_p3) }
   0xd   : > { %v576_v44 = vld [vmem:[%s1291_s6] sm:$0xff] (!%p301_p3) }
   0xe   : > { %v737_v47 = vld [vmem:[%s1287_s2] sm:$0xff] (!%p301_p3) }
  0x10   : > { %s1305_s28 = smov (!%p352_p5, %s1127_s28), 1  ;;  %s1307_s12 = smov (!%p354_p6, %s1022_s12), 15  ;;  %396 = vperm.xlu0 %1099, %v388_v3   ;;  %894 = vperm.xlu1 %1100, %v891_v11  }
  0x11   : > { %s1023_s15 = sshll.u32 %s1305_s28, 4 }
  0x12   : > { %s357_s18 = sadd.s32 %s1023_s15, %s1307_s12 }
  0x13   : > { %s1226_s19 = sshll.u32 %s357_s18, 3 }
  0x14   : > { %s369_s22 = scalar_lea.vmem %s1286_s1, %s1226_s19  ;;  %s359_s16 = scalar_lea.vmem %s1285_s0, %s1226_s19 }
  0x15   : > { %v384_v5 = vld [vmem:[%s369_s22 + $0x8] sm:$0xff]  ;;  %v386_v6 = vld [vmem:[%s369_s22 + $0x18] sm:$0xff]  ;;  %v383_v7 = vld [vmem:[%s369_s22] sm:$0xff]  ;;  %s379_s24 = scalar_lea.vmem %s1293_s8, %s1226_s19 }
  0x16   : > { %406 = vmatprep.subr.mxu0 %v384_v5  ;;  %483 = vmatprep.subr.mxu1 %v386_v6  ;;  %v385_v8 = vld [vmem:[%s369_s22 + $0x10] sm:$0xff]  ;;  %v739_v42 = vld [vmem:[%s359_s16 + $0x8] sm:$0xff]  ;;  %v741_v43 = vld [vmem:[%s359_s16 + $0x18] sm:$0xff] }
  0x17   : > { %407 = vmatpush1.msra.mxu0 %v383_v7  ;;  %484 = vmatpush1.msra.mxu1 %v385_v8  ;;  %v738_v45 = vld [vmem:[%s359_s16] sm:$0xff]  ;;  %v740_v46 = vld [vmem:[%s359_s16 + $0x10] sm:$0xff] }
  0x18   : > { %1031 = vmatmul.mubr.msk.f32.vlgmr.msra.gmra.mrb[0].mxu0 %vm399_vm0, %v381_v4  ;;  %1033 = vmatmul.mubr.msk.f32.vlgmr.msra.gmra.mrb[0].mxu1 %vm399_vm0, %v381_v4 }
  0x19   : > { %476 = vmatprep.mubr.f32.mxu0 %v1141_v0  ;;  %553 = vmatprep.mubr.f32.mxu1 %v1141_v0 }
  0x1c   : > { %1032 = vmatmul.mubr.msk.f32.gmra.mrb[2].mxu0 %vm399_vm0, %v382_v9  ;;  %1034 = vmatmul.mubr.msk.f32.gmra.mrb[2].mxu1 %vm399_vm0, %v382_v9 }
  0x1d   : > { %659 = vmatprep.mubr.f32.mxu0 %v1141_v0  ;;  %730 = vmatprep.mubr.f32.mxu1 %v1141_v0 }
  0x8b   : > { %v392_v12 = vpop.permute.xlu0 %391  ;;  %v589_v48 = vpop.permute.xlu1 %588 }
  0x8f   : > { %v397_v19 = vpop.permute.xlu0 %396  ;;  %v895_v57 = vpop.permute.xlu1 %894 }
  0xeb   : > { %v472_v13 = vpop.f32.mrb[0].mxu0  ;;  %v549_v14 = vpop.f32.mrb[0].mxu1 }
  0xec   : > { %v474_v15 = vpop.f32.mrb[1].mxu0  ;;  %v551_v16 = vpop.f32.mrb[1].mxu1  ;;  %v473_v17 = vadd.f32 %v472_v13, %v392_v12  ;;  %v550_v18 = vadd.f32 %v549_v14, %v392_v12 }
  0xed   : > { %v475_v20 = vadd.f32 %v474_v15, %v392_v12  ;;  %v552_v21 = vadd.f32 %v551_v16, %v392_v12 }
  0xee   : > { %v560_v30 = vmax.f32 %v473_v17, 0.0  ;;  %v562_v31 = vmax.f32 %v550_v18, 0.0 }
  0xef   : > { %v478_v22 = vpop.f32.mrb[2].mxu0  ;;  %v555_v23 = vpop.f32.mrb[2].mxu1  ;;  %v561_v34 = vmax.f32 %v475_v20, 0.0  ;;  %v563_v35 = vmax.f32 %v552_v21, 0.0 }
  0xf0   : > { %v479_v24 = vadd.f32 %v478_v22, %v397_v19  ;;  %v556_v25 = vadd.f32 %v555_v23, %v397_v19  ;;  %v480_v26 = vpop.f32.mrb[3].mxu0  ;;  %v557_v27 = vpop.f32.mrb[3].mxu1 }
  0xf1   : > { %v481_v28 = vadd.f32 %v480_v26, %v397_v19  ;;  %v558_v29 = vadd.f32 %v557_v27, %v397_v19 }
  0xf2   : > { %v564_v32 = vmax.f32 %v479_v24, 0.0  ;;  %v566_v33 = vmax.f32 %v556_v25, 0.0 }
  0xf3   : > { %v565_v36 = vmax.f32 %v481_v28, 0.0  ;;  %v567_v37 = vmax.f32 %v558_v29, 0.0 }
  0xf4   : > { %v1043_v38 = vpack.c.bf16 %v564_v32, %v560_v30  ;;  %v1047_v39 = vpack.c.bf16 %v566_v33, %v562_v31 }
  0xf5   : > { %v1041_v40 = vpack.c.bf16 %v565_v36, %v561_v34  ;;  %v1045_v41 = vpack.c.bf16 %v567_v37, %v563_v35 }
  0xf7   : > { %1042 = vmatprep.subr.bf16.mxu0 %v1041_v40  ;;  %1046 = vmatprep.subr.bf16.mxu1 %v1045_v41 }
  0xf8   : > { %1044 = vmatpush1.bf16.msra.mxu0 %v1043_v38  ;;  %1048 = vmatpush1.bf16.msra.mxu1 %v1047_v39 }
  0xf9   : > { %745 = vmatprep.subr.mxu0 %v739_v42  ;;  %816 = vmatprep.subr.mxu1 %v741_v43 }
  0xfb   : > { %1035 = vmatmul.mubr.msk.f32.vlgmr.msra.gmra.mrb[4].mxu0 %vm591_vm1, %v576_v44  ;;  %1036 = vmatmul.mubr.msk.f32.vlgmr.msra.gmra.mrb[4].mxu1 %vm591_vm1, %v576_v44 }
  0xfc   : > { %746 = vmatpush1.msra.mxu0 %v738_v45  ;;  %817 = vmatpush1.msra.mxu1 %v740_v46 }
  0xfd   : > { %809 = vmatprep.mubr.f32.mxu0 %v1141_v0  ;;  %880 = vmatprep.mubr.f32.mxu1 %v1141_v0 }
 0x103   : > { %1037 = vmatmul.mubr.msk.f32.vlgmr.msra.gmra.mrb[4].mxu0 %vm399_vm0, %v737_v47  ;;  %1038 = vmatmul.mubr.msk.f32.vlgmr.msra.gmra.mrb[4].mxu1 %vm399_vm0, %v737_v47 }
 0x1d6   : > { %v811_v49 = vpop.f32.mrb[4].mxu0  ;;  %v882_v50 = vpop.f32.mrb[4].mxu1 }
 0x1d7   : > { %v1049_v51 = vadd.f32 %v811_v49, %v589_v48  ;;  %v1051_v52 = vadd.f32 %v882_v50, %v589_v48  ;;  %v813_v53 = vpop.f32.mrb[5].mxu0  ;;  %v884_v54 = vpop.f32.mrb[5].mxu1 }
 0x1d8   : > { %v1050_v55 = vadd.f32 %v813_v53, %v589_v48  ;;  %v1052_v56 = vadd.f32 %v884_v54, %v589_v48 }
 0x1d9   : > { %v897_v58 = vadd.f32 %v1049_v51, %v895_v57  ;;  %v899_v59 = vadd.f32 %v1051_v52, %v895_v57 }
 0x1da   : > { %v898_v60 = vadd.f32 %v1050_v55, %v895_v57  ;;  %v900_v61 = vadd.f32 %v1052_v56, %v895_v57 }
 0x1db   : > { %v901_v62 = vmax.f32 %v897_v58, 0.0  ;;  %v903_v63 = vmax.f32 %v899_v59, 0.0 }
 0x1dc   : > { %v902_v0 = vmax.f32 %v898_v60, 0.0  ;;  %v904_v1 = vmax.f32 %v900_v61, 0.0 }
 0x1dd   : > { %905 = vst [vmem:[%s379_s24] sm:$0xff] %v901_v62  ;;  %907 = vst [vmem:[%s379_s24 + $0x10] sm:$0xff] %v903_v63 }
 0x1de   : > { %906 = vst [vmem:[%s379_s24 + $0x8] sm:$0xff] %v902_v0  ;;  %908 = vst [vmem:[%s379_s24 + $0x18] sm:$0xff] %v904_v1 }
 0x1df PF: > { %s18_s9 = sadd.s32 1, %s1139_s9   ;;  %s1294_s27 = smov %s1131_s29 }
 0x1e0   : > { %p15_p7 = scmp.ge.s32.totalorder %s18_s9, 10   ;;  %s1295_s28 = smov %s1135_s30 }
 0x1e1   : > { %s1296_s29 = smov %s1299_s10  ;;  %s1297_s30 = smov %s1303_s11 }
 0x1e2   :  { %17 = sbr.rel (!%p15_p7) target bundleno = 3 (0x3), region = 85 }

// kernel: sfno_forward.18
= control target key start
LH: loop header
LB: loop body
LE: loop exit
PB: predicated region body
PF: predicated region fallthrough
CT: control target
= control target key end

     0   :  { %s613_s14 = smov 0   ;;  %s615_s15 = smov 0   ;;  %s671_s0 = inlined_call_operand.vmem [shape: f32[2,8,2048], index: 0, kind: input, shape index: {}]   ;;  %s672_s1 = inlined_call_operand.vmem [shape: f32[1,8], index: 1, kind: input, shape index: {}]   ;;  %s673_s2 = inlined_call_operand.<no memory space> [shape: f32[1,1], index: 2, kind: input, shape index: {}]   ;;  %s674_s3 = inlined_call_operand.vmem [shape: f32[2,1,2048], index: 3, kind: output, shape index: {}]  }
   0x1   :  { %v8_v0 = vstv %s673_s2  ;;  %s617_s16 = smov 0   ;;  %s619_s17 = smov 0  }
   0x2   :  { %9 = vst [vmem:[#allocation2] sm:$0x1] %v8_v0  ;;  %s621_s18 = smov 0  }
   0x3 LB: > { %s24_s2 = sadd.s32 1, %s577_s16  ;;  %s27_s19 = sadd.s32 1, %s581_s17  ;;  %s585_s18 = sphi %s621_s18, %s15_s18   ;;  %s581_s17 = sphi %s619_s17, %s678_s17   ;;  %s577_s16 = sphi %s617_s16, %s677_s16   ;;  %s573_s15 = sphi %s615_s15, %s676_s15   ;;  %s569_s14 = sphi %s613_s14, %s675_s14  }
   0x4   : > { %p25_p0 = scmp.ge.s32.totalorder %s24_s2, 4  ;;  %p493_p1 = scmp.ge.s32.totalorder %s585_s18, 1 }
   0x5   : > { %p160_p2 = scmp.lt.s32.totalorder %s585_s18, 9 }
   0x6   : > { %s680_s2 = smov (%p25_p0, %s24_s2), 0  ;;  %s682_s19 = smov (!%p25_p0, %s27_s19), %s581_s17 }
   0x7   : > { %p161_p3 = pnand %p493_p1, %p160_p2  ;;  %p29_p4 = scmp.ge.s32.totalorder %s682_s19, 2 }
   0x8   : > { %s494_s20 = sshll.u32 (!%p161_p3), %s569_s14, 2  ;;  %p192_p5 = scmp.lt.s32.totalorder (!%p161_p3), %s573_s15, 1  ;;  %v587_v1 = vmov (!%p161_p3), 0.0   ;;  %v588_v3 = vmov (!%p161_p3), 0   ;;  %v210_v4 = vld [vmem:[%s672_s1] sm:$0x1] (!%p161_p3)  ;;  %v221_v9 = vlaneseq (!%p161_p3) }
   0x9   : > { %s684_s19 = smov (%p29_p4, %s682_s19), 0  ;;  %164 = sbr.rel (%p161_p3) target bundleno = 248 (0xf8), region = 32 }
   0xa   : > { %p194_p6 = scmp.lt.s32.totalorder (!%p161_p3), %s494_s20, 15  ;;  %293 = vmatprep.mubr.f32.mxu0 (!%p161_p3), %v587_v1  ;;  %364 = vmatprep.mubr.f32.mxu1 (!%p161_p3), %v587_v1  ;;  %v215_v2 = vld [vmem:[#allocation2] sm:$0x1] (!%p161_p3)  ;;  %vm225_vm0 = vcmask (!%p161_p3), 64512   ;;  %v222_v10 = vshrl.u32 (!%p161_p3), %v221_v9, 7  ;;  %vm402_vm1 = vcmp.lt.s32.totalorder (!%p161_p3), %v221_v9, 512 }
   0xb   : > { %546 = vset.pattern.permute.xlu0 (!%p161_p3), %v588_v3  ;;  %v589_v12 = vmov (!%p161_p3), 1966171168  }
   0xc   : > { %218 = vperm.xlu0 (!%p161_p3), %546, %v215_v2   ;;  %v223_v11 = vsub.s32 (!%p161_p3), 0, %v222_v10  ;;  %v378_v13 = vunpack.c.l.s4 (!%p161_p3), %v589_v12 }
   0xe   : > { %v379_v16 = vunpack.c.0.s8 (!%p161_p3), %v378_v13 }
  0x10   : > { %s686_s15 = smov (!%p192_p5, %s573_s15), 1  ;;  %s688_s20 = smov (!%p194_p6, %s494_s20), 15  ;;  %v382_v23 = vsub.s32 %v379_v16, %v222_v10 }
  0x11   : > { %s495_s21 = sshll.u32 %s686_s15, 4 }
  0x12   : > { %s643_s22 = sadd.s32 %s495_s21, %s688_s20 }
  0x13   : > { %s496_s23 = sshll.u32 %s643_s22, 3  ;;  %s208_s4 = scalar_lea.vmem %s674_s3, %s643_s22 }
  0x14   : > { %s199_s26 = scalar_lea.vmem %s671_s0, %s496_s23 }
  0x15   : > { %v212_v5 = vld [vmem:[%s199_s26 + $0x8] sm:$0xff]  ;;  %v214_v6 = vld [vmem:[%s199_s26 + $0x18] sm:$0xff]  ;;  %v211_v7 = vld [vmem:[%s199_s26] sm:$0xff] }
  0x16   : > { %229 = vmatprep.subr.mxu0 %v212_v5  ;;  %300 = vmatprep.subr.mxu1 %v214_v6  ;;  %v213_v8 = vld [vmem:[%s199_s26 + $0x10] sm:$0xff] }
  0x17   : > { %230 = vmatpush1.msra.mxu0 %v211_v7  ;;  %301 = vmatpush1.msra.mxu1 %v213_v8 }
  0x18   : > { %499 = vmatmul.mubr.msk.f32.vlgmr.msra.gmra.mrb[0].mxu0 %vm225_vm0, %v210_v4  ;;  %500 = vmatmul.mubr.msk.f32.vlgmr.msra.gmra.mrb[0].mxu1 %vm225_vm0, %v210_v4 }
  0x8b   : > { %v219_v14 = vpop.permute.xlu0 %218 }
  0x8c   : > { %v224_v15 = vrot.slane %v219_v14, %v223_v11 }
  0xeb   : > { %v295_v17 = vpop.f32.mrb[0].mxu0  ;;  %v366_v18 = vpop.f32.mrb[0].mxu1 }
  0xec   : > { %v296_v19 = vadd.f32 %v295_v17, %v224_v15  ;;  %v367_v20 = vadd.f32 %v366_v18, %v224_v15  ;;  %v297_v21 = vpop.f32.mrb[1].mxu0  ;;  %v368_v22 = vpop.f32.mrb[1].mxu1 }
  0xed   : > { %v298_v24 = vadd.f32 %v297_v21, %v224_v15  ;;  %v369_v25 = vadd.f32 %v368_v22, %v224_v15 }
  0xef   : > { %v375_v26 = vcombine.low %v296_v19, %v298_v24  ;;  %v376_v27 = vcombine.low %v367_v20, %v369_v25 }
  0xf1   : > { %v383_v28 = vrot.slane %v375_v26, %v382_v23  ;;  %v390_v29 = vrot.slane %v376_v27, %v382_v23 }
  0xf3   : > { %v391_v30 = vcombine.low %v383_v28, %v390_v29 }
  0xf5   : > { %v398_v31 = vrot.slane %v391_v30, %v382_v23 }
  0xf7   : > { %404 = vst.msk [vmem:[%s208_s4] sm:$0xf] %vm402_vm1, %v398_v31 }
  0xf8 PF: > { %s15_s18 = sadd.s32 1, %s585_s18   ;;  %s675_s14 = smov %s577_s16 }
  0xf9   : > { %p12_p7 = scmp.ge.s32.totalorder %s15_s18, 10   ;;  %s676_s15 = smov %s581_s17 }
  0xfa   : > { %s677_s16 = smov %s680_s2  ;;  %s678_s17 = smov %s684_s19 }
  0xfb   :  { %14 = sbr.rel (!%p12_p7) target bundleno = 3 (0x3), region = 62 }

// kernel: sfno_forward.19
= control target key start
LH: loop header
LB: loop body
LE: loop exit
PB: predicated region body
PF: predicated region fallthrough
CT: control target
= control target key end

     0   :  { %s612_s18 = smov 0   ;;  %s614_s19 = smov 0   ;;  %s675_s0 = inlined_call_operand.vmem [shape: f32[2,1,1,256], index: 0, kind: input, shape index: {}]   ;;  %s676_s1 = inlined_call_operand.vmem [shape: f32[2,1,1,256], index: 1, kind: input, shape index: {}]   ;;  %s677_s2 = inlined_call_operand.vmem [shape: f32[1,1,256], index: 2, kind: input, shape index: {}]   ;;  %s678_s3 = inlined_call_operand.vmem [shape: f32[1,1,256], index: 3, kind: input, shape index: {}]   ;;  %s679_s4 = inlined_call_operand.vmem [shape: f32[2,1,256], index: 4, kind: output, shape index: {0}]   ;;  %s680_s5 = inlined_call_operand.vmem [shape: f32[2,1,256], index: 5, kind: output, shape index: {1}]  }
   0x1   :  { %s616_s20 = smov 0   ;;  %s618_s21 = smov 0  }
   0x2   :  { %s620_s22 = smov 0  }
   0x3 LB: > { %s25_s23 = sadd.s32 1, %s572_s20  ;;  %s28_s24 = sadd.s32 1, %s576_s21  ;;  %s580_s22 = sphi %s620_s22, %s16_s22   ;;  %s576_s21 = sphi %s618_s21, %s684_s21   ;;  %s572_s20 = sphi %s616_s20, %s683_s20   ;;  %s568_s19 = sphi %s614_s19, %s682_s19   ;;  %s564_s18 = sphi %s612_s18, %s681_s18  }
   0x4   : > { %p26_p0 = scmp.ge.s32.totalorder %s25_s23, 2  ;;  %p495_p1 = scmp.ge.s32.totalorder %s580_s22, 1 }
   0x5   : > { %p240_p2 = scmp.lt.s32.totalorder %s580_s22, 5 }
   0x6   : > { %s686_s23 = smov (%p26_p0, %s25_s23), 0  ;;  %s688_s24 = smov (!%p26_p0, %s28_s24), %s576_s21 }
   0x7   : > { %p241_p3 = pnand %p495_p1, %p240_p2  ;;  %p30_p4 = scmp.ge.s32.totalorder %s688_s24, 2 }
   0x8   : > { %p292_p5 = scmp.lt.s32.totalorder (!%p241_p3), %s564_s18, 1  ;;  %p294_p6 = scmp.lt.s32.totalorder (!%p241_p3), %s568_s19, 1 }
   0x9   : > { %s690_s24 = smov (%p30_p4, %s688_s24), 0  ;;  %244 = sbr.rel (%p241_p3) target bundleno = 27 (0x1b), region = 36 }
  0x10   : > { %s692_s18 = smov (!%p292_p5, %s564_s18), 1  ;;  %s694_s19 = smov (!%p294_p6, %s568_s19), 1 }
  0x11   : > { %s496_s25 = sshll.u32 %s692_s18, 1  ;;  %s308_s29 = scalar_lea.vmem %s677_s2, %s694_s19 }
  0x12   : > { %s297_s26 = sadd.s32 %s496_s25, %s694_s19  ;;  %v328_v0 = vld [vmem:[%s308_s29] sm:$0x1]  ;;  %s311_s13 = scalar_lea.vmem %s678_s3, %s694_s19 }
  0x13   : > { %s298_s7 = scalar_lea.vmem %s675_s0, %s297_s26  ;;  %s305_s10 = scalar_lea.vmem %s676_s1, %s297_s26  ;;  %v329_v3 = vld [vmem:[%s311_s13] sm:$0x1] }
  0x14   : > { %v326_v1 = vld [vmem:[%s298_s7] sm:$0x1]  ;;  %s318_s16 = scalar_lea.vmem %s679_s4, %s297_s26  ;;  %s325_s25 = scalar_lea.vmem %s680_s5, %s297_s26 }
  0x15   : > { %v327_v2 = vld [vmem:[%s305_s10] sm:$0x1]  ;;  %v330_v4 = vmul.f32 %v328_v0, %v326_v1  ;;  %v334_v7 = vmul.f32 %v329_v3, %v326_v1 }
  0x16   : > { %v336_v5 = vmul.f32 %v328_v0, %v327_v2  ;;  %v332_v6 = vmul.f32 %v329_v3, %v327_v2 }
  0x18   : > { %v333_v8 = vsub.f32 %v330_v4, %v332_v6  ;;  %v337_v9 = vadd.f32 %v336_v5, %v334_v7 }
  0x1a   : > { %338 = vst [vmem:[%s318_s16] sm:$0x1] %v333_v8  ;;  %339 = vst [vmem:[%s325_s25] sm:$0x1] %v337_v9 }
  0x1b PF: > { %s16_s22 = sadd.s32 1, %s580_s22   ;;  %s681_s18 = smov %s572_s20 }
  0x1c   : > { %p13_p7 = scmp.ge.s32.totalorder %s16_s22, 6   ;;  %s682_s19 = smov %s576_s21 }
  0x1d   : > { %s683_s20 = smov %s686_s23  ;;  %s684_s21 = smov %s690_s24 }
  0x1e   :  { %15 = sbr.rel (!%p13_p7) target bundleno = 3 (0x3), region = 87 }

// kernel: reverse.2
= control target key start
LH: loop header
LB: loop body
LE: loop exit
PB: predicated region body
PF: predicated region fallthrough
CT: control target
= control target key end

     0   :  { %s440_s0 = inlined_call_operand.vmem [shape: f32[2,1,16,16,9], index: 0, kind: input, shape index: {}]   ;;  %s441_s1 = inlined_call_operand.vmem [shape: f32[2,1,16,16,9], index: 1, kind: output, shape index: {}]  }
   0x1   :  { %v144_v0 = vld [vmem:[%s440_s0 + $0x80] sm:$0xff]  ;;  %v145_v1 = vld [vmem:[%s440_s0 + $0x110] sm:$0xff]  ;;  %v178_v18 = vld [vmem:[%s440_s0 + $0x88] sm:$0xff] }
   0x2   :  { %v147_v2 = vld [vmem:[%s440_s0 + $0x70] sm:$0xff]  ;;  %4 = vst [vmem:[%s441_s1] sm:$0xff] %v144_v0  ;;  %146 = vst [vmem:[%s441_s1 + $0x90] sm:$0xff] %v145_v1  ;;  %v149_v3 = vld [vmem:[%s440_s0 + $0x100] sm:$0xff] }
   0x3   :  { %148 = vst [vmem:[%s441_s1 + $0x10] sm:$0xff] %v147_v2  ;;  %v151_v4 = vld [vmem:[%s440_s0 + $0x60] sm:$0xff]  ;;  %v153_v5 = vld [vmem:[%s440_s0 + $0xf0] sm:$0xff]  ;;  %150 = vst [vmem:[%s441_s1 + $0xa0] sm:$0xff] %v149_v3 }
   0x4   :  { %152 = vst [vmem:[%s441_s1 + $0x20] sm:$0xff] %v151_v4  ;;  %154 = vst [vmem:[%s441_s1 + $0xb0] sm:$0xff] %v153_v5  ;;  %v155_v6 = vld [vmem:[%s440_s0 + $0x50] sm:$0xff]  ;;  %v157_v7 = vld [vmem:[%s440_s0 + $0xe0] sm:$0xff] }
   0x5   :  { %v159_v8 = vld [vmem:[%s440_s0 + $0x40] sm:$0xff]  ;;  %156 = vst [vmem:[%s441_s1 + $0x30] sm:$0xff] %v155_v6  ;;  %158 = vst [vmem:[%s441_s1 + $0xc0] sm:$0xff] %v157_v7  ;;  %v161_v9 = vld [vmem:[%s440_s0 + $0xd0] sm:$0xff] }
   0x6   :  { %160 = vst [vmem:[%s441_s1 + $0x40] sm:$0xff] %v159_v8  ;;  %v163_v10 = vld [vmem:[%s440_s0 + $0x30] sm:$0xff]  ;;  %v165_v11 = vld [vmem:[%s440_s0 + $0xc0] sm:$0xff]  ;;  %162 = vst [vmem:[%s441_s1 + $0xd0] sm:$0xff] %v161_v9 }
   0x7   :  { %164 = vst [vmem:[%s441_s1 + $0x50] sm:$0xff] %v163_v10  ;;  %166 = vst [vmem:[%s441_s1 + $0xe0] sm:$0xff] %v165_v11  ;;  %v167_v12 = vld [vmem:[%s440_s0 + $0x20] sm:$0xff]  ;;  %v169_v13 = vld [vmem:[%s440_s0 + $0xb0] sm:$0xff] }
   0x8   :  { %v171_v14 = vld [vmem:[%s440_s0 + $0x10] sm:$0xff]  ;;  %168 = vst [vmem:[%s441_s1 + $0x60] sm:$0xff] %v167_v12  ;;  %170 = vst [vmem:[%s441_s1 + $0xf0] sm:$0xff] %v169_v13  ;;  %v173_v15 = vld [vmem:[%s440_s0 + $0xa0] sm:$0xff] }
   0x9   :  { %172 = vst [vmem:[%s441_s1 + $0x70] sm:$0xff] %v171_v14  ;;  %v65_v16 = vld [vmem:[%s440_s0] sm:$0xff]  ;;  %v176_v17 = vld [vmem:[%s440_s0 + $0x90] sm:$0xff]  ;;  %174 = vst [vmem:[%s441_s1 + $0x100] sm:$0xff] %v173_v15 }
   0xa   :  { %175 = vst [vmem:[%s441_s1 + $0x80] sm:$0xff] %v65_v16  ;;  %177 = vst [vmem:[%s441_s1 + $0x110] sm:$0xff] %v176_v17  ;;  %v180_v19 = vld [vmem:[%s440_s0 + $0x118] sm:$0xff]  ;;  %v184_v21 = vld [vmem:[%s440_s0 + $0x108] sm:$0xff] }
   0xb   :  { %v182_v20 = vld [vmem:[%s440_s0 + $0x78] sm:$0xff]  ;;  %179 = vst [vmem:[%s441_s1 + $0x8] sm:$0xff] %v178_v18  ;;  %181 = vst [vmem:[%s441_s1 + $0x98] sm:$0xff] %v180_v19  ;;  %v186_v22 = vld [vmem:[%s440_s0 + $0x68] sm:$0xff] }
   0xc   :  { %183 = vst [vmem:[%s441_s1 + $0x18] sm:$0xff] %v182_v20  ;;  %v188_v23 = vld [vmem:[%s440_s0 + $0xf8] sm:$0xff]  ;;  %185 = vst [vmem:[%s441_s1 + $0xa8] sm:$0xff] %v184_v21  ;;  %v192_v25 = vld [vmem:[%s440_s0 + $0xe8] sm:$0xff] }
   0xd   :  { %187 = vst [vmem:[%s441_s1 + $0x28] sm:$0xff] %v186_v22  ;;  %189 = vst [vmem:[%s441_s1 + $0xb8] sm:$0xff] %v188_v23  ;;  %v190_v24 = vld [vmem:[%s440_s0 + $0x58] sm:$0xff]  ;;  %v194_v26 = vld [vmem:[%s440_s0 + $0x48] sm:$0xff] }
   0xe   :  { %191 = vst [vmem:[%s441_s1 + $0x38] sm:$0xff] %v190_v24  ;;  %193 = vst [vmem:[%s441_s1 + $0xc8] sm:$0xff] %v192_v25  ;;  %v196_v27 = vld [vmem:[%s440_s0 + $0xd8] sm:$0xff]  ;;  %v200_v29 = vld [vmem:[%s440_s0 + $0xc8] sm:$0xff] }
   0xf   :  { %195 = vst [vmem:[%s441_s1 + $0x48] sm:$0xff] %v194_v26  ;;  %v198_v28 = vld [vmem:[%s440_s0 + $0x38] sm:$0xff]  ;;  %197 = vst [vmem:[%s441_s1 + $0xd8] sm:$0xff] %v196_v27  ;;  %v202_v30 = vld [vmem:[%s440_s0 + $0x28] sm:$0xff] }
  0x10   :  { %199 = vst [vmem:[%s441_s1 + $0x58] sm:$0xff] %v198_v28  ;;  %201 = vst [vmem:[%s441_s1 + $0xe8] sm:$0xff] %v200_v29  ;;  %v204_v31 = vld [vmem:[%s440_s0 + $0xb8] sm:$0xff]  ;;  %v208_v33 = vld [vmem:[%s440_s0 + $0xa8] sm:$0xff] }
  0x11   :  { %v206_v32 = vld [vmem:[%s440_s0 + $0x18] sm:$0xff]  ;;  %203 = vst [vmem:[%s441_s1 + $0x68] sm:$0xff] %v202_v30  ;;  %205 = vst [vmem:[%s441_s1 + $0xf8] sm:$0xff] %v204_v31  ;;  %v210_v34 = vld [vmem:[%s440_s0 + $0x8] sm:$0xff] }
  0x12   :  { %207 = vst [vmem:[%s441_s1 + $0x78] sm:$0xff] %v206_v32  ;;  %v212_v35 = vld [vmem:[%s440_s0 + $0x98] sm:$0xff]  ;;  %209 = vst [vmem:[%s441_s1 + $0x108] sm:$0xff] %v208_v33 }
  0x13   :  { %211 = vst [vmem:[%s441_s1 + $0x88] sm:$0xff] %v210_v34  ;;  %213 = vst [vmem:[%s441_s1 + $0x118] sm:$0xff] %v212_v35 }

</bundles_post_ra>
